<compile_context>
chip_gen: v7x
topology: tpu7x:2x2x1
jax: 0.10.0
libtpu: 0.0.40
codegen_flags: <defaults>
</compile_context>

<pallas_src>
import functools

import jax
import jax.numpy as jnp
import numpy as np
from jax.experimental import pallas as pl
from jax.experimental.pallas import tpu as pltpu

LEAKY_SLOPE = 0.2
BN_EPS = 1e-5
LANE = 128
TILE_ROWS = 32          # target downsampled (y) rows per grid step


def _round_up(x, m):
    return (x + m - 1) // m * m


def _vmem_limit_bytes():
    # ~3/4 of physical VMEM: ~96 MiB on v5e/v6e (128 MiB), ~48 MiB on v7x (64 MiB).
    try:
        cap = pltpu.get_tpu_info().vmem_capacity_bytes
        return int(min(cap * 3 // 4, 100 * 1024 * 1024))
    except Exception:
        return 48 * 1024 * 1024


# ------------------------------ fused Pallas kernel ------------------------------ #
def _fused_unet_kernel(p_ref, wd_ref, wu_ref,          # inputs
                       z_ref, sum_ref, ssq_ref,        # outputs
                       ybuf_ref,                       # VMEM scratch
                       *, TH, Wo, n_tiles, inner_p, outer_p, wp):
    """One (batch, row-tile) step: leakyrelu(x) -> conv s2 -> relu -> convT s2 (+BN sums).

    p_ref  : (1, TH+3, WP, C4P)      bf16  leakyrelu(x), 4 parity phases packed along K
    wd_ref : (C4P, 4*innerP)         bf16  down-conv weights, K=(phase,cin), N=(tap,inner)
    wu_ref : (innerP, 16*outerP)     bf16  up-conv weights, N=(out-phase, tap, outer)
    z_ref  : (TH, 2, Wo, 2*outerP)   bf16  un-normalized ConvT output, reshape-free layout
    sum_ref/ssq_ref : (1, 8, outerP) f32   per-batch BN partial sums (row 0 used)
    ybuf_ref: (TH+2, WP, innerP)     f32   zero-bordered relu(y) tile
    """
    th = pl.program_id(1)
    c4p = p_ref.shape[-1]

    # ---- down conv: single K-fused matmul over the 4 stride-2 parity phases --------
    lhs = p_ref[0].reshape((TH + 3) * wp, c4p)                          # bf16
    u = jnp.dot(lhs, wd_ref[...], preferred_element_type=jnp.float32)   # MXU, f32 acc
    u3 = u.reshape(TH + 3, wp, 4 * inner_p)

    y = jnp.zeros((TH + 2, Wo, inner_p), jnp.float32)
    for dh in range(2):
        for dw in range(2):
            j = dh * 2 + dw
            y = y + u3[dh:dh + TH + 2, dw:dw + Wo, j * inner_p:(j + 1) * inner_p]
    y = jnp.maximum(y, 0.0)                                              # uprelu

    # ---- zero-bordered y tile: halo column stripes + conditional boundary rows -----
    # TODO(synk): make ybuf bf16 (needs an odd-sublane-offset packed store) to halve
    # the vld bytes feeding the up-conv matmul.
    ybuf_ref[:, 0:1, :] = jnp.zeros((TH + 2, 1, inner_p), jnp.float32)
    ybuf_ref[:, Wo + 1:wp, :] = jnp.zeros((TH + 2, wp - Wo - 1, inner_p), jnp.float32)
    ybuf_ref[:, 1:1 + Wo, :] = y

    @pl.when(th == 0)                       # y row -1 lies outside the feature map
    def _():
        ybuf_ref[0:1, :, :] = jnp.zeros((1, wp, inner_p), jnp.float32)

    @pl.when(th == n_tiles - 1)             # y row Ho lies outside the feature map
    def _():
        ybuf_ref[TH + 1:TH + 2, :, :] = jnp.zeros((1, wp, inner_p), jnp.float32)

    ypad = ybuf_ref[...].astype(jnp.bfloat16).reshape((TH + 2) * wp, inner_p)

    # ---- up conv: single matmul over all 4 output phases x 4 taps -------------------
    v = jnp.dot(ypad, wu_ref[...], preferred_element_type=jnp.float32)
    v4 = v.reshape(TH + 2, wp, 16 * outer_p)

    # TODO(synk): fold the column taps (ew) into K (column-shifted copy of ypad) or
    # shift the accumulator with pltpu.roll to halve the 16 shifted slice-adds below.
    s_tot = jnp.zeros((1, outer_p), jnp.float32)
    ss_tot = jnp.zeros((1, outer_p), jnp.float32)
    zrows = []
    for qh in range(2):                     # output row phase
        parts = []
        for qw in range(2):                 # output col phase
            q = qh * 2 + qw
            zq = jnp.zeros((TH, Wo, outer_p), jnp.float32)
            for eh in range(2):
                for ew in range(2):
                    c0 = (q * 4 + eh * 2 + ew) * outer_p
                    zq = zq + v4[qh + eh:qh + eh + TH,
                                 qw + ew:qw + ew + Wo, c0:c0 + outer_p]
            s_tot = s_tot + jnp.sum(zq, axis=(0, 1)).reshape(1, outer_p)
            ss_tot = ss_tot + jnp.sum(zq * zq, axis=(0, 1)).reshape(1, outer_p)
            parts.append(zq.astype(z_ref.dtype))
        zrows.append(jnp.concatenate(parts, axis=-1))      # lane concat -> (TH, Wo, 2*outerP)
    z_ref[...] = jnp.stack(zrows, axis=1)                  # (TH, 2, Wo, 2*outerP)

    # ---- BatchNorm partial sums: revisited accumulator along the row-tile axis -----
    @pl.when(th == 0)
    def _():
        sum_ref[...] = jnp.zeros_like(sum_ref)
        ssq_ref[...] = jnp.zeros_like(ssq_ref)
    sum_ref[0, 0:1, :] += s_tot
    ssq_ref[0, 0:1, :] += ss_tot


# ------------------------------------ wrapper ------------------------------------ #
@jax.jit
def unet_innermost_forward(x_nchw, params):
    w_down = params["w_down"].astype(jnp.float32)   # (inner_nc, input_nc, 4, 4)
    w_up = params["w_up"].astype(jnp.float32)       # (inner_nc, outer_nc, 4, 4)
    gamma = params["gamma"].astype(jnp.float32)     # (outer_nc,)
    beta = params["beta"].astype(jnp.float32)       # (outer_nc,)

    N, Cin, H, W = x_nchw.shape
    inner_nc = w_down.shape[0]
    outer_nc = w_up.shape[1]
    assert H % 2 == 0 and W % 2 == 0
    Ho, Wo = H // 2, W // 2

    TH = min(TILE_ROWS, Ho)
    assert Ho % TH == 0   # TODO(synk): ragged last row-tile not handled
    n_tiles = Ho // TH
    T = N * n_tiles

    c4 = 4 * Cin
    c4p = _round_up(c4, LANE)
    inner_p = _round_up(inner_nc, LANE)
    outer_p = _round_up(outer_nc, LANE)
    wp = _round_up(Wo + 2, 8)            # tile width incl. column halo, 8-aligned

    # ---- LeakyReLU once, then a vectorized parity-phase split packed along K -------
    # TODO(synk): stream the un-padded NHWC input straight from HBM (pl.ANY + manual
    # halo DMAs) and do the phase split / channel pad in VMEM to remove this extra
    # HBM round-trip entirely.
    x_nhwc = jnp.transpose(x_nchw, (0, 2, 3, 1)).astype(jnp.float32)
    h = jnp.where(x_nhwc >= 0.0, x_nhwc, LEAKY_SLOPE * x_nhwc)
    hpad = jnp.pad(h, ((0, 0), (3, 3), (1, 1), (0, 0)))              # (N, H+6, W+2, Cin)
    phases = [hpad[:, pe::2, po::2, :] for pe in range(2) for po in range(2)]
    ph = jnp.concatenate(phases, axis=-1)                            # (N, Ho+3, Wo+1, 4*Cin)
    ph = jnp.pad(ph, ((0, 0), (0, 0), (0, wp - (Wo + 1)), (0, c4p - c4)))
    ridx = jnp.arange(n_tiles)[:, None] * TH + jnp.arange(TH + 3)[None, :]
    p_all = ph[:, ridx].reshape(T, TH + 3, wp, c4p).astype(jnp.bfloat16)

    # ---- packed, lane-padded, bf16 weight matrices ----------------------------------
    # down conv:  K rows = (phase (pe,po), cin), N cols = (tap (dh,dw), inner)
    wd_rows = []
    for pe in range(2):
        for po in range(2):
            taps = []
            for dh in range(2):
                for dw in range(2):
                    m = jnp.transpose(w_down[:, :, 2 * dh + pe, 2 * dw + po])  # (Cin, inner)
                    taps.append(jnp.pad(m, ((0, 0), (0, inner_p - inner_nc))))
            wd_rows.append(jnp.concatenate(taps, axis=1))            # (Cin, 4*innerP)
    wd_packed = jnp.pad(jnp.concatenate(wd_rows, axis=0),
                        ((0, c4p - c4), (0, 0))).astype(jnp.bfloat16)   # (C4P, 4*innerP)

    # up conv: N cols = (out-phase q=(qh,qw), tap e=(eh,ew), outer); uses W[3-qh-2eh, 3-qw-2ew]
    wu_blocks = []
    for qh in range(2):
        for qw in range(2):
            for eh in range(2):
                for ew in range(2):
                    m = w_up[:, :, 3 - qh - 2 * eh, 3 - qw - 2 * ew]  # (inner, outer)
                    wu_blocks.append(jnp.pad(
                        m, ((0, inner_p - inner_nc), (0, outer_p - outer_nc))))
    wu_packed = jnp.concatenate(wu_blocks, axis=1).astype(jnp.bfloat16)  # (innerP, 16*outerP)

    # ---- fused, tiled, pipelined Pallas call -----------------------------------------
    kernel = functools.partial(
        _fused_unet_kernel, TH=TH, Wo=Wo, n_tiles=n_tiles,
        inner_p=inner_p, outer_p=outer_p, wp=wp)

    # TODO(synk): on v7x, mark wd/wu specs pipeline_mode=pl.Buffered(1) (grid-constant
    # weights) to avoid double-buffering MiB-scale weights out of the 64 MiB VMEM.
    z_ph, bn_sum, bn_ssq = pl.pallas_call(
        kernel,
        out_shape=(
            jax.ShapeDtypeStruct((N * Ho, 2, Wo, 2 * outer_p), jnp.bfloat16),
            jax.ShapeDtypeStruct((N, 8, outer_p), jnp.float32),
            jax.ShapeDtypeStruct((N, 8, outer_p), jnp.float32),
        ),
        grid=(N, n_tiles),
        in_specs=[
            pl.BlockSpec((1, TH + 3, wp, c4p), lambda n, t: (n * n_tiles + t, 0, 0, 0)),
            pl.BlockSpec((c4p, 4 * inner_p), lambda n, t: (0, 0)),
            pl.BlockSpec((inner_p, 16 * outer_p), lambda n, t: (0, 0)),
        ],
        out_specs=(
            pl.BlockSpec((TH, 2, Wo, 2 * outer_p), lambda n, t: (n * n_tiles + t, 0, 0, 0)),
            pl.BlockSpec((1, 8, outer_p), lambda n, t: (n, 0, 0)),
            pl.BlockSpec((1, 8, outer_p), lambda n, t: (n, 0, 0)),
        ),
        scratch_shapes=[pltpu.VMEM((TH + 2, wp, inner_p), jnp.float32)],
        compiler_params=pltpu.CompilerParams(
            # batch axis is independent (megacore on v7x); the row-tile axis carries the
            # per-batch BN partial-sum accumulation -> "arbitrary".
            dimension_semantics=("parallel", "arbitrary"),
            vmem_limit_bytes=_vmem_limit_bytes(),
        ),
    )(p_all, wd_packed, wu_packed)

    # ---- epilogue: finalize BN (global stats), affine, skip-concat, NCHW -------------
    # TODO(synk): fold this into a second lightweight Pallas pass writing NCHW directly.
    count = jnp.float32(N * H * W)
    mean = jnp.sum(bn_sum[:, 0, :], axis=0) / count
    var = jnp.sum(bn_ssq[:, 0, :], axis=0) / count - mean * mean   # biased (training BN)
    inv = jax.lax.rsqrt(var + BN_EPS)

    z_full = z_ph.reshape(N, H, W, outer_p)     # free: phase un-interleave by layout
    z32 = z_full[..., :outer_nc].astype(jnp.float32)
    zn = gamma * (z32 - mean[:outer_nc]) * inv[:outer_nc] + beta
    out_nchw = jnp.transpose(zn, (0, 3, 1, 2))
    return jnp.concatenate([x_nchw.astype(jnp.float32), out_nchw], axis=1)


# ------------------------------ pure-JAX reference ------------------------------- #
def reference_forward(x, params):
    w_down, w_up = params["w_down"], params["w_up"]
    gamma, beta = params["gamma"], params["beta"]
    h = jnp.where(x >= 0.0, x, LEAKY_SLOPE * x)
    y = jax.lax.conv_general_dilated(h, w_down, (2, 2), ((1, 1), (1, 1)),
                                     dimension_numbers=("NCHW", "OIHW", "NCHW"))
    y = jnp.maximum(y, 0.0)
    w_t = jnp.transpose(w_up, (1, 0, 2, 3))[:, :, ::-1, ::-1]
    z = jax.lax.conv_general_dilated(y, w_t, (1, 1), ((2, 2), (2, 2)),
                                     lhs_dilation=(2, 2),
                                     dimension_numbers=("NCHW", "OIHW", "NCHW"))
    mean = z.mean(axis=(0, 2, 3), keepdims=True)
    var = ((z - mean) ** 2).mean(axis=(0, 2, 3), keepdims=True)
    zn = (gamma.reshape(1, -1, 1, 1) * (z - mean) * jax.lax.rsqrt(var + BN_EPS)
          + beta.reshape(1, -1, 1, 1))
    return jnp.concatenate([x, zn], axis=1)


# --------------------------------------- main ------------------------------------- #
if __name__ == "__main__":
    N, input_nc, H, W = 2, 4, 16, 16
    outer_nc, inner_nc = input_nc, 8           # input_nc defaults to outer_nc

    key = jax.random.PRNGKey(0)
    kx, kd, ku, kg, kb = jax.random.split(key, 5)
    x = jax.random.normal(kx, (N, input_nc, H, W), jnp.float32)

    params = {
        "w_down": 0.1 * jax.random.normal(kd, (inner_nc, input_nc, 4, 4), jnp.float32),
        "w_up":   0.1 * jax.random.normal(ku, (inner_nc, outer_nc, 4, 4), jnp.float32),
        "gamma":  1.0 + 0.1 * jax.random.normal(kg, (outer_nc,), jnp.float32),
        "beta":   0.1 * jax.random.normal(kb, (outer_nc,), jnp.float32),
    }

    out = jax.block_until_ready(unet_innermost_forward(x, params))
    ref = jax.block_until_ready(reference_forward(x, params))

    assert out.shape == (N, input_nc + outer_nc, H, W), out.shape
    np.testing.assert_allclose(np.asarray(out), np.asarray(ref), atol=5e-2, rtol=5e-2)

    print("KERNEL_OK")
</pallas_src>

<mosaic_0001>
module attributes {stable_mosaic.version = 11 : i64} {
  func.func @_fused_unet_kernel(%arg0: i32, %arg1: i32, %arg2: memref<1x11x16x128xbf16, #tpu.memory_space<vmem>>, %arg3: memref<128x512xbf16, #tpu.memory_space<vmem>>, %arg4: memref<128x2048xbf16, #tpu.memory_space<vmem>>, %arg5: memref<8x2x8x256xbf16, #tpu.memory_space<vmem>>, %arg6: memref<1x8x128xf32, #tpu.memory_space<vmem>>, %arg7: memref<1x8x128xf32, #tpu.memory_space<vmem>>, %arg8: memref<10x16x128xf32, #tpu.memory_space<vmem>>) attributes {dimension_semantics = [#tpu.dimension_semantics<parallel>, #tpu.dimension_semantics<arbitrary>], iteration_bounds = array<i64: 2, 1>, scalar_prefetch = 0 : i64, scratch_operands = 1 : i64, tpu.core_type = #tpu.core_type<tc>, window_params = [{transform_indices = @transform_0, window_bounds = array<i64: 1, 11, 16, 128>}, {pipeline_mode = #tpu.pipeline_mode<synchronous>, transform_indices = @transform_1, window_bounds = array<i64: 128, 512>}, {pipeline_mode = #tpu.pipeline_mode<synchronous>, transform_indices = @transform_2, window_bounds = array<i64: 128, 2048>}, {transform_indices = @transform_3, window_bounds = array<i64: 8, 2, 8, 256>}, {transform_indices = @transform_4, window_bounds = array<i64: 1, 8, 128>}, {transform_indices = @transform_5, window_bounds = array<i64: 1, 8, 128>}]} {
    %c0 = arith.constant 0 : index
    %c0_0 = arith.constant 0 : index
    %c0_1 = arith.constant 0 : index
    %c0_2 = arith.constant 0 : index
    %0 = vector.load %arg2[%c0, %c0_0, %c0_1, %c0_2] : memref<1x11x16x128xbf16, #tpu.memory_space<vmem>>, vector<1x11x16x128xbf16>
    %1 = vector.shape_cast %0 : vector<1x11x16x128xbf16> to vector<11x16x128xbf16>
    %2 = vector.shape_cast %1 : vector<11x16x128xbf16> to vector<176x128xbf16>
    %c0_3 = arith.constant 0 : index
    %c0_4 = arith.constant 0 : index
    %3 = vector.load %arg3[%c0_3, %c0_4] : memref<128x512xbf16, #tpu.memory_space<vmem>>, vector<128x512xbf16>
    %cst = arith.constant dense<0.000000e+00> : vector<176x512xf32>
    %4 = tpu.matmul %2, %3, %cst {dimension_numbers = #tpu.dot_dimension_numbers<[1], [0], [0], [1], [0, 0, 1, 1], [], []>} : vector<176x128xbf16>, vector<128x512xbf16>, vector<176x512xf32> -> vector<176x512xf32>
    %5 = vector.shape_cast %4 : vector<176x512xf32> to vector<11x16x512xf32>
    %cst_5 = arith.constant 0.000000e+00 : f32
    %6 = vector.broadcast %cst_5 : f32 to vector<10x8x128xf32>
    %7 = vector.extract_strided_slice %5 {offsets = [0, 0, 0], sizes = [10, 8, 128], strides = [1, 1, 1]} : vector<11x16x512xf32> to vector<10x8x128xf32>
    %8 = arith.addf %6, %7 : vector<10x8x128xf32>
    %9 = vector.extract_strided_slice %5 {offsets = [0, 1, 128], sizes = [10, 8, 128], strides = [1, 1, 1]} : vector<11x16x512xf32> to vector<10x8x128xf32>
    %10 = arith.addf %8, %9 : vector<10x8x128xf32>
    %11 = vector.extract_strided_slice %5 {offsets = [1, 0, 256], sizes = [10, 8, 128], strides = [1, 1, 1]} : vector<11x16x512xf32> to vector<10x8x128xf32>
    %12 = arith.addf %10, %11 : vector<10x8x128xf32>
    %13 = vector.extract_strided_slice %5 {offsets = [1, 1, 384], sizes = [10, 8, 128], strides = [1, 1, 1]} : vector<11x16x512xf32> to vector<10x8x128xf32>
    %14 = arith.addf %12, %13 : vector<10x8x128xf32>
    %cst_6 = arith.constant 0.000000e+00 : f32
    %15 = vector.broadcast %cst_6 : f32 to vector<10x8x128xf32>
    %16 = arith.maximumf %14, %15 : vector<10x8x128xf32>
    %cst_7 = arith.constant 0.000000e+00 : f32
    %17 = vector.broadcast %cst_7 : f32 to vector<10x1x128xf32>
    %c0_8 = arith.constant 0 : index
    %c0_9 = arith.constant 0 : index
    %c0_10 = arith.constant 0 : index
    %18 = vector.load %arg8[%c0_8, %c0_9, %c0_10] : memref<10x16x128xf32, #tpu.memory_space<vmem>>, vector<10x1x128xf32>
    tpu.vector_store %arg8[%c0_8, %c0_9, %c0_10], %17 {strides = array<i32>} : memref<10x16x128xf32, #tpu.memory_space<vmem>>, vector<10x1x128xf32>,
    %cst_11 = arith.constant 0.000000e+00 : f32
    %19 = vector.broadcast %cst_11 : f32 to vector<10x7x128xf32>
    %c0_12 = arith.constant 0 : index
    %c9 = arith.constant 9 : index
    %c0_13 = arith.constant 0 : index
    %20 = vector.load %arg8[%c0_12, %c9, %c0_13] : memref<10x16x128xf32, #tpu.memory_space<vmem>>, vector<10x7x128xf32>
    tpu.vector_store %arg8[%c0_12, %c9, %c0_13], %19 {strides = array<i32>} : memref<10x16x128xf32, #tpu.memory_space<vmem>>, vector<10x7x128xf32>,
    %c0_14 = arith.constant 0 : index
    %c1 = arith.constant 1 : index
    %c0_15 = arith.constant 0 : index
    %21 = vector.load %arg8[%c0_14, %c1, %c0_15] : memref<10x16x128xf32, #tpu.memory_space<vmem>>, vector<10x8x128xf32>
    tpu.vector_store %arg8[%c0_14, %c1, %c0_15], %16 {strides = array<i32>} : memref<10x16x128xf32, #tpu.memory_space<vmem>>, vector<10x8x128xf32>,
    %c0_i32 = arith.constant 0 : i32
    %22 = arith.cmpi eq, %arg1, %c0_i32 : i32
    %23 = arith.extui %22 : i1 to i32
    %c0_i32_16 = arith.constant 0 : i32
    %24 = arith.cmpi ne, %23, %c0_i32_16 : i32
    scf.if %24 {
      %cst_57 = arith.constant 0.000000e+00 : f32
      %125 = vector.broadcast %cst_57 : f32 to vector<1x16x128xf32>
      %c0_58 = arith.constant 0 : index
      %c0_59 = arith.constant 0 : index
      %c0_60 = arith.constant 0 : index
      %126 = vector.load %arg8[%c0_58, %c0_59, %c0_60] : memref<10x16x128xf32, #tpu.memory_space<vmem>>, vector<1x16x128xf32>
      tpu.vector_store %arg8[%c0_58, %c0_59, %c0_60], %125 {strides = array<i32>} : memref<10x16x128xf32, #tpu.memory_space<vmem>>, vector<1x16x128xf32>,
    } else {
    }
    %c0_i32_17 = arith.constant 0 : i32
    %25 = arith.cmpi eq, %arg1, %c0_i32_17 : i32
    %26 = arith.extui %25 : i1 to i32
    %c0_i32_18 = arith.constant 0 : i32
    %27 = arith.cmpi ne, %26, %c0_i32_18 : i32
    scf.if %27 {
      %cst_57 = arith.constant 0.000000e+00 : f32
      %125 = vector.broadcast %cst_57 : f32 to vector<1x16x128xf32>
      %c9_58 = arith.constant 9 : index
      %c0_59 = arith.constant 0 : index
      %c0_60 = arith.constant 0 : index
      %126 = vector.load %arg8[%c9_58, %c0_59, %c0_60] : memref<10x16x128xf32, #tpu.memory_space<vmem>>, vector<1x16x128xf32>
      tpu.vector_store %arg8[%c9_58, %c0_59, %c0_60], %125 {strides = array<i32>} : memref<10x16x128xf32, #tpu.memory_space<vmem>>, vector<1x16x128xf32>,
    } else {
    }
    %c0_19 = arith.constant 0 : index
    %c0_20 = arith.constant 0 : index
    %c0_21 = arith.constant 0 : index
    %28 = vector.load %arg8[%c0_19, %c0_20, %c0_21] : memref<10x16x128xf32, #tpu.memory_space<vmem>>, vector<10x16x128xf32>
    %29 = arith.truncf %28 : vector<10x16x128xf32> to vector<10x16x128xbf16>
    %30 = vector.shape_cast %29 : vector<10x16x128xbf16> to vector<160x128xbf16>
    %c0_22 = arith.constant 0 : index
    %c0_23 = arith.constant 0 : index
    %31 = vector.load %arg4[%c0_22, %c0_23] : memref<128x2048xbf16, #tpu.memory_space<vmem>>, vector<128x2048xbf16>
    %cst_24 = arith.constant dense<0.000000e+00> : vector<160x2048xf32>
    %32 = tpu.matmul %30, %31, %cst_24 {dimension_numbers = #tpu.dot_dimension_numbers<[1], [0], [0], [1], [0, 0, 1, 1], [], []>} : vector<160x128xbf16>, vector<128x2048xbf16>, vector<160x2048xf32> -> vector<160x2048xf32>
    %33 = vector.shape_cast %32 : vector<160x2048xf32> to vector<10x16x2048xf32>
    %cst_25 = arith.constant 0.000000e+00 : f32
    %34 = vector.broadcast %cst_25 : f32 to vector<1x128xf32>
    %cst_26 = arith.constant 0.000000e+00 : f32
    %35 = vector.broadcast %cst_26 : f32 to vector<1x128xf32>
    %cst_27 = arith.constant 0.000000e+00 : f32
    %36 = vector.broadcast %cst_27 : f32 to vector<8x8x128xf32>
    %37 = vector.extract_strided_slice %33 {offsets = [0, 0, 0], sizes = [8, 8, 128], strides = [1, 1, 1]} : vector<10x16x2048xf32> to vector<8x8x128xf32>
    %38 = arith.addf %36, %37 : vector<8x8x128xf32>
    %39 = vector.extract_strided_slice %33 {offsets = [0, 1, 128], sizes = [8, 8, 128], strides = [1, 1, 1]} : vector<10x16x2048xf32> to vector<8x8x128xf32>
    %40 = arith.addf %38, %39 : vector<8x8x128xf32>
    %41 = vector.extract_strided_slice %33 {offsets = [1, 0, 256], sizes = [8, 8, 128], strides = [1, 1, 1]} : vector<10x16x2048xf32> to vector<8x8x128xf32>
    %42 = arith.addf %40, %41 : vector<8x8x128xf32>
    %43 = vector.extract_strided_slice %33 {offsets = [1, 1, 384], sizes = [8, 8, 128], strides = [1, 1, 1]} : vector<10x16x2048xf32> to vector<8x8x128xf32>
    %44 = arith.addf %42, %43 : vector<8x8x128xf32>
    %cst_28 = arith.constant dense<0.000000e+00> : vector<128xf32>
    %45 = vector.multi_reduction <add>, %44, %cst_28 [0, 1] : vector<8x8x128xf32> to vector<128xf32>
    %46 = vector.shape_cast %45 : vector<128xf32> to vector<1x128xf32>
    %47 = arith.addf %34, %46 : vector<1x128xf32>
    %48 = arith.mulf %44, %44 : vector<8x8x128xf32>
    %cst_29 = arith.constant dense<0.000000e+00> : vector<128xf32>
    %49 = vector.multi_reduction <add>, %48, %cst_29 [0, 1] : vector<8x8x128xf32> to vector<128xf32>
    %50 = vector.shape_cast %49 : vector<128xf32> to vector<1x128xf32>
    %51 = arith.addf %35, %50 : vector<1x128xf32>
    %52 = arith.truncf %44 : vector<8x8x128xf32> to vector<8x8x128xbf16>
    %cst_30 = arith.constant 0.000000e+00 : f32
    %53 = vector.broadcast %cst_30 : f32 to vector<8x8x128xf32>
    %54 = vector.extract_strided_slice %33 {offsets = [0, 1, 512], sizes = [8, 8, 128], strides = [1, 1, 1]} : vector<10x16x2048xf32> to vector<8x8x128xf32>
    %55 = arith.addf %53, %54 : vector<8x8x128xf32>
    %56 = vector.extract_strided_slice %33 {offsets = [0, 2, 640], sizes = [8, 8, 128], strides = [1, 1, 1]} : vector<10x16x2048xf32> to vector<8x8x128xf32>
    %57 = arith.addf %55, %56 : vector<8x8x128xf32>
    %58 = vector.extract_strided_slice %33 {offsets = [1, 1, 768], sizes = [8, 8, 128], strides = [1, 1, 1]} : vector<10x16x2048xf32> to vector<8x8x128xf32>
    %59 = arith.addf %57, %58 : vector<8x8x128xf32>
    %60 = vector.extract_strided_slice %33 {offsets = [1, 2, 896], sizes = [8, 8, 128], strides = [1, 1, 1]} : vector<10x16x2048xf32> to vector<8x8x128xf32>
    %61 = arith.addf %59, %60 : vector<8x8x128xf32>
    %cst_31 = arith.constant dense<0.000000e+00> : vector<128xf32>
    %62 = vector.multi_reduction <add>, %61, %cst_31 [0, 1] : vector<8x8x128xf32> to vector<128xf32>
    %63 = vector.shape_cast %62 : vector<128xf32> to vector<1x128xf32>
    %64 = arith.addf %47, %63 : vector<1x128xf32>
    %65 = arith.mulf %61, %61 : vector<8x8x128xf32>
    %cst_32 = arith.constant dense<0.000000e+00> : vector<128xf32>
    %66 = vector.multi_reduction <add>, %65, %cst_32 [0, 1] : vector<8x8x128xf32> to vector<128xf32>
    %67 = vector.shape_cast %66 : vector<128xf32> to vector<1x128xf32>
    %68 = arith.addf %51, %67 : vector<1x128xf32>
    %69 = arith.truncf %61 : vector<8x8x128xf32> to vector<8x8x128xbf16>
    %70 = tpu.concatenate %52, %69 in 2 : vector<8x8x128xbf16>, vector<8x8x128xbf16> -> vector<8x8x256xbf16>
    %cst_33 = arith.constant 0.000000e+00 : f32
    %71 = vector.broadcast %cst_33 : f32 to vector<8x8x128xf32>
    %72 = vector.extract_strided_slice %33 {offsets = [1, 0, 1024], sizes = [8, 8, 128], strides = [1, 1, 1]} : vector<10x16x2048xf32> to vector<8x8x128xf32>
    %73 = arith.addf %71, %72 : vector<8x8x128xf32>
    %74 = vector.extract_strided_slice %33 {offsets = [1, 1, 1152], sizes = [8, 8, 128], strides = [1, 1, 1]} : vector<10x16x2048xf32> to vector<8x8x128xf32>
    %75 = arith.addf %73, %74 : vector<8x8x128xf32>
    %76 = vector.extract_strided_slice %33 {offsets = [2, 0, 1280], sizes = [8, 8, 128], strides = [1, 1, 1]} : vector<10x16x2048xf32> to vector<8x8x128xf32>
    %77 = arith.addf %75, %76 : vector<8x8x128xf32>
    %78 = vector.extract_strided_slice %33 {offsets = [2, 1, 1408], sizes = [8, 8, 128], strides = [1, 1, 1]} : vector<10x16x2048xf32> to vector<8x8x128xf32>
    %79 = arith.addf %77, %78 : vector<8x8x128xf32>
    %cst_34 = arith.constant dense<0.000000e+00> : vector<128xf32>
    %80 = vector.multi_reduction <add>, %79, %cst_34 [0, 1] : vector<8x8x128xf32> to vector<128xf32>
    %81 = vector.shape_cast %80 : vector<128xf32> to vector<1x128xf32>
    %82 = arith.addf %64, %81 : vector<1x128xf32>
    %83 = arith.mulf %79, %79 : vector<8x8x128xf32>
    %cst_35 = arith.constant dense<0.000000e+00> : vector<128xf32>
    %84 = vector.multi_reduction <add>, %83, %cst_35 [0, 1] : vector<8x8x128xf32> to vector<128xf32>
    %85 = vector.shape_cast %84 : vector<128xf32> to vector<1x128xf32>
    %86 = arith.addf %68, %85 : vector<1x128xf32>
    %87 = arith.truncf %79 : vector<8x8x128xf32> to vector<8x8x128xbf16>
    %cst_36 = arith.constant 0.000000e+00 : f32
    %88 = vector.broadcast %cst_36 : f32 to vector<8x8x128xf32>
    %89 = vector.extract_strided_slice %33 {offsets = [1, 1, 1536], sizes = [8, 8, 128], strides = [1, 1, 1]} : vector<10x16x2048xf32> to vector<8x8x128xf32>
    %90 = arith.addf %88, %89 : vector<8x8x128xf32>
    %91 = vector.extract_strided_slice %33 {offsets = [1, 2, 1664], sizes = [8, 8, 128], strides = [1, 1, 1]} : vector<10x16x2048xf32> to vector<8x8x128xf32>
    %92 = arith.addf %90, %91 : vector<8x8x128xf32>
    %93 = vector.extract_strided_slice %33 {offsets = [2, 1, 1792], sizes = [8, 8, 128], strides = [1, 1, 1]} : vector<10x16x2048xf32> to vector<8x8x128xf32>
    %94 = arith.addf %92, %93 : vector<8x8x128xf32>
    %95 = vector.extract_strided_slice %33 {offsets = [2, 2, 1920], sizes = [8, 8, 128], strides = [1, 1, 1]} : vector<10x16x2048xf32> to vector<8x8x128xf32>
    %96 = arith.addf %94, %95 : vector<8x8x128xf32>
    %cst_37 = arith.constant dense<0.000000e+00> : vector<128xf32>
    %97 = vector.multi_reduction <add>, %96, %cst_37 [0, 1] : vector<8x8x128xf32> to vector<128xf32>
    %98 = vector.shape_cast %97 : vector<128xf32> to vector<1x128xf32>
    %99 = arith.addf %82, %98 : vector<1x128xf32>
    %100 = arith.mulf %96, %96 : vector<8x8x128xf32>
    %cst_38 = arith.constant dense<0.000000e+00> : vector<128xf32>
    %101 = vector.multi_reduction <add>, %100, %cst_38 [0, 1] : vector<8x8x128xf32> to vector<128xf32>
    %102 = vector.shape_cast %101 : vector<128xf32> to vector<1x128xf32>
    %103 = arith.addf %86, %102 : vector<1x128xf32>
    %104 = arith.truncf %96 : vector<8x8x128xf32> to vector<8x8x128xbf16>
    %105 = tpu.concatenate %87, %104 in 2 : vector<8x8x128xbf16>, vector<8x8x128xbf16> -> vector<8x8x256xbf16>
    %106 = vector.shape_cast %70 : vector<8x8x256xbf16> to vector<8x1x8x256xbf16>
    %107 = vector.shape_cast %105 : vector<8x8x256xbf16> to vector<8x1x8x256xbf16>
    %108 = tpu.concatenate %106, %107 in 1 : vector<8x1x8x256xbf16>, vector<8x1x8x256xbf16> -> vector<8x2x8x256xbf16>
    %c0_39 = arith.constant 0 : index
    %c0_40 = arith.constant 0 : index
    %c0_41 = arith.constant 0 : index
    %c0_42 = arith.constant 0 : index
    %109 = vector.load %arg5[%c0_39, %c0_40, %c0_41, %c0_42] : memref<8x2x8x256xbf16, #tpu.memory_space<vmem>>, vector<8x2x8x256xbf16>
    tpu.vector_store %arg5[%c0_39, %c0_40, %c0_41, %c0_42], %108 {strides = array<i32>} : memref<8x2x8x256xbf16, #tpu.memory_space<vmem>>, vector<8x2x8x256xbf16>,
    %c0_i32_43 = arith.constant 0 : i32
    %110 = arith.cmpi eq, %arg1, %c0_i32_43 : i32
    %111 = arith.extui %110 : i1 to i32
    %c0_i32_44 = arith.constant 0 : i32
    %112 = arith.cmpi ne, %111, %c0_i32_44 : i32
    scf.if %112 {
      %cst_57 = arith.constant 0.000000e+00 : f32
      %125 = vector.broadcast %cst_57 : f32 to vector<1x8x128xf32>
      %c0_58 = arith.constant 0 : index
      %c0_59 = arith.constant 0 : index
      %c0_60 = arith.constant 0 : index
      %126 = vector.load %arg6[%c0_58, %c0_59, %c0_60] : memref<1x8x128xf32, #tpu.memory_space<vmem>>, vector<1x8x128xf32>
      tpu.vector_store %arg6[%c0_58, %c0_59, %c0_60], %125 {strides = array<i32>} : memref<1x8x128xf32, #tpu.memory_space<vmem>>, vector<1x8x128xf32>,
      %cst_61 = arith.constant 0.000000e+00 : f32
      %127 = vector.broadcast %cst_61 : f32 to vector<1x8x128xf32>
      %c0_62 = arith.constant 0 : index
      %c0_63 = arith.constant 0 : index
      %c0_64 = arith.constant 0 : index
      %128 = vector.load %arg7[%c0_62, %c0_63, %c0_64] : memref<1x8x128xf32, #tpu.memory_space<vmem>>, vector<1x8x128xf32>
      tpu.vector_store %arg7[%c0_62, %c0_63, %c0_64], %127 {strides = array<i32>} : memref<1x8x128xf32, #tpu.memory_space<vmem>>, vector<1x8x128xf32>,
    } else {
    }
    %c0_45 = arith.constant 0 : index
    %c0_46 = arith.constant 0 : index
    %c0_47 = arith.constant 0 : index
    %113 = vector.load %arg6[%c0_45, %c0_46, %c0_47] : memref<1x8x128xf32, #tpu.memory_space<vmem>>, vector<1x1x128xf32>
    %114 = vector.shape_cast %113 : vector<1x1x128xf32> to vector<1x128xf32>
    %115 = arith.addf %114, %99 : vector<1x128xf32>
    %c0_48 = arith.constant 0 : index
    %c0_49 = arith.constant 0 : index
    %c0_50 = arith.constant 0 : index
    %116 = vector.load %arg6[%c0_48, %c0_49, %c0_50] : memref<1x8x128xf32, #tpu.memory_space<vmem>>, vector<1x1x128xf32>
    %117 = vector.shape_cast %116 : vector<1x1x128xf32> to vector<1x128xf32>
    %118 = vector.shape_cast %115 : vector<1x128xf32> to vector<1x1x128xf32>
    tpu.vector_store %arg6[%c0_48, %c0_49, %c0_50], %118 {strides = array<i32>} : memref<1x8x128xf32, #tpu.memory_space<vmem>>, vector<1x1x128xf32>,
    %c0_51 = arith.constant 0 : index
    %c0_52 = arith.constant 0 : index
    %c0_53 = arith.constant 0 : index
    %119 = vector.load %arg7[%c0_51, %c0_52, %c0_53] : memref<1x8x128xf32, #tpu.memory_space<vmem>>, vector<1x1x128xf32>
    %120 = vector.shape_cast %119 : vector<1x1x128xf32> to vector<1x128xf32>
    %121 = arith.addf %120, %103 : vector<1x128xf32>
    %c0_54 = arith.constant 0 : index
    %c0_55 = arith.constant 0 : index
    %c0_56 = arith.constant 0 : index
    %122 = vector.load %arg7[%c0_54, %c0_55, %c0_56] : memref<1x8x128xf32, #tpu.memory_space<vmem>>, vector<1x1x128xf32>
    %123 = vector.shape_cast %122 : vector<1x1x128xf32> to vector<1x128xf32>
    %124 = vector.shape_cast %121 : vector<1x128xf32> to vector<1x1x128xf32>
    tpu.vector_store %arg7[%c0_54, %c0_55, %c0_56], %124 {strides = array<i32>} : memref<1x8x128xf32, #tpu.memory_space<vmem>>, vector<1x1x128xf32>,
    return
  }
  func.func @transform_0(%arg0: i32, %arg1: i32) -> (i32, i32, i32, i32) {
    %c1_i32 = arith.constant 1 : i32
    %0 = arith.muli %arg0, %c1_i32 : i32
    %1 = arith.addi %0, %arg1 : i32
    %c0_i32 = arith.constant 0 : i32
    %c0_i32_0 = arith.constant 0 : i32
    %c0_i32_1 = arith.constant 0 : i32
    %c0_i32_2 = arith.constant 0 : i32
    return %1, %c0_i32, %c0_i32_0, %c0_i32_1 : i32, i32, i32, i32
  }
  func.func @transform_1(%arg0: i32, %arg1: i32) -> (i32, i32) {
    %c0_i32 = arith.constant 0 : i32
    %c0_i32_0 = arith.constant 0 : i32
    %c0_i32_1 = arith.constant 0 : i32
    return %c0_i32, %c0_i32_0 : i32, i32
  }
  func.func @transform_2(%arg0: i32, %arg1: i32) -> (i32, i32) {
    %c0_i32 = arith.constant 0 : i32
    %c0_i32_0 = arith.constant 0 : i32
    %c0_i32_1 = arith.constant 0 : i32
    return %c0_i32, %c0_i32_0 : i32, i32
  }
  func.func @transform_3(%arg0: i32, %arg1: i32) -> (i32, i32, i32, i32) {
    %c1_i32 = arith.constant 1 : i32
    %0 = arith.muli %arg0, %c1_i32 : i32
    %1 = arith.addi %0, %arg1 : i32
    %c0_i32 = arith.constant 0 : i32
    %c0_i32_0 = arith.constant 0 : i32
    %c0_i32_1 = arith.constant 0 : i32
    %c0_i32_2 = arith.constant 0 : i32
    return %1, %c0_i32, %c0_i32_0, %c0_i32_1 : i32, i32, i32, i32
  }
  func.func @transform_4(%arg0: i32, %arg1: i32) -> (i32, i32, i32) {
    %c0_i32 = arith.constant 0 : i32
    %c0_i32_0 = arith.constant 0 : i32
    %c0_i32_1 = arith.constant 0 : i32
    return %arg0, %c0_i32, %c0_i32_0 : i32, i32, i32
  }
  func.func @transform_5(%arg0: i32, %arg1: i32) -> (i32, i32, i32) {
    %c0_i32 = arith.constant 0 : i32
    %c0_i32_0 = arith.constant 0 : i32
    %c0_i32_1 = arith.constant 0 : i32
    return %arg0, %c0_i32, %c0_i32_0 : i32, i32, i32
  }
}

</mosaic_0001>

<bundles_post_ra>
// kernel: unet_innermost_forward.1
= control target key start
LH: loop header
LB: loop body
LE: loop exit
PB: predicated region body
PF: predicated region fallthrough
CT: control target
= control target key end

     0   :  { %s4476_s18 = smov 0   ;;  %s4478_s19 = smov 0   ;;  %s5541_s0 = inlined_call_operand.vmem [shape: bf16[2,11,16,128], index: 0, kind: input, shape index: {}]   ;;  %s5542_s1 = inlined_call_operand.vmem [shape: bf16[128,512], index: 1, kind: input, shape index: {}]   ;;  %s5543_s2 = inlined_call_operand.vmem [shape: bf16[128,2048], index: 2, kind: input, shape index: {}]   ;;  %s5544_s3 = inlined_call_operand.vmem [shape: bf16[16,2,8,256], index: 3, kind: output, shape index: {0}]   ;;  %s5545_s4 = inlined_call_operand.vmem [shape: f32[2,8,128], index: 4, kind: output, shape index: {1}]   ;;  %s5546_s5 = inlined_call_operand.vmem [shape: f32[2,8,128], index: 5, kind: output, shape index: {2}]  }
   0x1   :  { %s4480_s20 = smov 0  }
   0x2 LB: > { %s28_s21 = sadd.s32 1, %s4437_s19  ;;  %p4135_p0 = scmp.ge.s32.totalorder %s4441_s20, 1  ;;  %s4441_s20 = sphi %s4480_s20, %s16_s20   ;;  %s4437_s19 = sphi %s4478_s19, %s5549_s19   ;;  %s4433_s18 = sphi %s4476_s18, %s5548_s18  }
   0x3   : > { %p30_p1 = scmp.ge.s32.totalorder %s28_s21, 2  ;;  %p210_p2 = scmp.lt.s32.totalorder %s4441_s20, 3 }
   0x5   : > { %s5551_s21 = smov (%p30_p1, %s28_s21), 0  ;;  %p211_p3 = pnand %p4135_p0, %p210_p2 }
   0x6   : > { %v4359_v0 = vld [vmem:[%s5542_s1 + $0x4] ss:$16 sps:$4 sm:$0xff] (!%p211_p3)   ;;  %v4361_v1 = vld [vmem:[%s5542_s1 + $0xc] ss:$16 sps:$4 sm:$0xff] (!%p211_p3)   ;;  %v4443_v2 = vmov (!%p211_p3), 0   ;;  %p250_p4 = scmp.lt.s32.totalorder (!%p211_p3), %s4433_s18, 1 }
   0x7   : > { %214 = sbr.rel (%p211_p3) target bundleno = 836 (0x344), region = 32  ;;  %586 = vmatprep.mubr.bf16.mxu0 (!%p211_p3), %v4443_v2  ;;  %715 = vmatprep.mubr.bf16.mxu1 (!%p211_p3), %v4443_v2  ;;  %v4363_v3 = vld [vmem:[%s5542_s1] ss:$16 sps:$4 sm:$0xff] (!%p211_p3)   ;;  %v4364_v4 = vld [vmem:[%s5542_s1 + $0x8] ss:$16 sps:$4 sm:$0xff] (!%p211_p3)   ;;  %vm842_vm0 = vcmask (!%p211_p3), 1046528  }
   0x8   : > { %554 = vmatprep.subr.bf16.mxu0 (!%p211_p3), %v4359_v0  ;;  %683 = vmatprep.subr.bf16.mxu1 (!%p211_p3), %v4361_v1  ;;  %v4365_v5 = vld [vmem:[%s5542_s1 + $0x24] ss:$16 sps:$4 sm:$0xff] (!%p211_p3)   ;;  %v4367_v6 = vld [vmem:[%s5542_s1 + $0x2c] ss:$16 sps:$4 sm:$0xff] (!%p211_p3)   ;;  %v4369_v7 = vld [vmem:[%s5542_s1 + $0x20] ss:$16 sps:$4 sm:$0xff] (!%p211_p3)  }
   0x9   : > { %555 = vmatpush1.bf16.msra.mxu0 (!%p211_p3), %v4363_v3  ;;  %684 = vmatpush1.bf16.msra.mxu1 (!%p211_p3), %v4364_v4  ;;  %v4370_v8 = vld [vmem:[%s5542_s1 + $0x28] ss:$16 sps:$4 sm:$0xff] (!%p211_p3)   ;;  %v4371_v9 = vld [vmem:[%s5542_s1 + $0x44] ss:$16 sps:$4 sm:$0xff] (!%p211_p3)   ;;  %v4373_v10 = vld [vmem:[%s5542_s1 + $0x4c] ss:$16 sps:$4 sm:$0xff] (!%p211_p3)  }
   0xa   : > { %556 = vmatprep.subr.bf16.mxu0 (!%p211_p3), %v4365_v5  ;;  %685 = vmatprep.subr.bf16.mxu1 (!%p211_p3), %v4367_v6  ;;  %v4375_v11 = vld [vmem:[%s5542_s1 + $0x40] ss:$16 sps:$4 sm:$0xff] (!%p211_p3)   ;;  %v4376_v12 = vld [vmem:[%s5542_s1 + $0x48] ss:$16 sps:$4 sm:$0xff] (!%p211_p3)   ;;  %v4377_v13 = vld [vmem:[%s5542_s1 + $0x64] ss:$16 sps:$4 sm:$0xff] (!%p211_p3)  }
   0xb   : > { %v4379_v14 = vld [vmem:[%s5542_s1 + $0x6c] ss:$16 sps:$4 sm:$0xff] (!%p211_p3)   ;;  %v4381_v15 = vld [vmem:[%s5542_s1 + $0x60] ss:$16 sps:$4 sm:$0xff] (!%p211_p3)   ;;  %v4382_v16 = vld [vmem:[%s5542_s1 + $0x68] ss:$16 sps:$4 sm:$0xff] (!%p211_p3)  }
   0xc   : > { %v4383_v17 = vld [vmem:[%s5542_s1 + $0x84] ss:$16 sps:$4 sm:$0xff] (!%p211_p3)   ;;  %v4385_v18 = vld [vmem:[%s5542_s1 + $0x8c] ss:$16 sps:$4 sm:$0xff] (!%p211_p3)   ;;  %v4387_v19 = vld [vmem:[%s5542_s1 + $0x80] ss:$16 sps:$4 sm:$0xff] (!%p211_p3)  }
   0xd   : > { %557 = vmatpush1.bf16.msra.mxu0 (!%p211_p3), %v4369_v7  ;;  %686 = vmatpush1.bf16.msra.mxu1 (!%p211_p3), %v4370_v8  ;;  %v4388_v20 = vld [vmem:[%s5542_s1 + $0x88] ss:$16 sps:$4 sm:$0xff] (!%p211_p3)   ;;  %v4389_v21 = vld [vmem:[%s5542_s1 + $0xa4] ss:$16 sps:$4 sm:$0xff] (!%p211_p3)   ;;  %v4391_v22 = vld [vmem:[%s5542_s1 + $0xac] ss:$16 sps:$4 sm:$0xff] (!%p211_p3)  }
   0xe   : > { %558 = vmatprep.subr.bf16.mxu0 %v4371_v9  ;;  %687 = vmatprep.subr.bf16.mxu1 %v4373_v10  ;;  %s4551_s10 = scalar_select %p250_p4, %s4433_s18, 1  ;;  %v4393_v23 = vld [vmem:[%s5542_s1 + $0xa0] ss:$16 sps:$4 sm:$0xff]   ;;  %v4394_v24 = vld [vmem:[%s5542_s1 + $0xa8] ss:$16 sps:$4 sm:$0xff]  }
   0xf   : > { %v4395_v25 = vld [vmem:[%s5542_s1 + $0xc4] ss:$16 sps:$4 sm:$0xff]   ;;  %v4397_v26 = vld [vmem:[%s5542_s1 + $0xcc] ss:$16 sps:$4 sm:$0xff]   ;;  %v4399_v27 = vld [vmem:[%s5542_s1 + $0xc0] ss:$16 sps:$4 sm:$0xff]  }
  0x10   : > { %s4332_s23 = smul.u32 88, %s4551_s10  ;;  %v4400_v28 = vld [vmem:[%s5542_s1 + $0xc8] ss:$16 sps:$4 sm:$0xff]   ;;  %v4401_v29 = vld [vmem:[%s5542_s1 + $0xe4] ss:$16 sps:$4 sm:$0xff]   ;;  %s4137_s27 = sshll.u32 %s4433_s18, 3 }
  0x11   : > { %559 = vmatpush1.bf16.msra.mxu0 %v4375_v11  ;;  %688 = vmatpush1.bf16.msra.mxu1 %v4376_v12  ;;  %v4403_v30 = vld [vmem:[%s5542_s1 + $0xec] ss:$16 sps:$4 sm:$0xff]   ;;  %v4405_v31 = vld [vmem:[%s5542_s1 + $0xe0] ss:$16 sps:$4 sm:$0xff]   ;;  %v4406_v32 = vld [vmem:[%s5542_s1 + $0xe8] ss:$16 sps:$4 sm:$0xff]  }
  0x12   : > { %560 = vmatprep.subr.bf16.mxu0 %v4377_v13  ;;  %689 = vmatprep.subr.bf16.mxu1 %v4379_v14  ;;  %s4581_s9 = scalar_lea.vmem %s5541_s0, %s4332_s23  ;;  %v1053_v34 = vld [vmem:[%s5543_s2 + $0x8] sm:$0xff]  ;;  %v1052_v37 = vld [vmem:[%s5543_s2] sm:$0xff]  ;;  %p5312_p5 = scmp.lt.s32.totalorder %s4137_s27, 15 }
  0x13   : > { %v4407_v33 = vld [vmem:[%s4581_s9] sm:$0xff]   ;;  %v1061_v35 = vld [vmem:[%s5543_s2 + $0x48] sm:$0xff]  ;;  %v4409_v8 = vld [vmem:[%s4581_s9 + $0x10] sm:$0xff]   ;;  %s4140_s7 = sshll.u32 %s4551_s10, 3 }
  0x14   : > { %v4188_v36 = vcombine.high %v1053_v34, %v1061_v35  ;;  %v1060_v38 = vld [vmem:[%s5543_s2 + $0x40] sm:$0xff]  ;;  %v1069_v39 = vld [vmem:[%s5543_s2 + $0x88] sm:$0xff]  ;;  %v4187_v40 = vcombine.low %v1053_v34, %v1061_v35  ;;  %s5553_s27 = smov (!%p5312_p5, %s4137_s27), 15  ;;  %s5414_s12 = scalar_lea.vmem %s5545_s4, %s4140_s7 }
  0x15   : > { %561 = vmatpush1.bf16.msra.mxu0 %v4381_v15  ;;  %690 = vmatpush1.bf16.msra.mxu1 %v4382_v16  ;;  %v4185_v41 = vcombine.low %v1052_v37, %v1060_v38  ;;  %v4186_v42 = vcombine.high %v1052_v37, %v1060_v38  ;;  %v1077_v43 = vld [vmem:[%s5543_s2 + $0xc8] sm:$0xff]  ;;  %v1068_v44 = vld [vmem:[%s5543_s2 + $0x80] sm:$0xff]  ;;  %s4331_s18 = sshll.u32 %s5553_s27, 4  ;;  %s5419_s15 = scalar_lea.vmem %s5546_s5, %s4140_s7 }
  0x16   : > { %562 = vmatprep.subr.bf16.mxu0 %v4383_v17  ;;  %691 = vmatprep.subr.bf16.mxu1 %v4385_v18  ;;  %v1076_v45 = vld [vmem:[%s5543_s2 + $0xc0] sm:$0xff]  ;;  %v4204_v46 = vcombine.high %v1069_v39, %v1077_v43  ;;  %v1085_v48 = vld [vmem:[%s5543_s2 + $0x108] sm:$0xff]  ;;  %v4203_v49 = vcombine.low %v1069_v39, %v1077_v43  ;;  %v4410_v17 = vld [vmem:[%s4581_s9 + $0x18] sm:$0xff]   ;;  %s5338_s6 = scalar_lea.vmem %s5544_s3, %s4331_s18 }
  0x17   : > { %v4202_v47 = vcombine.high %v1068_v44, %v1076_v45  ;;  %v4201_v50 = vcombine.low %v1068_v44, %v1076_v45  ;;  %v1093_v51 = vld [vmem:[%s5543_s2 + $0x148] sm:$0xff]  ;;  %v1084_v52 = vld [vmem:[%s5543_s2 + $0x100] sm:$0xff] }
  0x18   : > { %v1092_v53 = vld [vmem:[%s5543_s2 + $0x140] sm:$0xff]  ;;  %v4408_v54 = vld [vmem:[%s4581_s9 + $0x8] sm:$0xff]   ;;  %v4220_v59 = vcombine.high %v1085_v48, %v1093_v51  ;;  %v4219_v61 = vcombine.low %v1085_v48, %v1093_v51  ;;  %v1063_v48 = vld [vmem:[%s5543_s2 + $0x58] sm:$0xff] }
  0x19   : > { %563 = vmatpush1.bf16.msra.mxu0 %v4387_v19  ;;  %692 = vmatpush1.bf16.msra.mxu1 %v4388_v20  ;;  %v1101_v55 = vld [vmem:[%s5543_s2 + $0x188] sm:$0xff]  ;;  %v1100_v57 = vld [vmem:[%s5543_s2 + $0x180] sm:$0xff]  ;;  %v4218_v60 = vcombine.high %v1084_v52, %v1092_v53  ;;  %v4217_v62 = vcombine.low %v1084_v52, %v1092_v53  ;;  %v4413_v20 = vld [vmem:[%s4581_s9 + $0x30] sm:$0xff]  }
  0x1a   : > { %564 = vmatprep.subr.bf16.mxu0 %v4389_v21  ;;  %693 = vmatprep.subr.bf16.mxu1 %v4391_v22  ;;  %v1109_v56 = vld [vmem:[%s5543_s2 + $0x1c8] sm:$0xff]  ;;  %v1108_v58 = vld [vmem:[%s5543_s2 + $0x1c0] sm:$0xff]  ;;  %v4414_v21 = vld [vmem:[%s4581_s9 + $0x38] sm:$0xff]  }
  0x1b   : > { %v4236_v63 = vcombine.high %v1101_v55, %v1109_v56  ;;  %v4234_v0 = vcombine.high %v1100_v57, %v1108_v58  ;;  %v1117_v1 = vld [vmem:[%s5543_s2 + $0x208] sm:$0xff]  ;;  %v4235_v3 = vcombine.low %v1101_v55, %v1109_v56  ;;  %v4233_v4 = vcombine.low %v1100_v57, %v1108_v58  ;;  %v1116_v6 = vld [vmem:[%s5543_s2 + $0x200] sm:$0xff]  ;;  %v1062_v52 = vld [vmem:[%s5543_s2 + $0x50] sm:$0xff] }
  0x1c   : > { %v1125_v5 = vld [vmem:[%s5543_s2 + $0x248] sm:$0xff]  ;;  %v1124_v7 = vld [vmem:[%s5543_s2 + $0x240] sm:$0xff]  ;;  %v1071_v55 = vld [vmem:[%s5543_s2 + $0x98] sm:$0xff] }
  0x1d   : > { %565 = vmatpush1.bf16.msra.mxu0 %v4393_v23  ;;  %694 = vmatpush1.bf16.msra.mxu1 %v4394_v24  ;;  %v1133_v9 = vld [vmem:[%s5543_s2 + $0x288] sm:$0xff]  ;;  %v4252_v11 = vcombine.high %v1117_v1, %v1125_v5  ;;  %v4250_v12 = vcombine.high %v1116_v6, %v1124_v7  ;;  %v4251_v13 = vcombine.low %v1117_v1, %v1125_v5  ;;  %v4411_v18 = vld [vmem:[%s4581_s9 + $0x20] sm:$0xff]   ;;  %v4417_v24 = vld [vmem:[%s4581_s9 + $0x50] sm:$0xff]  }
  0x1e   : > { %566 = vmatprep.subr.bf16.mxu0 %v4395_v25  ;;  %695 = vmatprep.subr.bf16.mxu1 %v4397_v26  ;;  %v1141_v10 = vld [vmem:[%s5543_s2 + $0x2c8] sm:$0xff]  ;;  %v4249_v14 = vcombine.low %v1116_v6, %v1124_v7  ;;  %v4415_v22 = vld [vmem:[%s4581_s9 + $0x40] sm:$0xff]   ;;  %v1079_v56 = vld [vmem:[%s5543_s2 + $0xd8] sm:$0xff] }
  0x1f   : > { %v4268_v15 = vcombine.high %v1133_v9, %v1141_v10  ;;  %v4267_v16 = vcombine.low %v1133_v9, %v1141_v10  ;;  %v4412_v19 = vld [vmem:[%s4581_s9 + $0x28] sm:$0xff]   ;;  %v1132_v25 = vld [vmem:[%s5543_s2 + $0x280] sm:$0xff]  ;;  %v4207_v57 = vcombine.low %v1071_v55, %v1079_v56  ;;  %v4208_v58 = vcombine.high %v1071_v55, %v1079_v56  ;;  %v1094_v5 = vld [vmem:[%s5543_s2 + $0x150] sm:$0xff] }
  0x20   : > { %v4416_v23 = vld [vmem:[%s4581_s9 + $0x48] sm:$0xff]   ;;  %v1140_v26 = vld [vmem:[%s5543_s2 + $0x2c0] sm:$0xff]  ;;  %v1111_v9 = vld [vmem:[%s5543_s2 + $0x1d8] sm:$0xff] }
  0x21   : > { %567 = vmatpush1.bf16.msra.mxu0 %v4399_v27  ;;  %696 = vmatpush1.bf16.msra.mxu1 %v4400_v28  ;;  %v4265_v27 = vcombine.low %v1132_v25, %v1140_v26  ;;  %v4266_v28 = vcombine.high %v1132_v25, %v1140_v26  ;;  %v1156_v34 = vld [vmem:[%s5543_s2 + $0x340] sm:$0xff]  ;;  %v1165_v38 = vld [vmem:[%s5543_s2 + $0x388] sm:$0xff]  ;;  %v1102_v10 = vld [vmem:[%s5543_s2 + $0x190] sm:$0xff] }
  0x22   : > { %568 = vmatprep.subr.bf16.mxu0 %v4401_v29  ;;  %697 = vmatprep.subr.bf16.mxu1 %v4403_v30  ;;  %v1149_v29 = vld [vmem:[%s5543_s2 + $0x308] sm:$0xff]  ;;  %v1172_v43 = vld [vmem:[%s5543_s2 + $0x3c0] sm:$0xff]  ;;  %v1143_v25 = vld [vmem:[%s5543_s2 + $0x2d8] sm:$0xff] }
  0x23   : > { %v1157_v30 = vld [vmem:[%s5543_s2 + $0x348] sm:$0xff]  ;;  %v4872_v55 = vld [vmem:[%s5543_s2 + $0x60] sm:$0xff] }
  0x24   : > { %v1173_v39 = vld [vmem:[%s5543_s2 + $0x3c8] sm:$0xff] }
  0x25   : > { %569 = vmatpush1.bf16.msra.mxu0 %v4405_v31  ;;  %698 = vmatpush1.bf16.msra.mxu1 %v4406_v32  ;;  %v4283_v31 = vcombine.low %v1149_v29, %v1157_v30  ;;  %v4284_v32 = vcombine.high %v1149_v29, %v1157_v30  ;;  %v1142_v29 = vld [vmem:[%s5543_s2 + $0x2d0] sm:$0xff]  ;;  %v1151_v30 = vld [vmem:[%s5543_s2 + $0x318] sm:$0xff] }
  0x26   : > { %1937 = vmatprep.subr.bf16.mxu1 %v4188_v36  ;;  %1820 = vmatprep.subr.bf16.mxu0 %v4186_v42  ;;  %v4444_v36 = vmov 0.0   ;;  %v1164_v42 = vld [vmem:[%s5543_s2 + $0x380] sm:$0xff] }
  0x27   : > { %983 = vst [vmem:[#allocation2] sm:$0x1] %v4444_v36  ;;  %984 = vst [vmem:[#allocation2 + $0x10] sm:$0x1] %v4444_v36  ;;  %v4298_v44 = vcombine.high %v1164_v42, %v1172_v43  ;;  %v4297_v45 = vcombine.low %v1164_v42, %v1172_v43 }
  0x28   : > { %587 = vmatmul.mubr.bf16.vlgmr.msra.gmra.mrb[0].mxu0 %v4407_v33  ;;  %716 = vmatmul.mubr.bf16.vlgmr.msra.gmra.mrb[0].mxu1 %v4407_v33  ;;  %v1148_v33 = vld [vmem:[%s5543_s2 + $0x300] sm:$0xff]  ;;  %985 = vst [vmem:[#allocation2 + $0x20] sm:$0x1] %v4444_v36  ;;  %986 = vst [vmem:[#allocation2 + $0x30] sm:$0x1] %v4444_v36 }
  0x29   : > { %595 = vmatprep.mubr.bf16.mxu0 %v4443_v2  ;;  %721 = vmatprep.mubr.bf16.mxu1 %v4443_v2  ;;  %v4282_v35 = vcombine.high %v1148_v33, %v1156_v34  ;;  %987 = vst [vmem:[#allocation2 + $0x40] sm:$0x1] %v4444_v36  ;;  %988 = vst [vmem:[#allocation2 + $0x50] sm:$0x1] %v4444_v36  ;;  %v4281_v37 = vcombine.low %v1148_v33, %v1156_v34  ;;  %v1159_v33 = vld [vmem:[%s5543_s2 + $0x358] sm:$0xff]  ;;  %v1150_v34 = vld [vmem:[%s5543_s2 + $0x310] sm:$0xff] }
  0x2a   : > { %1938 = vmatpush1.bf16.msra.mxu1 %v4187_v40  ;;  %1821 = vmatpush1.bf16.msra.mxu0 %v4185_v41  ;;  %989 = vst [vmem:[#allocation2 + $0x60] sm:$0x1] %v4444_v36  ;;  %990 = vst [vmem:[#allocation2 + $0x70] sm:$0x1] %v4444_v36  ;;  %v4299_v40 = vcombine.low %v1165_v38, %v1173_v39  ;;  %v4300_v41 = vcombine.high %v1165_v38, %v1173_v39 }
  0x2b   : > { %1939 = vmatprep.subr.bf16.mxu1 %v4204_v46  ;;  %1822 = vmatprep.subr.bf16.mxu0 %v4202_v47  ;;  %991 = vst [vmem:[#allocation2 + $0x80] sm:$0x1] %v4444_v36  ;;  %994 = vst [vmem:[#allocation2 + $0x19] sm:$0x7f] %v4444_v36  ;;  %v4445_v46 = vmov 0.0|0.0   ;;  %v1055_v47 = vld [vmem:[%s5543_s2 + $0x18] sm:$0xff]  ;;  %v4288_v38 = vcombine.high %v1151_v30, %v1159_v33 }
  0x2c   : > { %995 = vst [vmem:[#allocation2 + $0x29] sm:$0x7f] %v4444_v36  ;;  %996 = vst [vmem:[#allocation2 + $0x39] sm:$0x7f] %v4444_v36  ;;  %v4192_v51 = vcombine.high %v1055_v47, %v1063_v48 }
  0x2d   : > { %997 = vst [vmem:[#allocation2 + $0x49] sm:$0x7f] %v4444_v36  ;;  %998 = vst [vmem:[#allocation2 + $0x59] sm:$0x7f] %v4444_v36 }
  0x2e   : > { %1940 = vmatpush1.bf16.msra.mxu1 %v4203_v49  ;;  %1823 = vmatpush1.bf16.msra.mxu0 %v4201_v50  ;;  %999 = vst [vmem:[#allocation2 + $0x69] sm:$0x7f] %v4444_v36  ;;  %1000 = vst [vmem:[#allocation2 + $0x79] sm:$0x7f] %v4444_v36  ;;  %v1054_v49 = vld [vmem:[%s5543_s2 + $0x10] sm:$0xff]  ;;  %v4191_v50 = vcombine.low %v1055_v47, %v1063_v48 }
  0x2f   : > { %1941 = vmatprep.subr.bf16.mxu1 %v4220_v59  ;;  %1824 = vmatprep.subr.bf16.mxu0 %v4218_v60  ;;  %1001 = vst [vmem:[#allocation2 + $0x89] sm:$0x7f] %v4444_v36  ;;  %v4189_v53 = vcombine.low %v1054_v49, %v1062_v52  ;;  %v1070_v59 = vld [vmem:[%s5543_s2 + $0x90] sm:$0xff] }
  0x30   : > { %596 = vmatmul.mubr.bf16.gmra.mrb[4].mxu0 %v4408_v54  ;;  %722 = vmatmul.mubr.bf16.gmra.mrb[4].mxu1 %v4408_v54  ;;  %v4190_v54 = vcombine.high %v1054_v49, %v1062_v52  ;;  %v1078_v60 = vld [vmem:[%s5543_s2 + $0xd0] sm:$0xff] }
  0x31   : > { %604 = vmatprep.mubr.bf16.mxu0 %v4443_v2  ;;  %730 = vmatprep.mubr.bf16.mxu1 %v4443_v2  ;;  %v1174_v47 = vld [vmem:[%s5543_s2 + $0x3d0] sm:$0xff] }
  0x32   : > { %1942 = vmatpush1.bf16.msra.mxu1 %v4219_v61  ;;  %1825 = vmatpush1.bf16.msra.mxu0 %v4217_v62  ;;  %v1087_v61 = vld [vmem:[%s5543_s2 + $0x118] sm:$0xff]  ;;  %v4205_v62 = vcombine.low %v1070_v59, %v1078_v60 }
  0x33   : > { %1943 = vmatprep.subr.bf16.mxu1 %v4236_v63  ;;  %1826 = vmatprep.subr.bf16.mxu0 %v4234_v0  ;;  %v4206_v63 = vcombine.high %v1070_v59, %v1078_v60  ;;  %v1095_v0 = vld [vmem:[%s5543_s2 + $0x158] sm:$0xff] }
  0x34   : > { %v4223_v1 = vcombine.low %v1087_v61, %v1095_v0 }
  0x36   : > { %1944 = vmatpush1.bf16.msra.mxu1 %v4235_v3  ;;  %1827 = vmatpush1.bf16.msra.mxu0 %v4233_v4  ;;  %v4224_v3 = vcombine.high %v1087_v61, %v1095_v0  ;;  %v1086_v4 = vld [vmem:[%s5543_s2 + $0x110] sm:$0xff] }
  0x37   : > { %1945 = vmatprep.subr.bf16.mxu1 %v4252_v11  ;;  %1828 = vmatprep.subr.bf16.mxu0 %v4250_v12  ;;  %v4221_v6 = vcombine.low %v1086_v4, %v1094_v5  ;;  %v4222_v7 = vcombine.high %v1086_v4, %v1094_v5 }
  0x38   : > { %605 = vmatmul.mubr.bf16.gmra.mrb[8].mxu0 %v4409_v8  ;;  %731 = vmatmul.mubr.bf16.gmra.mrb[8].mxu1 %v4409_v8  ;;  %v1103_v8 = vld [vmem:[%s5543_s2 + $0x198] sm:$0xff] }
  0x39   : > { %613 = vmatprep.mubr.bf16.mxu0 %v4443_v2  ;;  %739 = vmatprep.mubr.bf16.mxu1 %v4443_v2  ;;  %v4239_v11 = vcombine.low %v1103_v8, %v1111_v9  ;;  %v4240_v12 = vcombine.high %v1103_v8, %v1111_v9 }
  0x3a   : > { %1946 = vmatpush1.bf16.msra.mxu1 %v4251_v13  ;;  %1829 = vmatpush1.bf16.msra.mxu0 %v4249_v14  ;;  %v1110_v13 = vld [vmem:[%s5543_s2 + $0x1d0] sm:$0xff] }
  0x3b   : > { %1947 = vmatprep.subr.bf16.mxu1 %v4268_v15  ;;  %1830 = vmatprep.subr.bf16.mxu0 %v4266_v28  ;;  %v4237_v14 = vcombine.low %v1102_v10, %v1110_v13  ;;  %v4238_v15 = vcombine.high %v1102_v10, %v1110_v13  ;;  %v1134_v28 = vld [vmem:[%s5543_s2 + $0x290] sm:$0xff] }
  0x3e   : > { %1948 = vmatpush1.bf16.msra.mxu1 %v4267_v16  ;;  %1831 = vmatpush1.bf16.msra.mxu0 %v4265_v27  ;;  %v1119_v16 = vld [vmem:[%s5543_s2 + $0x218] sm:$0xff] }
  0x3f   : > { %1949 = vmatprep.subr.bf16.mxu1 %v4284_v32  ;;  %1832 = vmatprep.subr.bf16.mxu0 %v4282_v35  ;;  %v4270_v32 = vcombine.high %v1134_v28, %v1142_v29  ;;  %v1158_v35 = vld [vmem:[%s5543_s2 + $0x350] sm:$0xff] }
  0x40   : > { %614 = vmatmul.mubr.bf16.gmra.mrb[12].mxu0 %v4410_v17  ;;  %740 = vmatmul.mubr.bf16.gmra.mrb[12].mxu1 %v4410_v17  ;;  %v1127_v17 = vld [vmem:[%s5543_s2 + $0x258] sm:$0xff]  ;;  %v4286_v39 = vcombine.high %v1150_v34, %v1158_v35  ;;  %v4285_v43 = vcombine.low %v1150_v34, %v1158_v35 }
  0x41   : > { %622 = vmatprep.mubr.bf16.mxu0 %v4443_v2  ;;  %748 = vmatprep.mubr.bf16.mxu1 %v4443_v2 }
  0x42   : > { %1950 = vmatpush1.bf16.msra.mxu1 %v4283_v31  ;;  %1833 = vmatpush1.bf16.msra.mxu0 %v4281_v37  ;;  %v4269_v31 = vcombine.low %v1134_v28, %v1142_v29  ;;  %v4287_v37 = vcombine.low %v1151_v30, %v1159_v33 }
  0x43   : > { %1951 = vmatprep.subr.bf16.mxu1 %v4300_v41  ;;  %1834 = vmatprep.subr.bf16.mxu0 %v4298_v44  ;;  %v1175_v41 = vld [vmem:[%s5543_s2 + $0x3d8] sm:$0xff] }
  0x46   : > { %1952 = vmatpush1.bf16.msra.mxu1 %v4299_v40  ;;  %1835 = vmatpush1.bf16.msra.mxu0 %v4297_v45  ;;  %v1167_v40 = vld [vmem:[%s5543_s2 + $0x398] sm:$0xff]  ;;  %v1166_v45 = vld [vmem:[%s5543_s2 + $0x390] sm:$0xff] }
  0x47   : > { %2179 = vmatprep.subr.bf16.mxu1 %v4192_v51  ;;  %2054 = vmatprep.subr.bf16.mxu0 %v4190_v54  ;;  %v4304_v42 = vcombine.high %v1167_v40, %v1175_v41  ;;  %v4303_v44 = vcombine.low %v1167_v40, %v1175_v41  ;;  %v4301_v48 = vcombine.low %v1166_v45, %v1174_v47  ;;  %v4858_v51 = vld [vmem:[%s5543_s2 + $0x68] sm:$0xff]  ;;  %v4867_v54 = vld [vmem:[%s5543_s2 + $0x20] sm:$0xff] }
  0x48   : > { %623 = vmatmul.mubr.bf16.gmra.mrb[16].mxu0 %v4411_v18  ;;  %749 = vmatmul.mubr.bf16.gmra.mrb[16].mxu1 %v4411_v18  ;;  %v1118_v18 = vld [vmem:[%s5543_s2 + $0x210] sm:$0xff]  ;;  %v4302_v49 = vcombine.high %v1166_v45, %v1174_v47  ;;  %v4193_v56 = vcombine.low %v4867_v54, %v4872_v55 }
  0x49   : > { %631 = vmatprep.mubr.bf16.mxu0 %v4443_v2  ;;  %757 = vmatprep.mubr.bf16.mxu1 %v4443_v2 }
  0x50   : > { %632 = vmatmul.mubr.bf16.gmra.mrb[20].mxu0 %v4412_v19  ;;  %758 = vmatmul.mubr.bf16.gmra.mrb[20].mxu1 %v4412_v19  ;;  %v4255_v19 = vcombine.low %v1119_v16, %v1127_v17 }
  0x51   : > { %640 = vmatprep.mubr.bf16.mxu0 %v4443_v2  ;;  %766 = vmatprep.mubr.bf16.mxu1 %v4443_v2 }
  0x58   : > { %641 = vmatmul.mubr.bf16.gmra.mrb[24].mxu0 %v4413_v20  ;;  %767 = vmatmul.mubr.bf16.gmra.mrb[24].mxu1 %v4413_v20  ;;  %v4256_v20 = vcombine.high %v1119_v16, %v1127_v17 }
  0x59   : > { %649 = vmatprep.mubr.bf16.mxu0 %v4443_v2  ;;  %775 = vmatprep.mubr.bf16.mxu1 %v4443_v2 }
  0x60   : > { %650 = vmatmul.mubr.bf16.gmra.mrb[28].mxu0 %v4414_v21  ;;  %776 = vmatmul.mubr.bf16.gmra.mrb[28].mxu1 %v4414_v21  ;;  %v1126_v21 = vld [vmem:[%s5543_s2 + $0x250] sm:$0xff] }
  0x61   : > { %658 = vmatprep.mubr.bf16.mxu0 %v4443_v2  ;;  %784 = vmatprep.mubr.bf16.mxu1 %v4443_v2 }
  0x68   : > { %659 = vmatmul.mubr.bf16.gmra.mrb[32].mxu0 %v4415_v22  ;;  %785 = vmatmul.mubr.bf16.gmra.mrb[32].mxu1 %v4415_v22  ;;  %v4253_v22 = vcombine.low %v1118_v18, %v1126_v21 }
  0x69   : > { %667 = vmatprep.mubr.bf16.mxu0 %v4443_v2  ;;  %793 = vmatprep.mubr.bf16.mxu1 %v4443_v2 }
  0x70   : > { %668 = vmatmul.mubr.bf16.gmra.mrb[36].mxu0 %v4416_v23  ;;  %794 = vmatmul.mubr.bf16.gmra.mrb[36].mxu1 %v4416_v23  ;;  %v4254_v23 = vcombine.high %v1118_v18, %v1126_v21 }
  0x71   : > { %802 = vmatprep.mubr.bf16.mxu1 %v4443_v2  ;;  %676 = vmatprep.mubr.bf16.mxu0 %v4443_v2 }
  0x78   : > { %803 = vmatmul.mubr.bf16.gmra.mrb[40].mxu1 %v4417_v24  ;;  %677 = vmatmul.mubr.bf16.gmra.mrb[40].mxu0 %v4417_v24  ;;  %v1135_v24 = vld [vmem:[%s5543_s2 + $0x298] sm:$0xff] }
  0x79   : > { %1852 = vmatprep.mubr.bf16.mxu0 %v4443_v2  ;;  %1969 = vmatprep.mubr.bf16.mxu1 %v4443_v2  ;;  %v4271_v26 = vcombine.low %v1135_v24, %v1143_v25  ;;  %v4272_v27 = vcombine.high %v1135_v24, %v1143_v25 }
  0x80   : > { %1970 = vmatmul.mubr.bf16.vlgmr.msra.gmra.mrb[44].mxu1 %v4445_v46  ;;  %1853 = vmatmul.mubr.bf16.vlgmr.msra.gmra.mrb[44].mxu0 %v4445_v46 }
  0x81   : > { %1975 = vmatprep.mubr.bf16.mxu1 %v4443_v2  ;;  %1861 = vmatprep.mubr.bf16.mxu0 %v4443_v2 }
  0x82   : > { %2180 = vmatpush1.bf16.msra.mxu1 %v4191_v50  ;;  %2055 = vmatpush1.bf16.msra.mxu0 %v4189_v53  ;;  %v4853_v50 = vld [vmem:[%s5543_s2 + $0x28] sm:$0xff] }
  0x83   : > { %2181 = vmatprep.subr.bf16.mxu1 %v4208_v58  ;;  %2056 = vmatprep.subr.bf16.mxu0 %v4206_v63  ;;  %v4195_v52 = vcombine.low %v4853_v50, %v4858_v51  ;;  %v4196_v53 = vcombine.high %v4853_v50, %v4858_v51  ;;  %v1105_v50 = vld [vmem:[%s5543_s2 + $0x1a8] sm:$0xff] }
  0x86   : > { %2182 = vmatpush1.bf16.msra.mxu1 %v4207_v57  ;;  %2057 = vmatpush1.bf16.msra.mxu0 %v4205_v62  ;;  %v4194_v57 = vcombine.high %v4867_v54, %v4872_v55  ;;  %v1113_v55 = vld [vmem:[%s5543_s2 + $0x1e8] sm:$0xff] }
  0x87   : > { %2183 = vmatprep.subr.bf16.mxu1 %v4224_v3  ;;  %2058 = vmatprep.subr.bf16.mxu0 %v4222_v7 }
  0x8a   : > { %2184 = vmatpush1.bf16.msra.mxu1 %v4223_v1  ;;  %2059 = vmatpush1.bf16.msra.mxu0 %v4221_v6 }
  0x8b   : > { %2185 = vmatprep.subr.bf16.mxu1 %v4240_v12  ;;  %2060 = vmatprep.subr.bf16.mxu0 %v4238_v15 }
  0x8e   : > { %2186 = vmatpush1.bf16.msra.mxu1 %v4239_v11  ;;  %2061 = vmatpush1.bf16.msra.mxu0 %v4237_v14 }
  0x8f   : > { %2187 = vmatprep.subr.bf16.mxu1 %v4256_v20  ;;  %2062 = vmatprep.subr.bf16.mxu0 %v4254_v23 }
  0x92   : > { %2188 = vmatpush1.bf16.msra.mxu1 %v4255_v19  ;;  %2063 = vmatpush1.bf16.msra.mxu0 %v4253_v22 }
  0x93   : > { %2189 = vmatprep.subr.bf16.mxu1 %v4272_v27  ;;  %2064 = vmatprep.subr.bf16.mxu0 %v4270_v32 }
  0x96   : > { %2190 = vmatpush1.bf16.msra.mxu1 %v4271_v26  ;;  %2065 = vmatpush1.bf16.msra.mxu0 %v4269_v31 }
  0x97   : > { %2191 = vmatprep.subr.bf16.mxu1 %v4288_v38  ;;  %2066 = vmatprep.subr.bf16.mxu0 %v4286_v39 }
  0x9a   : > { %2192 = vmatpush1.bf16.msra.mxu1 %v4287_v37  ;;  %2067 = vmatpush1.bf16.msra.mxu0 %v4285_v43 }
  0x9b   : > { %2193 = vmatprep.subr.bf16.mxu1 %v4304_v42  ;;  %2068 = vmatprep.subr.bf16.mxu0 %v4302_v49 }
  0x9e   : > { %2194 = vmatpush1.bf16.msra.mxu1 %v4303_v44  ;;  %2069 = vmatpush1.bf16.msra.mxu0 %v4301_v48 }
  0x9f   : > { %2421 = vmatprep.subr.bf16.mxu1 %v4196_v53  ;;  %2304 = vmatprep.subr.bf16.mxu0 %v4194_v57 }
  0xfb   : > { %v588_v58 = vpop.f32.mrb[0].mxu0  ;;  %v717_v59 = vpop.f32.mrb[0].mxu1 }
  0xfc   : > { %v590_v60 = vpop.f32.mrb[1].mxu0  ;;  %v718_v61 = vpop.f32.mrb[1].mxu1 }
  0xfd   : > { %v843_v62 = vrot.slane %v590_v60, 1  ;;  %v592_v63 = vpop.f32.mrb[2].mxu0  ;;  %v719_v0 = vpop.f32.mrb[2].mxu1 }
  0xfe   : > { %v593_v1 = vpop.f32.mrb[3].mxu0  ;;  %v720_v3 = vpop.f32.mrb[3].mxu1 }
  0xff   : > { %v844_v4 = vrot.slane %v593_v1, 1 }
 0x101   : > { %v845_v5 = vsel %vm842_vm0, %v843_v62, %v844_v4 }
 0x102   : > { %v883_v6 = vadd.f32 %v845_v5, %v588_v58 }
 0x103   : > { %v597_v7 = vpop.f32.mrb[4].mxu0  ;;  %v723_v8 = vpop.f32.mrb[4].mxu1 }
 0x104   : > { %v893_v9 = vadd.f32 %v883_v6, %v723_v8  ;;  %v599_v10 = vpop.f32.mrb[5].mxu0  ;;  %v725_v11 = vpop.f32.mrb[5].mxu1 }
 0x105   : > { %v846_v12 = vrot.slane %v599_v10, 1  ;;  %v601_v13 = vpop.f32.mrb[6].mxu0  ;;  %v727_v14 = vpop.f32.mrb[6].mxu1  ;;  %v923_v17 = vrot.slane %v725_v11, 1 }
 0x106   : > { %v602_v15 = vpop.f32.mrb[7].mxu0  ;;  %v728_v16 = vpop.f32.mrb[7].mxu1 }
 0x107   : > { %v847_v18 = vrot.slane %v602_v15, 1  ;;  %v924_v19 = vrot.slane %v728_v16, 1 }
 0x109   : > { %v925_v20 = vsel %vm842_vm0, %v923_v17, %v924_v19  ;;  %v848_v21 = vsel %vm842_vm0, %v846_v12, %v847_v18 }
 0x10a   : > { %v963_v22 = vadd.f32 %v925_v20, %v893_v9  ;;  %v884_v23 = vadd.f32 %v848_v21, %v597_v7 }
 0x10b   : > { %v606_v24 = vpop.f32.mrb[8].mxu0  ;;  %v732_v25 = vpop.f32.mrb[8].mxu1 }
 0x10c   : > { %v973_v26 = vmax.f32 %v963_v22, 0.0  ;;  %v894_v27 = vadd.f32 %v884_v23, %v732_v25  ;;  %v608_v28 = vpop.f32.mrb[9].mxu0  ;;  %v734_v29 = vpop.f32.mrb[9].mxu1 }
 0x10d   : > { %v849_v30 = vrot.slane %v608_v28, 1  ;;  %v610_v31 = vpop.f32.mrb[10].mxu0  ;;  %v736_v32 = vpop.f32.mrb[10].mxu1  ;;  %v926_v35 = vrot.slane %v734_v29, 1 }
 0x10e   : > { %1003 = vst [vmem:[#allocation2 + $0x1] sm:$0xff] %v973_v26  ;;  %v611_v33 = vpop.f32.mrb[11].mxu0  ;;  %v737_v34 = vpop.f32.mrb[11].mxu1 }
 0x10f   : > { %1017 = vst [vmem:[#allocation2] sm:$0xff] %v4444_v36  ;;  %v850_v37 = vrot.slane %v611_v33, 1  ;;  %v927_v38 = vrot.slane %v737_v34, 1 }
 0x111   : > { %v928_v39 = vsel %vm842_vm0, %v926_v35, %v927_v38  ;;  %v851_v40 = vsel %vm842_vm0, %v849_v30, %v850_v37 }
 0x112   : > { %v964_v41 = vadd.f32 %v928_v39, %v894_v27  ;;  %v885_v42 = vadd.f32 %v851_v40, %v606_v24 }
 0x113   : > { %v615_v43 = vpop.f32.mrb[12].mxu0  ;;  %v741_v44 = vpop.f32.mrb[12].mxu1 }
 0x114   : > { %v974_v45 = vmax.f32 %v964_v41, 0.0  ;;  %v895_v47 = vadd.f32 %v885_v42, %v741_v44  ;;  %v617_v48 = vpop.f32.mrb[13].mxu0  ;;  %v743_v49 = vpop.f32.mrb[13].mxu1 }
 0x115   : > { %v852_v53 = vrot.slane %v617_v48, 1  ;;  %v619_v57 = vpop.f32.mrb[14].mxu0  ;;  %v745_v58 = vpop.f32.mrb[14].mxu1  ;;  %v929_v60 = vrot.slane %v743_v49, 1 }
 0x116   : > { %1004 = vst [vmem:[#allocation2 + $0x11] sm:$0xff] %v974_v45  ;;  %v620_v36 = vpop.f32.mrb[15].mxu0  ;;  %v746_v59 = vpop.f32.mrb[15].mxu1 }
 0x117   : > { %v853_v61 = vrot.slane %v620_v36, 1  ;;  %v930_v62 = vrot.slane %v746_v59, 1 }
 0x119   : > { %v931_v63 = vsel %vm842_vm0, %v929_v60, %v930_v62  ;;  %v854_v0 = vsel %vm842_vm0, %v852_v53, %v853_v61 }
 0x11a   : > { %v965_v1 = vadd.f32 %v931_v63, %v895_v47  ;;  %v886_v3 = vadd.f32 %v854_v0, %v615_v43 }
 0x11b   : > { %v624_v4 = vpop.f32.mrb[16].mxu0  ;;  %v750_v5 = vpop.f32.mrb[16].mxu1 }
 0x11c   : > { %v975_v6 = vmax.f32 %v965_v1, 0.0  ;;  %v896_v7 = vadd.f32 %v886_v3, %v750_v5  ;;  %v626_v8 = vpop.f32.mrb[17].mxu0  ;;  %v752_v9 = vpop.f32.mrb[17].mxu1 }
 0x11d   : > { %v855_v10 = vrot.slane %v626_v8, 1  ;;  %v628_v11 = vpop.f32.mrb[18].mxu0  ;;  %v754_v12 = vpop.f32.mrb[18].mxu1  ;;  %v1024_v13 = vld [vmem:[#allocation2 + $0x10] sm:$0xff]  ;;  %v1025_v14 = vld [vmem:[#allocation2 + $0x18] sm:$0xff]  ;;  %v932_v18 = vrot.slane %v752_v9, 1 }
 0x11e   : > { %1005 = vst [vmem:[#allocation2 + $0x21] sm:$0xff] %v975_v6  ;;  %v629_v15 = vpop.f32.mrb[19].mxu0  ;;  %v755_v16 = vpop.f32.mrb[19].mxu1  ;;  %v4886_v17 = vpack.c.bf16 %v1025_v14, %v1024_v13 }
 0x11f   : > { %v856_v19 = vrot.slane %v629_v15, 1  ;;  %v933_v20 = vrot.slane %v755_v16, 1 }
 0x120   : > { %1862 = vmatmul.mubr.bf16.gmra.mrb[48].mxu0 %v4886_v17  ;;  %1976 = vmatmul.mubr.bf16.gmra.mrb[48].mxu1 %v4886_v17 }
 0x121   : > { %v934_v21 = vsel %vm842_vm0, %v932_v18, %v933_v20  ;;  %v857_v22 = vsel %vm842_vm0, %v855_v10, %v856_v19  ;;  %1870 = vmatprep.mubr.bf16.mxu0 %v4443_v2  ;;  %1984 = vmatprep.mubr.bf16.mxu1 %v4443_v2 }
 0x122   : > { %v966_v23 = vadd.f32 %v934_v21, %v896_v7  ;;  %v887_v24 = vadd.f32 %v857_v22, %v624_v4 }
 0x123   : > { %v633_v25 = vpop.f32.mrb[20].mxu0  ;;  %v759_v26 = vpop.f32.mrb[20].mxu1 }
 0x124   : > { %v976_v27 = vmax.f32 %v966_v23, 0.0  ;;  %v897_v28 = vadd.f32 %v887_v24, %v759_v26  ;;  %v635_v29 = vpop.f32.mrb[21].mxu0  ;;  %v761_v30 = vpop.f32.mrb[21].mxu1 }
 0x125   : > { %v858_v31 = vrot.slane %v635_v29, 1  ;;  %v637_v32 = vpop.f32.mrb[22].mxu0  ;;  %v763_v33 = vpop.f32.mrb[22].mxu1  ;;  %v1026_v34 = vld [vmem:[#allocation2 + $0x20] sm:$0xff]  ;;  %v1027_v35 = vld [vmem:[#allocation2 + $0x28] sm:$0xff]  ;;  %v935_v40 = vrot.slane %v761_v30, 1 }
 0x126   : > { %1006 = vst [vmem:[#allocation2 + $0x31] sm:$0xff] %v976_v27  ;;  %v638_v37 = vpop.f32.mrb[23].mxu0  ;;  %v764_v38 = vpop.f32.mrb[23].mxu1  ;;  %v4894_v39 = vpack.c.bf16 %v1027_v35, %v1026_v34 }
 0x127   : > { %v859_v41 = vrot.slane %v638_v37, 1  ;;  %v936_v42 = vrot.slane %v764_v38, 1 }
 0x128   : > { %1871 = vmatmul.mubr.bf16.gmra.mrb[52].mxu0 %v4894_v39  ;;  %1985 = vmatmul.mubr.bf16.gmra.mrb[52].mxu1 %v4894_v39 }
 0x129   : > { %v937_v43 = vsel %vm842_vm0, %v935_v40, %v936_v42  ;;  %v860_v44 = vsel %vm842_vm0, %v858_v31, %v859_v41  ;;  %1879 = vmatprep.mubr.bf16.mxu0 %v4443_v2  ;;  %1993 = vmatprep.mubr.bf16.mxu1 %v4443_v2 }
 0x12a   : > { %v967_v45 = vadd.f32 %v937_v43, %v897_v28  ;;  %v888_v47 = vadd.f32 %v860_v44, %v633_v25 }
 0x12b   : > { %v642_v48 = vpop.f32.mrb[24].mxu0  ;;  %v768_v49 = vpop.f32.mrb[24].mxu1 }
 0x12c   : > { %v977_v53 = vmax.f32 %v967_v45, 0.0  ;;  %v898_v57 = vadd.f32 %v888_v47, %v768_v49  ;;  %v644_v58 = vpop.f32.mrb[25].mxu0  ;;  %v770_v36 = vpop.f32.mrb[25].mxu1 }
 0x12d   : > { %v861_v59 = vrot.slane %v644_v58, 1  ;;  %v646_v60 = vpop.f32.mrb[26].mxu0  ;;  %v772_v61 = vpop.f32.mrb[26].mxu1  ;;  %v1028_v62 = vld [vmem:[#allocation2 + $0x30] sm:$0xff]  ;;  %v1029_v63 = vld [vmem:[#allocation2 + $0x38] sm:$0xff]  ;;  %v938_v4 = vrot.slane %v770_v36, 1 }
 0x12e   : > { %1007 = vst [vmem:[#allocation2 + $0x41] sm:$0xff] %v977_v53  ;;  %v647_v0 = vpop.f32.mrb[27].mxu0  ;;  %v773_v1 = vpop.f32.mrb[27].mxu1  ;;  %v4902_v3 = vpack.c.bf16 %v1029_v63, %v1028_v62 }
 0x12f   : > { %v862_v5 = vrot.slane %v647_v0, 1  ;;  %v939_v6 = vrot.slane %v773_v1, 1 }
 0x130   : > { %1880 = vmatmul.mubr.bf16.gmra.mrb[56].mxu0 %v4902_v3  ;;  %1994 = vmatmul.mubr.bf16.gmra.mrb[56].mxu1 %v4902_v3 }
 0x131   : > { %v940_v7 = vsel %vm842_vm0, %v938_v4, %v939_v6  ;;  %v863_v8 = vsel %vm842_vm0, %v861_v59, %v862_v5  ;;  %1888 = vmatprep.mubr.bf16.mxu0 %v4443_v2  ;;  %2002 = vmatprep.mubr.bf16.mxu1 %v4443_v2 }
 0x132   : > { %v968_v9 = vadd.f32 %v940_v7, %v898_v57  ;;  %v889_v10 = vadd.f32 %v863_v8, %v642_v48 }
 0x133   : > { %v651_v11 = vpop.f32.mrb[28].mxu0  ;;  %v777_v12 = vpop.f32.mrb[28].mxu1 }
 0x134   : > { %v978_v13 = vmax.f32 %v968_v9, 0.0  ;;  %v899_v14 = vadd.f32 %v889_v10, %v777_v12  ;;  %v653_v15 = vpop.f32.mrb[29].mxu0  ;;  %v779_v16 = vpop.f32.mrb[29].mxu1 }
 0x135   : > { %v864_v18 = vrot.slane %v653_v15, 1  ;;  %v655_v19 = vpop.f32.mrb[30].mxu0  ;;  %v781_v20 = vpop.f32.mrb[30].mxu1  ;;  %v1030_v21 = vld [vmem:[#allocation2 + $0x40] sm:$0xff]  ;;  %v1031_v22 = vld [vmem:[#allocation2 + $0x48] sm:$0xff]  ;;  %v941_v26 = vrot.slane %v779_v16, 1 }
 0x136   : > { %1008 = vst [vmem:[#allocation2 + $0x51] sm:$0xff] %v978_v13  ;;  %v656_v23 = vpop.f32.mrb[31].mxu0  ;;  %v782_v24 = vpop.f32.mrb[31].mxu1  ;;  %v4910_v25 = vpack.c.bf16 %v1031_v22, %v1030_v21 }
 0x137   : > { %v865_v27 = vrot.slane %v656_v23, 1  ;;  %v942_v28 = vrot.slane %v782_v24, 1 }
 0x138   : > { %1889 = vmatmul.mubr.bf16.gmra.mrb[60].mxu0 %v4910_v25  ;;  %2003 = vmatmul.mubr.bf16.gmra.mrb[60].mxu1 %v4910_v25 }
 0x139   : > { %v943_v29 = vsel %vm842_vm0, %v941_v26, %v942_v28  ;;  %v866_v30 = vsel %vm842_vm0, %v864_v18, %v865_v27  ;;  %1897 = vmatprep.mubr.bf16.mxu0 %v4443_v2  ;;  %2011 = vmatprep.mubr.bf16.mxu1 %v4443_v2 }
 0x13a   : > { %v969_v31 = vadd.f32 %v943_v29, %v899_v14  ;;  %v890_v32 = vadd.f32 %v866_v30, %v651_v11 }
 0x13b   : > { %v660_v33 = vpop.f32.mrb[32].mxu0  ;;  %v786_v34 = vpop.f32.mrb[32].mxu1 }
 0x13c   : > { %v979_v35 = vmax.f32 %v969_v31, 0.0  ;;  %v900_v37 = vadd.f32 %v890_v32, %v786_v34  ;;  %v662_v38 = vpop.f32.mrb[33].mxu0  ;;  %v788_v40 = vpop.f32.mrb[33].mxu1  ;;  %v1073_v34 = vld [vmem:[%s5543_s2 + $0xa8] sm:$0xff] }
 0x13d   : > { %v867_v41 = vrot.slane %v662_v38, 1  ;;  %v664_v42 = vpop.f32.mrb[34].mxu0  ;;  %v790_v43 = vpop.f32.mrb[34].mxu1  ;;  %v1032_v44 = vld [vmem:[#allocation2 + $0x50] sm:$0xff]  ;;  %v1033_v45 = vld [vmem:[#allocation2 + $0x58] sm:$0xff]  ;;  %v944_v53 = vrot.slane %v788_v40, 1 }
 0x13e   : > { %1009 = vst [vmem:[#allocation2 + $0x61] sm:$0xff] %v979_v35  ;;  %v665_v47 = vpop.f32.mrb[35].mxu0  ;;  %v791_v48 = vpop.f32.mrb[35].mxu1  ;;  %v4918_v49 = vpack.c.bf16 %v1033_v45, %v1032_v44  ;;  %v1081_v35 = vld [vmem:[%s5543_s2 + $0xe8] sm:$0xff]  ;;  %v1080_v38 = vld [vmem:[%s5543_s2 + $0xe0] sm:$0xff] }
 0x13f   : > { %v868_v57 = vrot.slane %v665_v47, 1  ;;  %v945_v58 = vrot.slane %v791_v48, 1  ;;  %v1089_v40 = vld [vmem:[%s5543_s2 + $0x128] sm:$0xff]  ;;  %v1088_v44 = vld [vmem:[%s5543_s2 + $0x120] sm:$0xff]  ;;  %v4211_v48 = vcombine.low %v1073_v34, %v1081_v35 }
 0x140   : > { %1898 = vmatmul.mubr.bf16.gmra.mrb[64].mxu0 %v4918_v49  ;;  %2012 = vmatmul.mubr.bf16.gmra.mrb[64].mxu1 %v4918_v49  ;;  %v1097_v43 = vld [vmem:[%s5543_s2 + $0x168] sm:$0xff]  ;;  %v1096_v45 = vld [vmem:[%s5543_s2 + $0x160] sm:$0xff] }
 0x141   : > { %v946_v36 = vsel %vm842_vm0, %v944_v53, %v945_v58  ;;  %v869_v59 = vsel %vm842_vm0, %v867_v41, %v868_v57  ;;  %1906 = vmatprep.mubr.bf16.mxu0 %v4443_v2  ;;  %2020 = vmatprep.mubr.bf16.mxu1 %v4443_v2  ;;  %v4212_v41 = vcombine.high %v1073_v34, %v1081_v35 }
 0x142   : > { %v970_v60 = vadd.f32 %v946_v36, %v900_v37  ;;  %v891_v61 = vadd.f32 %v869_v59, %v660_v33  ;;  %v1072_v37 = vld [vmem:[%s5543_s2 + $0xa0] sm:$0xff]  ;;  %v4228_v36 = vcombine.high %v1089_v40, %v1097_v43  ;;  %v4226_v59 = vcombine.high %v1088_v44, %v1096_v45 }
 0x143   : > { %v669_v62 = vpop.f32.mrb[36].mxu0  ;;  %v795_v63 = vpop.f32.mrb[36].mxu1  ;;  %v4210_v42 = vcombine.high %v1072_v37, %v1080_v38  ;;  %v4209_v53 = vcombine.low %v1072_v37, %v1080_v38 }
 0x144   : > { %v980_v0 = vmax.f32 %v970_v60, 0.0  ;;  %v901_v1 = vadd.f32 %v891_v61, %v795_v63  ;;  %v671_v4 = vpop.f32.mrb[37].mxu0  ;;  %v797_v5 = vpop.f32.mrb[37].mxu1  ;;  %v1112_v62 = vld [vmem:[%s5543_s2 + $0x1e0] sm:$0xff] }
 0x145   : > { %v673_v6 = vpop.f32.mrb[38].mxu0  ;;  %v799_v7 = vpop.f32.mrb[38].mxu1  ;;  %v1034_v8 = vld [vmem:[#allocation2 + $0x60] sm:$0xff]  ;;  %v1035_v9 = vld [vmem:[#allocation2 + $0x68] sm:$0xff]  ;;  %v947_v13 = vrot.slane %v797_v5, 1  ;;  %v4225_v4 = vcombine.low %v1088_v44, %v1096_v45  ;;  %v4244_v5 = vcombine.high %v1105_v50, %v1113_v55 }
 0x146   : > { %1010 = vst [vmem:[#allocation2 + $0x71] sm:$0xff] %v980_v0  ;;  %v674_v10 = vpop.f32.mrb[39].mxu0  ;;  %v800_v11 = vpop.f32.mrb[39].mxu1  ;;  %v4926_v12 = vpack.c.bf16 %v1035_v9, %v1034_v8  ;;  %v1121_v7 = vld [vmem:[%s5543_s2 + $0x228] sm:$0xff] }
 0x147   : > { %v948_v14 = vrot.slane %v800_v11, 1  ;;  %v1129_v9 = vld [vmem:[%s5543_s2 + $0x268] sm:$0xff]  ;;  %v1120_v10 = vld [vmem:[%s5543_s2 + $0x220] sm:$0xff] }
 0x148   : > { %1907 = vmatmul.mubr.bf16.gmra.mrb[68].mxu0 %v4926_v12  ;;  %2021 = vmatmul.mubr.bf16.gmra.mrb[68].mxu1 %v4926_v12  ;;  %v1128_v11 = vld [vmem:[%s5543_s2 + $0x260] sm:$0xff] }
 0x149   : > { %v949_v15 = vsel %vm842_vm0, %v947_v13, %v948_v14  ;;  %1915 = vmatprep.mubr.bf16.mxu0 %v4443_v2  ;;  %2029 = vmatprep.mubr.bf16.mxu1 %v4443_v2  ;;  %v4243_v14 = vcombine.low %v1105_v50, %v1113_v55  ;;  %v1082_v55 = vld [vmem:[%s5543_s2 + $0xf0] sm:$0xff] }
 0x14a   : > { %v971_v16 = vadd.f32 %v949_v15, %v901_v1  ;;  %v4227_v1 = vcombine.low %v1089_v40, %v1097_v43  ;;  %v1169_v40 = vld [vmem:[%s5543_s2 + $0x3a8] sm:$0xff]  ;;  %v1176_v43 = vld [vmem:[%s5543_s2 + $0x3e0] sm:$0xff] }
 0x14b   : > { %v804_v18 = vpop.f32.mrb[40].mxu1  ;;  %v678_v19 = vpop.f32.mrb[40].mxu0 }
 0x14c   : > { %v981_v20 = vmax.f32 %v971_v16, 0.0  ;;  %v806_v21 = vpop.f32.mrb[41].mxu1  ;;  %v679_v22 = vpop.f32.mrb[41].mxu0  ;;  %v4260_v16 = vcombine.high %v1121_v7, %v1129_v9  ;;  %v4258_v18 = vcombine.high %v1120_v10, %v1128_v11  ;;  %v1137_v19 = vld [vmem:[%s5543_s2 + $0x2a8] sm:$0xff] }
 0x14d   : > { %v808_v23 = vpop.f32.mrb[42].mxu1  ;;  %v1036_v24 = vld [vmem:[#allocation2 + $0x70] sm:$0xff]  ;;  %v1037_v26 = vld [vmem:[#allocation2 + $0x78] sm:$0xff]  ;;  %v680_v27 = vpop.f32.mrb[42].mxu0  ;;  %v1136_v21 = vld [vmem:[%s5543_s2 + $0x2a0] sm:$0xff] }
 0x14e   : > { %1011 = vst [vmem:[#allocation2 + $0x81] sm:$0xff] %v981_v20  ;;  %v809_v28 = vpop.f32.mrb[43].mxu1  ;;  %v4933_v29 = vpack.c.bf16 %v1037_v26, %v1036_v24  ;;  %v681_v30 = vpop.f32.mrb[43].mxu0  ;;  %v1145_v20 = vld [vmem:[%s5543_s2 + $0x2e8] sm:$0xff]  ;;  %v1144_v22 = vld [vmem:[%s5543_s2 + $0x2e0] sm:$0xff]  ;;  %v4259_v23 = vcombine.low %v1121_v7, %v1129_v9  ;;  %v4257_v24 = vcombine.low %v1120_v10, %v1128_v11  ;;  %v1107_v11 = vld [vmem:[%s5543_s2 + $0x1b8] sm:$0xff] }
 0x14f   : > { %v4276_v26 = vcombine.high %v1137_v19, %v1145_v20  ;;  %v4274_v27 = vcombine.high %v1136_v21, %v1144_v22  ;;  %v1153_v28 = vld [vmem:[%s5543_s2 + $0x328] sm:$0xff]  ;;  %v4275_v34 = vcombine.low %v1137_v19, %v1145_v20  ;;  %v4273_v35 = vcombine.low %v1136_v21, %v1144_v22  ;;  %v1123_v22 = vld [vmem:[%s5543_s2 + $0x238] sm:$0xff] }
 0x150   : > { %1916 = vmatmul.mubr.bf16.gmra.mrb[72].mxu0 %v4933_v29  ;;  %2030 = vmatmul.mubr.bf16.gmra.mrb[72].mxu1 %v4933_v29  ;;  %v1161_v30 = vld [vmem:[%s5543_s2 + $0x368] sm:$0xff] }
 0x151   : > { %1924 = vmatprep.mubr.bf16.mxu0 %v4443_v2  ;;  %2038 = vmatprep.mubr.bf16.mxu1 %v4443_v2  ;;  %v4292_v37 = vcombine.high %v1153_v28, %v1161_v30  ;;  %v4291_v44 = vcombine.low %v1153_v28, %v1161_v30 }
 0x153   : > { %v1971_v47 = vpop.f32.mrb[44].mxu1  ;;  %v1854_v57 = vpop.f32.mrb[44].mxu0 }
 0x154   : > { %v1972_v58 = vpop.f32.mrb[45].mxu1  ;;  %v1856_v60 = vpop.f32.mrb[45].mxu0 }
 0x155   : > { %v1038_v31 = vld [vmem:[#allocation2 + $0x80] sm:$0xff]  ;;  %v1039_v32 = vld [vmem:[#allocation2 + $0x88] sm:$0xff]  ;;  %v1973_v61 = vpop.f32.mrb[46].mxu1  ;;  %v2812_v51 = vrot.slane %v1856_v60, 1  ;;  %v1058_v58 = vld [vmem:[%s5543_s2 + $0x30] sm:$0xff] }
 0x156   : > { %v4939_v33 = vpack.c.bf16 %v1039_v32, %v1038_v31  ;;  %v1974_v54 = vpop.f32.mrb[47].mxu1  ;;  %v1152_v31 = vld [vmem:[%s5543_s2 + $0x320] sm:$0xff] }
 0x157   : > { %v1160_v32 = vld [vmem:[%s5543_s2 + $0x360] sm:$0xff]  ;;  %v1074_v54 = vld [vmem:[%s5543_s2 + $0xb0] sm:$0xff] }
 0x158   : > { %1925 = vmatmul.mubr.bf16.gmra.mrb[76].mxu0 %v4939_v33  ;;  %2039 = vmatmul.mubr.bf16.gmra.mrb[76].mxu1 %v4939_v33  ;;  %v4290_v38 = vcombine.high %v1152_v31, %v1160_v32  ;;  %v4289_v45 = vcombine.low %v1152_v31, %v1160_v32  ;;  %v1139_v32 = vld [vmem:[%s5543_s2 + $0x2b8] sm:$0xff] }
 0x159   : > { %1930 = vmatprep.mubr.bf16.mxu0 %v4443_v2  ;;  %2047 = vmatprep.mubr.bf16.mxu1 %v4443_v2 }
 0x160   : > { %1931 = vmatmul.mubr.bf16.gmra.mrb[80].mxu0 %v4445_v46  ;;  %2048 = vmatmul.mubr.bf16.gmra.mrb[80].mxu1 %v4445_v46 }
 0x161   : > { %2086 = vmatprep.mubr.bf16.mxu0 %v4443_v2  ;;  %2211 = vmatprep.mubr.bf16.mxu1 %v4443_v2 }
 0x168   : > { %2087 = vmatmul.mubr.bf16.vlgmr.msra.gmra.mrb[84].mxu0 %v4445_v46  ;;  %2212 = vmatmul.mubr.bf16.vlgmr.msra.gmra.mrb[84].mxu1 %v4445_v46 }
 0x169   : > { %2422 = vmatpush1.bf16.msra.mxu1 %v4195_v52  ;;  %2305 = vmatpush1.bf16.msra.mxu0 %v4193_v56  ;;  %v1858_v52 = vpop.f32.mrb[46].mxu0  ;;  %v1104_v56 = vld [vmem:[%s5543_s2 + $0x1a0] sm:$0xff] }
 0x16a   : > { %2096 = vmatprep.mubr.bf16.mxu0 %v4443_v2  ;;  %2217 = vmatprep.mubr.bf16.mxu1 %v4443_v2  ;;  %v1859_v63 = vpop.f32.mrb[47].mxu0  ;;  %v4242_v6 = vcombine.high %v1104_v56, %v1112_v62  ;;  %v4241_v15 = vcombine.low %v1104_v56, %v1112_v62  ;;  %v1083_v52 = vld [vmem:[%s5543_s2 + $0xf8] sm:$0xff] }
 0x16b   : > { %2423 = vmatprep.subr.bf16.mxu1 %v4212_v41  ;;  %2306 = vmatprep.subr.bf16.mxu0 %v4210_v42  ;;  %v2813_v0 = vrot.slane %v1859_v63, 1  ;;  %v1177_v41 = vld [vmem:[%s5543_s2 + $0x3e8] sm:$0xff]  ;;  %v1168_v42 = vld [vmem:[%s5543_s2 + $0x3a0] sm:$0xff]  ;;  %v1091_v63 = vld [vmem:[%s5543_s2 + $0x138] sm:$0xff] }
 0x16c   : > { %v4308_v47 = vcombine.high %v1169_v40, %v1177_v41  ;;  %v4305_v60 = vcombine.low %v1168_v42, %v1176_v43 }
 0x16d   : > { %2424 = vmatpush1.bf16.msra.mxu1 %v4211_v48  ;;  %2307 = vmatpush1.bf16.msra.mxu0 %v4209_v53  ;;  %v2814_v8 = vsel %vm842_vm0, %v2812_v51, %v2813_v0  ;;  %v4306_v48 = vcombine.high %v1168_v42, %v1176_v43  ;;  %v1059_v53 = vld [vmem:[%s5543_s2 + $0x38] sm:$0xff] }
 0x16e   : > { %2425 = vmatprep.subr.bf16.mxu1 %v4228_v36  ;;  %2308 = vmatprep.subr.bf16.mxu0 %v4226_v59  ;;  %v5010_v13 = vadd.f32 %v2814_v8, %v1854_v57  ;;  %v1067_v57 = vld [vmem:[%s5543_s2 + $0x78] sm:$0xff]  ;;  %v1066_v36 = vld [vmem:[%s5543_s2 + $0x70] sm:$0xff]  ;;  %v4307_v59 = vcombine.low %v1169_v40, %v1177_v41  ;;  %v4213_v8 = vcombine.low %v1074_v54, %v1082_v55 }
 0x16f   : > { %v4200_v61 = vcombine.high %v1059_v53, %v1067_v57  ;;  %v4198_v50 = vcombine.high %v1058_v58, %v1066_v36  ;;  %v1075_v51 = vld [vmem:[%s5543_s2 + $0xb8] sm:$0xff]  ;;  %v4199_v56 = vcombine.low %v1059_v53, %v1067_v57  ;;  %v4197_v62 = vcombine.low %v1058_v58, %v1066_v36 }
 0x170   : > { %2097 = vmatmul.mubr.bf16.gmra.mrb[88].mxu0 %v4886_v17  ;;  %2218 = vmatmul.mubr.bf16.gmra.mrb[88].mxu1 %v4886_v17  ;;  %v4216_v0 = vcombine.high %v1075_v51, %v1083_v52  ;;  %v4215_v7 = vcombine.low %v1075_v51, %v1083_v52  ;;  %v1155_v43 = vld [vmem:[%s5543_s2 + $0x338] sm:$0xff] }
 0x171   : > { %2106 = vmatprep.mubr.bf16.mxu0 %v4443_v2  ;;  %2227 = vmatprep.mubr.bf16.mxu1 %v4443_v2  ;;  %v1171_v36 = vld [vmem:[%s5543_s2 + $0x3b8] sm:$0xff] }
 0x172   : > { %2426 = vmatpush1.bf16.msra.mxu1 %v4227_v1  ;;  %2309 = vmatpush1.bf16.msra.mxu0 %v4225_v4  ;;  %v4214_v1 = vcombine.high %v1074_v54, %v1082_v55  ;;  %v1099_v4 = vld [vmem:[%s5543_s2 + $0x178] sm:$0xff] }
 0x173   : > { %2427 = vmatprep.subr.bf16.mxu1 %v4244_v5  ;;  %2310 = vmatprep.subr.bf16.mxu0 %v4242_v6  ;;  %v1090_v5 = vld [vmem:[%s5543_s2 + $0x130] sm:$0xff]  ;;  %v4232_v9 = vcombine.high %v1091_v63, %v1099_v4 }
 0x174   : > { %v1098_v6 = vld [vmem:[%s5543_s2 + $0x170] sm:$0xff] }
 0x175   : > { %v4230_v10 = vcombine.high %v1090_v5, %v1098_v6  ;;  %v4229_v19 = vcombine.low %v1090_v5, %v1098_v6 }
 0x176   : > { %2428 = vmatpush1.bf16.msra.mxu1 %v4243_v14  ;;  %2311 = vmatpush1.bf16.msra.mxu0 %v4241_v15  ;;  %v1115_v14 = vld [vmem:[%s5543_s2 + $0x1f8] sm:$0xff]  ;;  %v1106_v15 = vld [vmem:[%s5543_s2 + $0x1b0] sm:$0xff] }
 0x177   : > { %2429 = vmatprep.subr.bf16.mxu1 %v4260_v16  ;;  %2312 = vmatprep.subr.bf16.mxu0 %v4258_v18  ;;  %v1114_v16 = vld [vmem:[%s5543_s2 + $0x1f0] sm:$0xff]  ;;  %v4231_v18 = vcombine.low %v1091_v63, %v1099_v4  ;;  %v4248_v20 = vcombine.high %v1107_v11, %v1115_v14 }
 0x178   : > { %2107 = vmatmul.mubr.bf16.gmra.mrb[92].mxu0 %v4894_v39  ;;  %2228 = vmatmul.mubr.bf16.gmra.mrb[92].mxu1 %v4894_v39  ;;  %v4246_v21 = vcombine.high %v1106_v15, %v1114_v16  ;;  %v4245_v28 = vcombine.low %v1106_v15, %v1114_v16 }
 0x179   : > { %2116 = vmatprep.mubr.bf16.mxu0 %v4443_v2  ;;  %2237 = vmatprep.mubr.bf16.mxu1 %v4443_v2 }
 0x17a   : > { %2430 = vmatpush1.bf16.msra.mxu1 %v4259_v23  ;;  %2313 = vmatpush1.bf16.msra.mxu0 %v4257_v24  ;;  %v1131_v23 = vld [vmem:[%s5543_s2 + $0x278] sm:$0xff]  ;;  %v1122_v24 = vld [vmem:[%s5543_s2 + $0x230] sm:$0xff] }
 0x17b   : > { %2431 = vmatprep.subr.bf16.mxu1 %v4276_v26  ;;  %2314 = vmatprep.subr.bf16.mxu0 %v4274_v27  ;;  %v1130_v26 = vld [vmem:[%s5543_s2 + $0x270] sm:$0xff]  ;;  %v4247_v27 = vcombine.low %v1107_v11, %v1115_v14  ;;  %v4264_v30 = vcombine.high %v1123_v22, %v1131_v23 }
 0x17c   : > { %v4262_v31 = vcombine.high %v1122_v24, %v1130_v26  ;;  %v4261_v40 = vcombine.low %v1122_v24, %v1130_v26 }
 0x17e   : > { %2432 = vmatpush1.bf16.msra.mxu1 %v4275_v34  ;;  %2315 = vmatpush1.bf16.msra.mxu0 %v4273_v35  ;;  %v1147_v34 = vld [vmem:[%s5543_s2 + $0x2f8] sm:$0xff]  ;;  %v1138_v35 = vld [vmem:[%s5543_s2 + $0x2b0] sm:$0xff] }
 0x17f   : > { %2433 = vmatprep.subr.bf16.mxu1 %v4292_v37  ;;  %2316 = vmatprep.subr.bf16.mxu0 %v4290_v38  ;;  %v1146_v37 = vld [vmem:[%s5543_s2 + $0x2f0] sm:$0xff]  ;;  %v4263_v38 = vcombine.low %v1123_v22, %v1131_v23  ;;  %v4280_v41 = vcombine.high %v1139_v32, %v1147_v34 }
 0x180   : > { %2117 = vmatmul.mubr.bf16.gmra.mrb[96].mxu0 %v4902_v3  ;;  %2238 = vmatmul.mubr.bf16.gmra.mrb[96].mxu1 %v4902_v3  ;;  %v4278_v42 = vcombine.high %v1138_v35, %v1146_v37  ;;  %v4277_v53 = vcombine.low %v1138_v35, %v1146_v37 }
 0x181   : > { %2126 = vmatprep.mubr.bf16.mxu0 %v4443_v2  ;;  %2247 = vmatprep.mubr.bf16.mxu1 %v4443_v2 }
 0x182   : > { %2434 = vmatpush1.bf16.msra.mxu1 %v4291_v44  ;;  %2317 = vmatpush1.bf16.msra.mxu0 %v4289_v45  ;;  %v1163_v44 = vld [vmem:[%s5543_s2 + $0x378] sm:$0xff]  ;;  %v1154_v45 = vld [vmem:[%s5543_s2 + $0x330] sm:$0xff] }
 0x183   : > { %2435 = vmatprep.subr.bf16.mxu1 %v4308_v47  ;;  %2318 = vmatprep.subr.bf16.mxu0 %v4306_v48  ;;  %v1162_v47 = vld [vmem:[%s5543_s2 + $0x370] sm:$0xff]  ;;  %v4279_v48 = vcombine.low %v1139_v32, %v1147_v34  ;;  %v4296_v57 = vcombine.high %v1155_v43, %v1163_v44 }
 0x184   : > { %v4294_v58 = vcombine.high %v1154_v45, %v1162_v47  ;;  %v4293_v51 = vcombine.low %v1154_v45, %v1162_v47 }
 0x186   : > { %2436 = vmatpush1.bf16.msra.mxu1 %v4307_v59  ;;  %2319 = vmatpush1.bf16.msra.mxu0 %v4305_v60  ;;  %v1179_v59 = vld [vmem:[%s5543_s2 + $0x3f8] sm:$0xff]  ;;  %v1170_v60 = vld [vmem:[%s5543_s2 + $0x3b0] sm:$0xff] }
 0x187   : > { %2663 = vmatprep.subr.bf16.mxu1 %v4200_v61  ;;  %2538 = vmatprep.subr.bf16.mxu0 %v4198_v50  ;;  %v1178_v61 = vld [vmem:[%s5543_s2 + $0x3f0] sm:$0xff]  ;;  %v4295_v50 = vcombine.low %v1155_v43, %v1163_v44  ;;  %v4312_v52 = vcombine.high %v1171_v36, %v1179_v59  ;;  %v4311_v55 = vcombine.low %v1171_v36, %v1179_v59 }
 0x188   : > { %2127 = vmatmul.mubr.bf16.gmra.mrb[100].mxu0 %v4910_v25  ;;  %2248 = vmatmul.mubr.bf16.gmra.mrb[100].mxu1 %v4910_v25  ;;  %v4310_v54 = vcombine.high %v1170_v60, %v1178_v61 }
 0x189   : > { %2136 = vmatprep.mubr.bf16.mxu0 %v4443_v2  ;;  %2257 = vmatprep.mubr.bf16.mxu1 %v4443_v2 }
 0x190   : > { %2137 = vmatmul.mubr.bf16.gmra.mrb[104].mxu0 %v4918_v49  ;;  %2258 = vmatmul.mubr.bf16.gmra.mrb[104].mxu1 %v4918_v49 }
 0x191   : > { %2146 = vmatprep.mubr.bf16.mxu0 %v4443_v2  ;;  %2267 = vmatprep.mubr.bf16.mxu1 %v4443_v2 }
 0x198   : > { %2147 = vmatmul.mubr.bf16.gmra.mrb[108].mxu0 %v4926_v12  ;;  %2268 = vmatmul.mubr.bf16.gmra.mrb[108].mxu1 %v4926_v12 }
 0x199   : > { %2156 = vmatprep.mubr.bf16.mxu0 %v4443_v2  ;;  %2277 = vmatprep.mubr.bf16.mxu1 %v4443_v2 }
 0x1a0   : > { %2157 = vmatmul.mubr.bf16.gmra.mrb[112].mxu0 %v4933_v29  ;;  %2278 = vmatmul.mubr.bf16.gmra.mrb[112].mxu1 %v4933_v29 }
 0x1a1   : > { %2166 = vmatprep.mubr.bf16.mxu0 %v4443_v2  ;;  %2287 = vmatprep.mubr.bf16.mxu1 %v4443_v2 }
 0x1a8   : > { %2167 = vmatmul.mubr.bf16.gmra.mrb[116].mxu0 %v4939_v33  ;;  %2288 = vmatmul.mubr.bf16.gmra.mrb[116].mxu1 %v4939_v33 }
 0x1a9   : > { %2172 = vmatprep.mubr.bf16.mxu0 %v4443_v2  ;;  %2297 = vmatprep.mubr.bf16.mxu1 %v4443_v2 }
 0x1b0   : > { %2173 = vmatmul.mubr.bf16.gmra.mrb[120].mxu0 %v4445_v46  ;;  %2298 = vmatmul.mubr.bf16.gmra.mrb[120].mxu1 %v4445_v46 }
 0x1b1   : > { %2336 = vmatprep.mubr.bf16.mxu0 %v4443_v2  ;;  %2453 = vmatprep.mubr.bf16.mxu1 %v4443_v2 }
 0x1b8   : > { %2337 = vmatmul.mubr.bf16.vlgmr.msra.gmra.mrb[124].mxu0 %v4445_v46  ;;  %2454 = vmatmul.mubr.bf16.vlgmr.msra.gmra.mrb[124].mxu1 %v4445_v46 }
 0x1b9   : > { %2664 = vmatpush1.bf16.msra.mxu1 %v4199_v56  ;;  %2539 = vmatpush1.bf16.msra.mxu0 %v4197_v62  ;;  %v4309_v56 = vcombine.low %v1170_v60, %v1178_v61 }
 0x1ba   : > { %2342 = vmatprep.mubr.bf16.mxu0 %v4443_v2  ;;  %2459 = vmatprep.mubr.bf16.mxu1 %v4443_v2 }
 0x1bb   : > { %2665 = vmatprep.subr.bf16.mxu1 %v4216_v0  ;;  %2540 = vmatprep.subr.bf16.mxu0 %v4214_v1 }
 0x1bd   : > { %2666 = vmatpush1.bf16.msra.mxu1 %v4215_v7  ;;  %2541 = vmatpush1.bf16.msra.mxu0 %v4213_v8 }
 0x1be   : > { %2667 = vmatprep.subr.bf16.mxu1 %v4232_v9  ;;  %2542 = vmatprep.subr.bf16.mxu0 %v4230_v10 }
 0x1c0   : > { %2343 = vmatmul.mubr.bf16.gmra.mrb[128].mxu0 %v4886_v17  ;;  %2460 = vmatmul.mubr.bf16.gmra.mrb[128].mxu1 %v4886_v17 }
 0x1c1   : > { %2351 = vmatprep.mubr.bf16.mxu0 %v4443_v2  ;;  %2465 = vmatprep.mubr.bf16.mxu1 %v4443_v2 }
 0x1c2   : > { %2668 = vmatpush1.bf16.msra.mxu1 %v4231_v18  ;;  %2543 = vmatpush1.bf16.msra.mxu0 %v4229_v19 }
 0x1c3   : > { %2669 = vmatprep.subr.bf16.mxu1 %v4248_v20  ;;  %2544 = vmatprep.subr.bf16.mxu0 %v4246_v21 }
 0x1c6   : > { %2670 = vmatpush1.bf16.msra.mxu1 %v4247_v27  ;;  %2545 = vmatpush1.bf16.msra.mxu0 %v4245_v28 }
 0x1c7   : > { %2671 = vmatprep.subr.bf16.mxu1 %v4264_v30  ;;  %2546 = vmatprep.subr.bf16.mxu0 %v4262_v31 }
 0x1c8   : > { %2352 = vmatmul.mubr.bf16.gmra.mrb[132].mxu0 %v4894_v39  ;;  %2466 = vmatmul.mubr.bf16.gmra.mrb[132].mxu1 %v4894_v39 }
 0x1c9   : > { %2360 = vmatprep.mubr.bf16.mxu0 %v4443_v2  ;;  %2474 = vmatprep.mubr.bf16.mxu1 %v4443_v2 }
 0x1ca   : > { %2672 = vmatpush1.bf16.msra.mxu1 %v4263_v38  ;;  %2547 = vmatpush1.bf16.msra.mxu0 %v4261_v40 }
 0x1cb   : > { %2673 = vmatprep.subr.bf16.mxu1 %v4280_v41  ;;  %2548 = vmatprep.subr.bf16.mxu0 %v4278_v42 }
 0x1ce   : > { %2674 = vmatpush1.bf16.msra.mxu1 %v4279_v48  ;;  %2549 = vmatpush1.bf16.msra.mxu0 %v4277_v53 }
 0x1cf   : > { %2675 = vmatprep.subr.bf16.mxu1 %v4296_v57  ;;  %2550 = vmatprep.subr.bf16.mxu0 %v4294_v58 }
 0x1d0   : > { %2361 = vmatmul.mubr.bf16.gmra.mrb[136].mxu0 %v4902_v3  ;;  %2475 = vmatmul.mubr.bf16.gmra.mrb[136].mxu1 %v4902_v3 }
 0x1d1   : > { %2369 = vmatprep.mubr.bf16.mxu0 %v4443_v2  ;;  %2483 = vmatprep.mubr.bf16.mxu1 %v4443_v2 }
 0x1d2   : > { %2676 = vmatpush1.bf16.msra.mxu1 %v4295_v50  ;;  %2551 = vmatpush1.bf16.msra.mxu0 %v4293_v51 }
 0x1d3   : > { %2677 = vmatprep.subr.bf16.mxu1 %v4312_v52  ;;  %2552 = vmatprep.subr.bf16.mxu0 %v4310_v54 }
 0x1d6   : > { %2678 = vmatpush1.bf16.msra.mxu1 %v4311_v55  ;;  %2553 = vmatpush1.bf16.msra.mxu0 %v4309_v56 }
 0x1d8   : > { %2370 = vmatmul.mubr.bf16.gmra.mrb[140].mxu0 %v4910_v25  ;;  %2484 = vmatmul.mubr.bf16.gmra.mrb[140].mxu1 %v4910_v25 }
 0x1d9   : > { %2378 = vmatprep.mubr.bf16.mxu0 %v4443_v2  ;;  %2492 = vmatprep.mubr.bf16.mxu1 %v4443_v2 }
 0x1e0   : > { %2379 = vmatmul.mubr.bf16.gmra.mrb[144].mxu0 %v4918_v49  ;;  %2493 = vmatmul.mubr.bf16.gmra.mrb[144].mxu1 %v4918_v49 }
 0x1e1   : > { %2387 = vmatprep.mubr.bf16.mxu0 %v4443_v2  ;;  %2501 = vmatprep.mubr.bf16.mxu1 %v4443_v2 }
 0x1e8   : > { %2388 = vmatmul.mubr.bf16.gmra.mrb[148].mxu0 %v4926_v12  ;;  %2502 = vmatmul.mubr.bf16.gmra.mrb[148].mxu1 %v4926_v12 }
 0x1e9   : > { %2396 = vmatprep.mubr.bf16.mxu0 %v4443_v2  ;;  %2510 = vmatprep.mubr.bf16.mxu1 %v4443_v2 }
 0x1f0   : > { %2397 = vmatmul.mubr.bf16.gmra.mrb[152].mxu0 %v4933_v29  ;;  %2511 = vmatmul.mubr.bf16.gmra.mrb[152].mxu1 %v4933_v29 }
 0x1f1   : > { %2405 = vmatprep.mubr.bf16.mxu0 %v4443_v2  ;;  %2519 = vmatprep.mubr.bf16.mxu1 %v4443_v2 }
 0x1f3   : > { %v1863_v62 = vpop.f32.mrb[48].mxu0  ;;  %v1977_v63 = vpop.f32.mrb[48].mxu1 }
 0x1f4   : > { %v2852_v0 = vadd.f32 %v5010_v13, %v1977_v63  ;;  %v1865_v1 = vpop.f32.mrb[49].mxu0  ;;  %v1979_v4 = vpop.f32.mrb[49].mxu1 }
 0x1f5   : > { %v1867_v5 = vpop.f32.mrb[50].mxu0  ;;  %v1981_v6 = vpop.f32.mrb[50].mxu1  ;;  %v2815_v9 = vrot.slane %v1865_v1, 1  ;;  %v2876_v10 = vrot.slane %v1979_v4, 1 }
 0x1f6   : > { %v1868_v7 = vpop.f32.mrb[51].mxu0  ;;  %v1982_v8 = vpop.f32.mrb[51].mxu1 }
 0x1f7   : > { %v2816_v11 = vrot.slane %v1868_v7, 1  ;;  %v2877_v14 = vrot.slane %v1982_v8, 1 }
 0x1f8   : > { %2406 = vmatmul.mubr.bf16.gmra.mrb[156].mxu0 %v4939_v33  ;;  %2520 = vmatmul.mubr.bf16.gmra.mrb[156].mxu1 %v4939_v33 }
 0x1f9   : > { %v2878_v15 = vsel %vm842_vm0, %v2876_v10, %v2877_v14  ;;  %v2817_v16 = vsel %vm842_vm0, %v2815_v9, %v2816_v11  ;;  %2414 = vmatprep.mubr.bf16.mxu0 %v4443_v2  ;;  %2528 = vmatprep.mubr.bf16.mxu1 %v4443_v2 }
 0x1fa   : > { %v5217_v13 = vadd.f32 %v2878_v15, %v2852_v0  ;;  %v2845_v18 = vadd.f32 %v2817_v16, %v1863_v62 }
 0x1fb   : > { %v1872_v19 = vpop.f32.mrb[52].mxu0  ;;  %v1986_v20 = vpop.f32.mrb[52].mxu1 }
 0x1fc   : > { %v2853_v21 = vadd.f32 %v2845_v18, %v1986_v20  ;;  %v1874_v22 = vpop.f32.mrb[53].mxu0  ;;  %v1988_v23 = vpop.f32.mrb[53].mxu1  ;;  %v2930_v43 = vmul.f32 %v5217_v13, %v5217_v13 }
 0x1fd   : > { %v1876_v24 = vpop.f32.mrb[54].mxu0  ;;  %v1990_v26 = vpop.f32.mrb[54].mxu1  ;;  %v2818_v30 = vrot.slane %v1874_v22, 1  ;;  %v2879_v31 = vrot.slane %v1988_v23, 1 }
 0x1fe   : > { %v1877_v27 = vpop.f32.mrb[55].mxu0  ;;  %v1991_v28 = vpop.f32.mrb[55].mxu1 }
 0x1ff   : > { %v2819_v32 = vrot.slane %v1877_v27, 1  ;;  %v2880_v34 = vrot.slane %v1991_v28, 1 }
 0x200   : > { %2415 = vmatmul.mubr.bf16.gmra.mrb[160].mxu0 %v4445_v46  ;;  %2529 = vmatmul.mubr.bf16.gmra.mrb[160].mxu1 %v4445_v46 }
 0x201   : > { %v2881_v35 = vsel %vm842_vm0, %v2879_v31, %v2880_v34  ;;  %v2820_v37 = vsel %vm842_vm0, %v2818_v30, %v2819_v32  ;;  %2570 = vmatprep.mubr.bf16.mxu0 %v4443_v2  ;;  %2695 = vmatprep.mubr.bf16.mxu1 %v4443_v2 }
 0x202   : > { %v5225_v38 = vadd.f32 %v2881_v35, %v2853_v21  ;;  %v2846_v40 = vadd.f32 %v2820_v37, %v1872_v19 }
 0x203   : > { %v1881_v41 = vpop.f32.mrb[56].mxu0  ;;  %v1995_v42 = vpop.f32.mrb[56].mxu1 }
 0x204   : > { %v2916_v44 = vadd.f32 %v5225_v38, %v5217_v13  ;;  %v2931_v45 = vmul.f32 %v5225_v38, %v5225_v38  ;;  %v2854_v47 = vadd.f32 %v2846_v40, %v1995_v42  ;;  %v1883_v48 = vpop.f32.mrb[57].mxu0  ;;  %v1997_v53 = vpop.f32.mrb[57].mxu1 }
 0x205   : > { %v1885_v57 = vpop.f32.mrb[58].mxu0  ;;  %v1999_v58 = vpop.f32.mrb[58].mxu1  ;;  %v2821_v61 = vrot.slane %v1883_v48, 1  ;;  %v2882_v50 = vrot.slane %v1997_v53, 1 }
 0x206   : > { %v2938_v36 = vadd.f32 %v2931_v45, %v2930_v43  ;;  %v1886_v59 = vpop.f32.mrb[59].mxu0  ;;  %v2000_v60 = vpop.f32.mrb[59].mxu1 }
 0x207   : > { %v2822_v51 = vrot.slane %v1886_v59, 1  ;;  %v2883_v52 = vrot.slane %v2000_v60, 1 }
 0x208   : > { %2571 = vmatmul.mubr.bf16.vlgmr.msra.gmra.mrb[164].mxu0 %v4445_v46  ;;  %2696 = vmatmul.mubr.bf16.vlgmr.msra.gmra.mrb[164].mxu1 %v4445_v46 }
 0x209   : > { %v2884_v54 = vsel %vm842_vm0, %v2882_v50, %v2883_v52  ;;  %v2823_v55 = vsel %vm842_vm0, %v2821_v61, %v2822_v51  ;;  %2576 = vmatprep.mubr.bf16.mxu0 %v4443_v2  ;;  %2701 = vmatprep.mubr.bf16.mxu1 %v4443_v2 }
 0x20a   : > { %v5239_v56 = vadd.f32 %v2884_v54, %v2854_v47  ;;  %v2847_v62 = vadd.f32 %v2823_v55, %v1881_v41 }
 0x20b   : > { %v1890_v63 = vpop.f32.mrb[60].mxu0  ;;  %v2004_v0 = vpop.f32.mrb[60].mxu1 }
 0x20c   : > { %v2917_v1 = vadd.f32 %v2916_v44, %v5239_v56  ;;  %v2932_v4 = vmul.f32 %v5239_v56, %v5239_v56  ;;  %v2855_v5 = vadd.f32 %v2847_v62, %v2004_v0  ;;  %v1892_v6 = vpop.f32.mrb[61].mxu0  ;;  %v2006_v7 = vpop.f32.mrb[61].mxu1 }
 0x20d   : > { %v1894_v8 = vpop.f32.mrb[62].mxu0  ;;  %v2008_v9 = vpop.f32.mrb[62].mxu1  ;;  %v2824_v15 = vrot.slane %v1892_v6, 1  ;;  %v2885_v16 = vrot.slane %v2006_v7, 1 }
 0x20e   : > { %v2939_v10 = vadd.f32 %v2938_v36, %v2932_v4  ;;  %v1895_v11 = vpop.f32.mrb[63].mxu0  ;;  %v2009_v14 = vpop.f32.mrb[63].mxu1 }
 0x20f   : > { %v2825_v18 = vrot.slane %v1895_v11, 1  ;;  %v2886_v19 = vrot.slane %v2009_v14, 1 }
 0x210   : > { %2577 = vmatmul.mubr.bf16.gmra.mrb[168].mxu0 %v4886_v17  ;;  %2702 = vmatmul.mubr.bf16.gmra.mrb[168].mxu1 %v4886_v17 }
 0x211   : > { %v2887_v20 = vsel %vm842_vm0, %v2885_v16, %v2886_v19  ;;  %v2826_v21 = vsel %vm842_vm0, %v2824_v15, %v2825_v18  ;;  %2586 = vmatprep.mubr.bf16.mxu0 %v4443_v2  ;;  %2707 = vmatprep.mubr.bf16.mxu1 %v4443_v2 }
 0x212   : > { %v5250_v22 = vadd.f32 %v2887_v20, %v2855_v5  ;;  %v2848_v23 = vadd.f32 %v2826_v21, %v1890_v63 }
 0x213   : > { %v1899_v24 = vpop.f32.mrb[64].mxu0  ;;  %v2013_v26 = vpop.f32.mrb[64].mxu1 }
 0x214   : > { %v2918_v27 = vadd.f32 %v2917_v1, %v5250_v22  ;;  %v2933_v28 = vmul.f32 %v5250_v22, %v5250_v22  ;;  %v2856_v30 = vadd.f32 %v2848_v23, %v2013_v26  ;;  %v1901_v17 = vpop.f32.mrb[65].mxu0  ;;  %v2015_v31 = vpop.f32.mrb[65].mxu1 }
 0x215   : > { %v1903_v32 = vpop.f32.mrb[66].mxu0  ;;  %v2017_v34 = vpop.f32.mrb[66].mxu1  ;;  %v2827_v41 = vrot.slane %v1901_v17, 1  ;;  %v2888_v42 = vrot.slane %v2015_v31, 1 }
 0x216   : > { %v2940_v35 = vadd.f32 %v2939_v10, %v2933_v28  ;;  %v1904_v37 = vpop.f32.mrb[67].mxu0  ;;  %v2018_v40 = vpop.f32.mrb[67].mxu1 }
 0x217   : > { %v2828_v43 = vrot.slane %v1904_v37, 1  ;;  %v2889_v44 = vrot.slane %v2018_v40, 1 }
 0x218   : > { %2587 = vmatmul.mubr.bf16.gmra.mrb[172].mxu0 %v4894_v39  ;;  %2708 = vmatmul.mubr.bf16.gmra.mrb[172].mxu1 %v4894_v39 }
 0x219   : > { %v2890_v45 = vsel %vm842_vm0, %v2888_v42, %v2889_v44  ;;  %v2829_v47 = vsel %vm842_vm0, %v2827_v41, %v2828_v43  ;;  %2596 = vmatprep.mubr.bf16.mxu0 %v4443_v2  ;;  %2717 = vmatprep.mubr.bf16.mxu1 %v4443_v2 }
 0x21a   : > { %v5261_v48 = vadd.f32 %v2890_v45, %v2856_v30  ;;  %v2849_v53 = vadd.f32 %v2829_v47, %v1899_v24 }
 0x21b   : > { %v1908_v57 = vpop.f32.mrb[68].mxu0  ;;  %v2022_v58 = vpop.f32.mrb[68].mxu1 }
 0x21c   : > { %v2919_v36 = vadd.f32 %v2918_v27, %v5261_v48  ;;  %v2934_v59 = vmul.f32 %v5261_v48, %v5261_v48  ;;  %v2857_v60 = vadd.f32 %v2849_v53, %v2022_v58  ;;  %v1910_v39 = vpop.f32.mrb[69].mxu0  ;;  %v2024_v61 = vpop.f32.mrb[69].mxu1 }
 0x21d   : > { %v1912_v50 = vpop.f32.mrb[70].mxu0  ;;  %v2026_v51 = vpop.f32.mrb[70].mxu1  ;;  %v2830_v62 = vrot.slane %v1910_v39, 1  ;;  %v2891_v63 = vrot.slane %v2024_v61, 1 }
 0x21e   : > { %v2941_v52 = vadd.f32 %v2940_v35, %v2934_v59  ;;  %v1913_v54 = vpop.f32.mrb[71].mxu0  ;;  %v2027_v55 = vpop.f32.mrb[71].mxu1 }
 0x21f   : > { %v2831_v0 = vrot.slane %v1913_v54, 1  ;;  %v2892_v1 = vrot.slane %v2027_v55, 1 }
 0x220   : > { %2597 = vmatmul.mubr.bf16.gmra.mrb[176].mxu0 %v4902_v3  ;;  %2718 = vmatmul.mubr.bf16.gmra.mrb[176].mxu1 %v4902_v3 }
 0x221   : > { %v2893_v4 = vsel %vm842_vm0, %v2891_v63, %v2892_v1  ;;  %v2832_v5 = vsel %vm842_vm0, %v2830_v62, %v2831_v0  ;;  %2606 = vmatprep.mubr.bf16.mxu0 %v4443_v2  ;;  %2727 = vmatprep.mubr.bf16.mxu1 %v4443_v2 }
 0x222   : > { %v5272_v6 = vadd.f32 %v2893_v4, %v2857_v60  ;;  %v2850_v7 = vadd.f32 %v2832_v5, %v1908_v57 }
 0x223   : > { %v1917_v8 = vpop.f32.mrb[72].mxu0  ;;  %v2031_v9 = vpop.f32.mrb[72].mxu1 }
 0x224   : > { %v2920_v10 = vadd.f32 %v2919_v36, %v5272_v6  ;;  %v2935_v11 = vmul.f32 %v5272_v6, %v5272_v6  ;;  %v2858_v14 = vadd.f32 %v2850_v7, %v2031_v9  ;;  %v1919_v3 = vpop.f32.mrb[73].mxu0  ;;  %v2033_v15 = vpop.f32.mrb[73].mxu1 }
 0x225   : > { %v1921_v16 = vpop.f32.mrb[74].mxu0  ;;  %v2035_v18 = vpop.f32.mrb[74].mxu1  ;;  %v2833_v23 = vrot.slane %v1919_v3, 1  ;;  %v2894_v24 = vrot.slane %v2033_v15, 1 }
 0x226   : > { %v2942_v19 = vadd.f32 %v2941_v52, %v2935_v11  ;;  %v1922_v20 = vpop.f32.mrb[75].mxu0  ;;  %v2036_v21 = vpop.f32.mrb[75].mxu1 }
 0x227   : > { %v2834_v26 = vrot.slane %v1922_v20, 1  ;;  %v2895_v27 = vrot.slane %v2036_v21, 1 }
 0x228   : > { %2607 = vmatmul.mubr.bf16.gmra.mrb[180].mxu0 %v4910_v25  ;;  %2728 = vmatmul.mubr.bf16.gmra.mrb[180].mxu1 %v4910_v25 }
 0x229   : > { %v2896_v28 = vsel %vm842_vm0, %v2894_v24, %v2895_v27  ;;  %v2835_v30 = vsel %vm842_vm0, %v2833_v23, %v2834_v26  ;;  %2616 = vmatprep.mubr.bf16.mxu0 %v4443_v2  ;;  %2737 = vmatprep.mubr.bf16.mxu1 %v4443_v2 }
 0x22a   : > { %v5283_v17 = vadd.f32 %v2896_v28, %v2858_v14  ;;  %v2851_v31 = vadd.f32 %v2835_v30, %v1917_v8 }
 0x22b   : > { %v1926_v32 = vpop.f32.mrb[76].mxu0  ;;  %v2040_v34 = vpop.f32.mrb[76].mxu1 }
 0x22c   : > { %v2921_v35 = vadd.f32 %v2920_v10, %v5283_v17  ;;  %v2936_v37 = vmul.f32 %v5283_v17, %v5283_v17  ;;  %v2859_v40 = vadd.f32 %v2851_v31, %v2040_v34  ;;  %v1927_v25 = vpop.f32.mrb[77].mxu0  ;;  %v2042_v41 = vpop.f32.mrb[77].mxu1 }
 0x22d   : > { %v1928_v42 = vpop.f32.mrb[78].mxu0  ;;  %v2044_v43 = vpop.f32.mrb[78].mxu1  ;;  %v2897_v53 = vrot.slane %v2042_v41, 1 }
 0x22e   : > { %v2943_v44 = vadd.f32 %v2942_v19, %v2936_v37  ;;  %v1929_v45 = vpop.f32.mrb[79].mxu0  ;;  %v2045_v47 = vpop.f32.mrb[79].mxu1 }
 0x22f   : > { %v2898_v57 = vrot.slane %v2045_v47, 1 }
 0x230   : > { %2617 = vmatmul.mubr.bf16.gmra.mrb[184].mxu0 %v4918_v49  ;;  %2738 = vmatmul.mubr.bf16.gmra.mrb[184].mxu1 %v4918_v49 }
 0x231   : > { %v2899_v58 = vsel %vm842_vm0, %v2897_v53, %v2898_v57  ;;  %2626 = vmatprep.mubr.bf16.mxu0 %v4443_v2  ;;  %2747 = vmatprep.mubr.bf16.mxu1 %v4443_v2 }
 0x232   : > { %v5293_v36 = vadd.f32 %v2899_v58, %v2859_v40 }
 0x233   : > { %v2049_v59 = vpop.f32.mrb[80].mxu1  ;;  %v1932_v60 = vpop.f32.mrb[80].mxu0 }
 0x234   : > { %v5296_v39 = vadd.f32 %v2921_v35, %v5293_v36  ;;  %v2937_v61 = vmul.f32 %v5293_v36, %v5293_v36  ;;  %v2050_v50 = vpop.f32.mrb[81].mxu1  ;;  %v1933_v51 = vpop.f32.mrb[81].mxu0 }
 0x235   : > { %v2051_v52 = vpop.f32.mrb[82].mxu1  ;;  %v1934_v49 = vpop.f32.mrb[82].mxu0 }
 0x236   : > { %v5300_v54 = vadd.f32 %v2943_v44, %v2937_v61  ;;  %v2052_v55 = vpop.f32.mrb[83].mxu1  ;;  %v1935_v62 = vpop.f32.mrb[83].mxu0 }
 0x238   : > { %2627 = vmatmul.mubr.bf16.gmra.mrb[188].mxu0 %v4926_v12  ;;  %2748 = vmatmul.mubr.bf16.gmra.mrb[188].mxu1 %v4926_v12 }
 0x239   : > { %2636 = vmatprep.mubr.bf16.mxu0 %v4443_v2  ;;  %2757 = vmatprep.mubr.bf16.mxu1 %v4443_v2 }
 0x23b   : > { %v2088_v63 = vpop.f32.mrb[84].mxu0  ;;  %v2213_v0 = vpop.f32.mrb[84].mxu1 }
 0x23c   : > { %v2090_v1 = vpop.f32.mrb[85].mxu0  ;;  %v2214_v4 = vpop.f32.mrb[85].mxu1 }
 0x23d   : > { %v2992_v5 = vrot.slane %v2090_v1, 1  ;;  %v2092_v7 = vpop.f32.mrb[86].mxu0  ;;  %v2215_v8 = vpop.f32.mrb[86].mxu1 }
 0x23e   : > { %v2094_v9 = vpop.f32.mrb[87].mxu0  ;;  %v2216_v10 = vpop.f32.mrb[87].mxu1 }
 0x23f   : > { %v2993_v11 = vrot.slane %v2094_v9, 1 }
 0x240   : > { %2637 = vmatmul.mubr.bf16.gmra.mrb[192].mxu0 %v4933_v29  ;;  %2758 = vmatmul.mubr.bf16.gmra.mrb[192].mxu1 %v4933_v29 }
 0x241   : > { %v2994_v12 = vsel %vm842_vm0, %v2992_v5, %v2993_v11  ;;  %v3033_v14 = vadd.f32 %v2993_v11, %v2092_v7  ;;  %2646 = vmatprep.mubr.bf16.mxu0 %v4443_v2  ;;  %2767 = vmatprep.mubr.bf16.mxu1 %v4443_v2 }
 0x242   : > { %v3032_v3 = vadd.f32 %v2994_v12, %v2088_v63  ;;  %v2952_v12 = vpack.c.bf16 %v5217_v13, %v5217_v13 }
 0x243   : > { %v2098_v15 = vpop.f32.mrb[88].mxu0  ;;  %v2219_v16 = vpop.f32.mrb[88].mxu1 }
 0x244   : > { %v3048_v18 = vadd.f32 %v3032_v3, %v2219_v16  ;;  %v2100_v19 = vpop.f32.mrb[89].mxu0  ;;  %v2221_v20 = vpop.f32.mrb[89].mxu1 }
 0x245   : > { %v2102_v21 = vpop.f32.mrb[90].mxu0  ;;  %v2223_v23 = vpop.f32.mrb[90].mxu1  ;;  %v2995_v29 = vrot.slane %v2100_v19, 1  ;;  %v3080_v28 = vrot.slane %v2221_v20, 1 }
 0x246   : > { %v3049_v24 = vadd.f32 %v3033_v14, %v2223_v23  ;;  %v2104_v26 = vpop.f32.mrb[91].mxu0  ;;  %v2225_v27 = vpop.f32.mrb[91].mxu1 }
 0x247   : > { %v2996_v30 = vrot.slane %v2104_v26, 1  ;;  %v3081_v31 = vrot.slane %v2225_v27, 1 }
 0x248   : > { %2647 = vmatmul.mubr.bf16.gmra.mrb[196].mxu0 %v4939_v33  ;;  %2768 = vmatmul.mubr.bf16.gmra.mrb[196].mxu1 %v4939_v33 }
 0x249   : > { %v3082_v32 = vsel %vm842_vm0, %v3080_v28, %v3081_v31  ;;  %v3121_v34 = vadd.f32 %v3081_v31, %v3049_v24  ;;  %v2997_v35 = vsel %vm842_vm0, %v2995_v29, %v2996_v30  ;;  %v3035_v37 = vadd.f32 %v2996_v30, %v2102_v21  ;;  %2777 = vmatprep.mubr.bf16.mxu1 %v4443_v2 }
 0x24a   : > { %v3120_v40 = vadd.f32 %v3082_v32, %v3048_v18  ;;  %v3034_v25 = vadd.f32 %v2997_v35, %v2098_v15  ;;  %2656 = vmatprep.mubr.bf16.mxu0 %v4443_v2 }
 0x24b   : > { %v3153_v41 = vrot.slane %v3121_v34, 1  ;;  %v3199_v42 = vmul.f32 %v3121_v34, %v3121_v34  ;;  %v2108_v43 = vpop.f32.mrb[92].mxu0  ;;  %v2229_v44 = vpop.f32.mrb[92].mxu1 }
 0x24c   : > { %v3152_v33 = vrot.slane %v3120_v40, 1  ;;  %v3198_v45 = vmul.f32 %v3120_v40, %v3120_v40  ;;  %v3276_v47 = vpack.c.bf16 %v3121_v34, %v3120_v40  ;;  %v3050_v53 = vadd.f32 %v3034_v25, %v2229_v44  ;;  %v2110_v57 = vpop.f32.mrb[93].mxu0  ;;  %v2231_v58 = vpop.f32.mrb[93].mxu1 }
 0x24d   : > { %v3231_v59 = vrot.slane %v3199_v42, 1  ;;  %v2112_v60 = vpop.f32.mrb[94].mxu0  ;;  %v2233_v61 = vpop.f32.mrb[94].mxu1  ;;  %v2998_v52 = vrot.slane %v2110_v57, 1  ;;  %v3083_v62 = vrot.slane %v2231_v58, 1 }
 0x24e   : > { %v3154_v50 = vsel %vm842_vm0, %v3152_v33, %v3153_v41  ;;  %v3230_v2 = vrot.slane %v3198_v45, 1  ;;  %v3287_v51 = vshll.u32 %v3276_v47, 16  ;;  %v2114_v49 = vpop.f32.mrb[95].mxu0  ;;  %v2235_v55 = vpop.f32.mrb[95].mxu1  ;;  %v3051_v63 = vadd.f32 %v3035_v37, %v2233_v61 }
 0x24f   : > { %v2999_v0 = vrot.slane %v2114_v49, 1  ;;  %v3084_v1 = vrot.slane %v2235_v55, 1  ;;  %v3285_v5 = vshrl.u32 %v3276_v47, 16  ;;  %v2953_v33 = vpack.c.bf16 %v5225_v38, %v5225_v38 }
 0x250   : > { %v3232_v4 = vsel %vm842_vm0, %v3230_v2, %v3231_v59  ;;  %v3289_v7 = vrot.slane %v3287_v51, 1  ;;  %2778 = vmatmul.mubr.bf16.gmra.mrb[200].mxu1 %v4445_v46  ;;  %2657 = vmatmul.mubr.bf16.gmra.mrb[200].mxu0 %v4445_v46 }
 0x251   : > { %v3085_v8 = vsel %vm842_vm0, %v3083_v62, %v3084_v1  ;;  %v3123_v9 = vadd.f32 %v3084_v1, %v3051_v63  ;;  %v3000_v10 = vsel %vm842_vm0, %v2998_v52, %v2999_v0  ;;  %v3037_v11 = vadd.f32 %v2999_v0, %v2112_v60 }
 0x252   : > { %v3290_v14 = vor.u32 %v3289_v7, %v3285_v5  ;;  %v3122_v3 = vadd.f32 %v3085_v8, %v3050_v53  ;;  %v3036_v15 = vadd.f32 %v3000_v10, %v2108_v43 }
 0x253   : > { %v3156_v16 = vrot.slane %v3123_v9, 1  ;;  %v3201_v46 = vmul.f32 %v3123_v9, %v3123_v9  ;;  %v2118_v18 = vpop.f32.mrb[96].mxu0  ;;  %v2239_v19 = vpop.f32.mrb[96].mxu1 }
 0x254   : > { %v4313_v20 = vcombine.low %v2952_v12, %v3290_v14  ;;  %v3155_v21 = vrot.slane %v3122_v3, 1  ;;  %v3200_v23 = vmul.f32 %v3122_v3, %v3122_v3  ;;  %v3277_v24 = vpack.c.bf16 %v3123_v9, %v3122_v3  ;;  %v2120_v26 = vpop.f32.mrb[97].mxu0  ;;  %v2241_v27 = vpop.f32.mrb[97].mxu1 }
 0x255   : > { %v3234_v13 = vrot.slane %v3201_v46, 1  ;;  %v3052_v29 = vadd.f32 %v3036_v15, %v2239_v19  ;;  %v3001_v28 = vrot.slane %v2120_v26, 1  ;;  %v2122_v30 = vpop.f32.mrb[98].mxu0  ;;  %v2243_v31 = vpop.f32.mrb[98].mxu1  ;;  %v3086_v37 = vrot.slane %v2241_v27, 1 }
 0x256   : > { %3972 = vst [vmem:[%s5338_s6] sm:$0xff] %v4313_v20  ;;  %v3157_v32 = vsel %vm842_vm0, %v3155_v21, %v3156_v16  ;;  %v3233_v34 = vrot.slane %v3200_v23, 1  ;;  %v3294_v35 = vshll.u32 %v3277_v24, 16  ;;  %v2124_v40 = vpop.f32.mrb[99].mxu0  ;;  %v2245_v25 = vpop.f32.mrb[99].mxu1  ;;  %v3053_v42 = vadd.f32 %v3037_v11, %v2243_v31 }
 0x257   : > { %v3184_v41 = vadd.f32 %v3157_v32, %v3154_v50  ;;  %v3002_v43 = vrot.slane %v2124_v40, 1  ;;  %v3087_v44 = vrot.slane %v2245_v25, 1  ;;  %v3292_v47 = vshrl.u32 %v3277_v24, 16 }
 0x258   : > { %v3235_v45 = vsel %vm842_vm0, %v3233_v34, %v3234_v13  ;;  %v3296_v53 = vrot.slane %v3294_v35, 1  ;;  %v2954_v23 = vpack.c.bf16 %v5239_v56, %v5239_v56 }
 0x259   : > { %v3262_v57 = vadd.f32 %v3235_v45, %v3232_v4  ;;  %v3088_v58 = vsel %vm842_vm0, %v3086_v37, %v3087_v44  ;;  %v3125_v59 = vadd.f32 %v3087_v44, %v3053_v42  ;;  %v3003_v60 = vsel %vm842_vm0, %v3001_v28, %v3002_v43 }
 0x25a   : > { %v3297_v61 = vor.u32 %v3296_v53, %v3292_v47  ;;  %v3124_v2 = vadd.f32 %v3088_v58, %v3052_v29  ;;  %v3038_v51 = vadd.f32 %v3003_v60, %v2118_v18  ;;  %v3039_v50 = vadd.f32 %v3002_v43, %v2122_v30 }
 0x25b   : > { %v3159_v52 = vrot.slane %v3125_v59, 1  ;;  %v3203_v49 = vmul.f32 %v3125_v59, %v3125_v59  ;;  %v2128_v55 = vpop.f32.mrb[100].mxu0  ;;  %v2249_v62 = vpop.f32.mrb[100].mxu1 }
 0x25c   : > { %v4315_v38 = vcombine.low %v2953_v33, %v3297_v61  ;;  %v3158_v63 = vrot.slane %v3124_v2, 1  ;;  %v3202_v0 = vmul.f32 %v3124_v2, %v3124_v2  ;;  %v3278_v1 = vpack.c.bf16 %v3125_v59, %v3124_v2  ;;  %v2130_v5 = vpop.f32.mrb[101].mxu0  ;;  %v2251_v4 = vpop.f32.mrb[101].mxu1 }
 0x25d   : > { %v3237_v7 = vrot.slane %v3203_v49, 1  ;;  %v3054_v8 = vadd.f32 %v3038_v51, %v2249_v62  ;;  %v3004_v9 = vrot.slane %v2130_v5, 1  ;;  %v2132_v10 = vpop.f32.mrb[102].mxu0  ;;  %v2253_v11 = vpop.f32.mrb[102].mxu1  ;;  %v3089_v15 = vrot.slane %v2251_v4, 1 }
 0x25e   : > { %3974 = vst [vmem:[%s5338_s6 + $0x10] sm:$0xff] %v4315_v38  ;;  %v3160_v12 = vsel %vm842_vm0, %v3158_v63, %v3159_v52  ;;  %v3236_v14 = vrot.slane %v3202_v0, 1  ;;  %v3301_v3 = vshll.u32 %v3278_v1, 16  ;;  %v2134_v16 = vpop.f32.mrb[103].mxu0  ;;  %v2255_v46 = vpop.f32.mrb[103].mxu1  ;;  %v3055_v19 = vadd.f32 %v3039_v50, %v2253_v11 }
 0x25f   : > { %v3185_v18 = vadd.f32 %v3184_v41, %v3160_v12  ;;  %v3005_v20 = vrot.slane %v2134_v16, 1  ;;  %v3090_v21 = vrot.slane %v2255_v46, 1  ;;  %v3299_v26 = vshrl.u32 %v3278_v1, 16 }
 0x260   : > { %v3238_v24 = vsel %vm842_vm0, %v3236_v14, %v3237_v7  ;;  %v3303_v27 = vrot.slane %v3301_v3, 1  ;;  %v2955_v63 = vpack.c.bf16 %v5250_v22, %v5250_v22 }
 0x261   : > { %v3263_v13 = vadd.f32 %v3262_v57, %v3238_v24  ;;  %v3091_v29 = vsel %vm842_vm0, %v3089_v15, %v3090_v21  ;;  %v3127_v28 = vadd.f32 %v3090_v21, %v3055_v19  ;;  %v3006_v30 = vsel %vm842_vm0, %v3004_v9, %v3005_v20 }
 0x262   : > { %v3304_v31 = vor.u32 %v3303_v27, %v3299_v26  ;;  %v3126_v32 = vadd.f32 %v3091_v29, %v3054_v8  ;;  %v3040_v34 = vadd.f32 %v3006_v30, %v2128_v55  ;;  %v3041_v35 = vadd.f32 %v3005_v20, %v2132_v10 }
 0x263   : > { %v3162_v37 = vrot.slane %v3127_v28, 1  ;;  %v3205_v40 = vmul.f32 %v3127_v28, %v3127_v28  ;;  %v2138_v25 = vpop.f32.mrb[104].mxu0  ;;  %v2259_v41 = vpop.f32.mrb[104].mxu1 }
 0x264   : > { %v4317_v56 = vcombine.low %v2954_v23, %v3304_v31  ;;  %v3161_v42 = vrot.slane %v3126_v32, 1  ;;  %v3204_v43 = vmul.f32 %v3126_v32, %v3126_v32  ;;  %v3279_v44 = vpack.c.bf16 %v3127_v28, %v3126_v32  ;;  %v2140_v33 = vpop.f32.mrb[105].mxu0  ;;  %v2261_v45 = vpop.f32.mrb[105].mxu1 }
 0x265   : > { %v3240_v47 = vrot.slane %v3205_v40, 1  ;;  %v3056_v53 = vadd.f32 %v3040_v34, %v2259_v41  ;;  %v3007_v57 = vrot.slane %v2140_v33, 1  ;;  %v2142_v58 = vpop.f32.mrb[106].mxu0  ;;  %v2263_v59 = vpop.f32.mrb[106].mxu1  ;;  %v3092_v51 = vrot.slane %v2261_v45, 1 }
 0x266   : > { %3976 = vst [vmem:[%s5338_s6 + $0x20] sm:$0xff] %v4317_v56  ;;  %v3163_v60 = vsel %vm842_vm0, %v3161_v42, %v3162_v37  ;;  %v3239_v61 = vrot.slane %v3204_v43, 1  ;;  %v3308_v2 = vshll.u32 %v3279_v44, 16  ;;  %v2144_v50 = vpop.f32.mrb[107].mxu0  ;;  %v2265_v52 = vpop.f32.mrb[107].mxu1  ;;  %v3057_v55 = vadd.f32 %v3041_v35, %v2263_v59 }
 0x267   : > { %v3186_v49 = vadd.f32 %v3185_v18, %v3163_v60  ;;  %v3008_v62 = vrot.slane %v2144_v50, 1  ;;  %v3093_v38 = vrot.slane %v2265_v52, 1  ;;  %v3306_v1 = vshrl.u32 %v3279_v44, 16 }
 0x268   : > { %v3241_v0 = vsel %vm842_vm0, %v3239_v61, %v3240_v47  ;;  %v3310_v5 = vrot.slane %v3308_v2, 1  ;;  %v2956_v56 = vpack.c.bf16 %v5261_v48, %v5261_v48 }
 0x269   : > { %v3264_v4 = vadd.f32 %v3263_v13, %v3241_v0  ;;  %v3094_v7 = vsel %vm842_vm0, %v3092_v51, %v3093_v38  ;;  %v3129_v8 = vadd.f32 %v3093_v38, %v3057_v55  ;;  %v3009_v9 = vsel %vm842_vm0, %v3007_v57, %v3008_v62 }
 0x26a   : > { %v3311_v10 = vor.u32 %v3310_v5, %v3306_v1  ;;  %v3128_v11 = vadd.f32 %v3094_v7, %v3056_v53  ;;  %v3042_v12 = vadd.f32 %v3009_v9, %v2138_v25  ;;  %v3043_v14 = vadd.f32 %v3008_v62, %v2142_v58 }
 0x26b   : > { %v3165_v3 = vrot.slane %v3129_v8, 1  ;;  %v3207_v15 = vmul.f32 %v3129_v8, %v3129_v8  ;;  %v2148_v16 = vpop.f32.mrb[108].mxu0  ;;  %v2269_v46 = vpop.f32.mrb[108].mxu1 }
 0x26c   : > { %v4319_v22 = vcombine.low %v2955_v63, %v3311_v10  ;;  %v3164_v18 = vrot.slane %v3128_v11, 1  ;;  %v3206_v19 = vmul.f32 %v3128_v11, %v3128_v11  ;;  %v3280_v20 = vpack.c.bf16 %v3129_v8, %v3128_v11  ;;  %v2150_v21 = vpop.f32.mrb[109].mxu0  ;;  %v2271_v23 = vpop.f32.mrb[109].mxu1 }
 0x26d   : > { %v3243_v24 = vrot.slane %v3207_v15, 1  ;;  %v3058_v26 = vadd.f32 %v3042_v12, %v2269_v46  ;;  %v3010_v27 = vrot.slane %v2150_v21, 1  ;;  %v2152_v13 = vpop.f32.mrb[110].mxu0  ;;  %v2273_v29 = vpop.f32.mrb[110].mxu1  ;;  %v3095_v32 = vrot.slane %v2271_v23, 1 }
 0x26e   : > { %3978 = vst [vmem:[%s5338_s6 + $0x30] sm:$0xff] %v4319_v22  ;;  %v3166_v28 = vsel %vm842_vm0, %v3164_v18, %v3165_v3  ;;  %v3242_v30 = vrot.slane %v3206_v19, 1  ;;  %v3315_v31 = vshll.u32 %v3280_v20, 16  ;;  %v2154_v34 = vpop.f32.mrb[111].mxu0  ;;  %v2275_v35 = vpop.f32.mrb[111].mxu1  ;;  %v3059_v40 = vadd.f32 %v3043_v14, %v2273_v29 }
 0x26f   : > { %v3187_v37 = vadd.f32 %v3186_v49, %v3166_v28  ;;  %v3011_v25 = vrot.slane %v2154_v34, 1  ;;  %v3096_v41 = vrot.slane %v2275_v35, 1  ;;  %v3313_v43 = vshrl.u32 %v3280_v20, 16 }
 0x270   : > { %v3244_v42 = vsel %vm842_vm0, %v3242_v30, %v3243_v24  ;;  %v3317_v44 = vrot.slane %v3315_v31, 1  ;;  %v2957_v46 = vpack.c.bf16 %v5272_v6, %v5272_v6 }
 0x271   : > { %v3265_v33 = vadd.f32 %v3264_v4, %v3244_v42  ;;  %v3097_v45 = vsel %vm842_vm0, %v3095_v32, %v3096_v41  ;;  %v3131_v47 = vadd.f32 %v3096_v41, %v3059_v40  ;;  %v3012_v53 = vsel %vm842_vm0, %v3010_v27, %v3011_v25 }
 0x272   : > { %v3318_v57 = vor.u32 %v3317_v44, %v3313_v43  ;;  %v3130_v58 = vadd.f32 %v3097_v45, %v3058_v26  ;;  %v3044_v59 = vadd.f32 %v3012_v53, %v2148_v16  ;;  %v3045_v60 = vadd.f32 %v3011_v25, %v2152_v13 }
 0x273   : > { %v3168_v61 = vrot.slane %v3131_v47, 1  ;;  %v3209_v2 = vmul.f32 %v3131_v47, %v3131_v47  ;;  %v2158_v51 = vpop.f32.mrb[112].mxu0  ;;  %v2279_v50 = vpop.f32.mrb[112].mxu1  ;;  %v2923_v44 = vrot.slane %v5296_v39, 4 }
 0x274   : > { %v4321_v48 = vcombine.low %v2956_v56, %v3318_v57  ;;  %v3167_v52 = vrot.slane %v3130_v58, 1  ;;  %v3208_v49 = vmul.f32 %v3130_v58, %v3130_v58  ;;  %v3281_v55 = vpack.c.bf16 %v3131_v47, %v3130_v58  ;;  %v2160_v62 = vpop.f32.mrb[113].mxu0  ;;  %v2281_v38 = vpop.f32.mrb[113].mxu1 }
 0x275   : > { %v3246_v63 = vrot.slane %v3209_v2, 1  ;;  %v3060_v0 = vadd.f32 %v3044_v59, %v2279_v50  ;;  %v3013_v1 = vrot.slane %v2160_v62, 1  ;;  %v2162_v5 = vpop.f32.mrb[114].mxu0  ;;  %v2283_v4 = vpop.f32.mrb[114].mxu1  ;;  %v3098_v10 = vrot.slane %v2281_v38, 1 }
 0x276   : > { %3980 = vst [vmem:[%s5338_s6 + $0x40] sm:$0xff] %v4321_v48  ;;  %v3169_v7 = vsel %vm842_vm0, %v3167_v52, %v3168_v61  ;;  %v3245_v8 = vrot.slane %v3208_v49, 1  ;;  %v3322_v9 = vshll.u32 %v3281_v55, 16  ;;  %v2164_v11 = vpop.f32.mrb[115].mxu0  ;;  %v2285_v12 = vpop.f32.mrb[115].mxu1  ;;  %v3061_v3 = vadd.f32 %v3045_v60, %v2283_v4 }
 0x277   : > { %v3188_v14 = vadd.f32 %v3187_v37, %v3169_v7  ;;  %v3014_v15 = vrot.slane %v2164_v11, 1  ;;  %v3099_v16 = vrot.slane %v2285_v12, 1  ;;  %v3320_v18 = vshrl.u32 %v3281_v55, 16 }
 0x278   : > { %v3247_v22 = vsel %vm842_vm0, %v3245_v8, %v3246_v63  ;;  %v3324_v19 = vrot.slane %v3322_v9, 1  ;;  %v2945_v48 = vrot.slane %v5300_v54, 4  ;;  %v2958_v62 = vpack.c.bf16 %v5283_v17, %v5283_v17 }
 0x279   : > { %v3266_v20 = vadd.f32 %v3265_v33, %v3247_v22  ;;  %v3100_v21 = vsel %vm842_vm0, %v3098_v10, %v3099_v16  ;;  %v3133_v23 = vadd.f32 %v3099_v16, %v3061_v3  ;;  %v3015_v24 = vsel %vm842_vm0, %v3013_v1, %v3014_v15 }
 0x27a   : > { %v3325_v26 = vor.u32 %v3324_v19, %v3320_v18  ;;  %v3132_v27 = vadd.f32 %v3100_v21, %v3060_v0  ;;  %v3046_v13 = vadd.f32 %v3015_v24, %v2158_v51  ;;  %v3047_v29 = vadd.f32 %v3014_v15, %v2162_v5 }
 0x27b   : > { %v3171_v28 = vrot.slane %v3133_v23, 1  ;;  %v3211_v30 = vmul.f32 %v3133_v23, %v3133_v23  ;;  %v2168_v31 = vpop.f32.mrb[116].mxu0  ;;  %v2289_v32 = vpop.f32.mrb[116].mxu1  ;;  %v2924_v0 = vadd.f32 %v2923_v44, %v5296_v39  ;;  %v2946_v3 = vadd.f32 %v2945_v48, %v5300_v54 }
 0x27c   : > { %v4323_v6 = vcombine.low %v2957_v46, %v3325_v26  ;;  %v3170_v34 = vrot.slane %v3132_v27, 1  ;;  %v3210_v35 = vmul.f32 %v3132_v27, %v3132_v27  ;;  %v3282_v37 = vpack.c.bf16 %v3133_v23, %v3132_v27  ;;  %v2169_v40 = vpop.f32.mrb[117].mxu0  ;;  %v2291_v25 = vpop.f32.mrb[117].mxu1 }
 0x27d   : > { %v3249_v41 = vrot.slane %v3211_v30, 1  ;;  %v3062_v56 = vadd.f32 %v3046_v13, %v2289_v32  ;;  %v2170_v42 = vpop.f32.mrb[118].mxu0  ;;  %v2293_v43 = vpop.f32.mrb[118].mxu1  ;;  %v3101_v59 = vrot.slane %v2291_v25, 1  ;;  %v2947_v27 = vrot.slane %v2946_v3, 2 }
 0x27e   : > { %3982 = vst [vmem:[%s5338_s6 + $0x50] sm:$0xff] %v4323_v6  ;;  %v3172_v33 = vsel %vm842_vm0, %v3170_v34, %v3171_v28  ;;  %v3248_v45 = vrot.slane %v3210_v35, 1  ;;  %v3329_v47 = vshll.u32 %v3282_v37, 16  ;;  %v2171_v53 = vpop.f32.mrb[119].mxu0  ;;  %v2295_v57 = vpop.f32.mrb[119].mxu1  ;;  %v3063_v60 = vadd.f32 %v3047_v29, %v2293_v43 }
 0x27f   : > { %v3189_v58 = vadd.f32 %v3188_v14, %v3172_v33  ;;  %v3102_v61 = vrot.slane %v2295_v57, 1  ;;  %v3327_v51 = vshrl.u32 %v3282_v37, 16  ;;  %v2959_v54 = vpack.c.bf16 %v5293_v36, %v5293_v36 }
 0x280   : > { %v3250_v2 = vsel %vm842_vm0, %v3248_v45, %v3249_v41  ;;  %v3331_v50 = vrot.slane %v3329_v47, 1  ;;  %v2948_v25 = vadd.f32 %v2947_v27, %v2946_v3 }
 0x281   : > { %v3267_v52 = vadd.f32 %v3266_v20, %v3250_v2  ;;  %v3103_v49 = vsel %vm842_vm0, %v3101_v59, %v3102_v61  ;;  %v3135_v55 = vadd.f32 %v3102_v61, %v3063_v60  ;;  %v2925_v20 = vrot.slane %v2924_v0, 2 }
 0x282   : > { %v3332_v38 = vor.u32 %v3331_v50, %v3327_v51  ;;  %v3134_v63 = vadd.f32 %v3103_v49, %v3062_v56  ;;  %v2949_v53 = vrot.slane %v2948_v25, 1 }
 0x283   : > { %v3174_v1 = vrot.slane %v3135_v55, 1  ;;  %v3213_v5 = vmul.f32 %v3135_v55, %v3135_v55  ;;  %v2299_v4 = vpop.f32.mrb[120].mxu1  ;;  %v2174_v7 = vpop.f32.mrb[120].mxu0  ;;  %v2926_v30 = vadd.f32 %v2925_v20, %v2924_v0 }
 0x284   : > { %v4325_v8 = vcombine.low %v2958_v62, %v3332_v38  ;;  %v3173_v9 = vrot.slane %v3134_v63, 1  ;;  %v3212_v10 = vmul.f32 %v3134_v63, %v3134_v63  ;;  %v3283_v11 = vpack.c.bf16 %v3135_v55, %v3134_v63  ;;  %v2300_v12 = vpop.f32.mrb[121].mxu1  ;;  %v2175_v14 = vpop.f32.mrb[121].mxu0 }
 0x285   : > { %v3252_v15 = vrot.slane %v3213_v5, 1  ;;  %v2301_v16 = vpop.f32.mrb[122].mxu1  ;;  %v2176_v17 = vpop.f32.mrb[122].mxu0  ;;  %v2927_v45 = vrot.slane %v2926_v30, 1 }
 0x286   : > { %3984 = vst [vmem:[%s5338_s6 + $0x60] sm:$0xff] %v4325_v8  ;;  %v3175_v46 = vsel %vm842_vm0, %v3173_v9, %v3174_v1  ;;  %v3251_v22 = vrot.slane %v3212_v10, 1  ;;  %v3336_v39 = vshll.u32 %v3283_v11, 16  ;;  %v2302_v18 = vpop.f32.mrb[123].mxu1  ;;  %v2177_v19 = vpop.f32.mrb[123].mxu0  ;;  %v3334_v24 = vshrl.u32 %v3283_v11, 16 }
 0x287   : > { %v3190_v21 = vadd.f32 %v3189_v58, %v3175_v46  ;;  %v2928_v59 = vadd.f32 %v2927_v45, %v2926_v30 }
 0x288   : > { %v3253_v23 = vsel %vm842_vm0, %v3251_v22, %v3252_v15  ;;  %v3338_v26 = vrot.slane %v3336_v39, 1 }
 0x289   : > { %v3191_v13 = vrot.slane %v3190_v21, 4  ;;  %v3268_v29 = vadd.f32 %v3267_v52, %v3253_v23  ;;  %v2950_v52 = vadd.f32 %v2949_v53, %v2948_v25 }
 0x28a   : > { %v3339_v28 = vor.u32 %v3338_v26, %v3334_v24 }
 0x28b   : > { %v3192_v31 = vadd.f32 %v3191_v13, %v3190_v21  ;;  %v3269_v32 = vrot.slane %v3268_v29, 4  ;;  %v2455_v6 = vpop.f32.mrb[124].mxu1  ;;  %v2338_v34 = vpop.f32.mrb[124].mxu0 }
 0x28c   : > { %v4327_v35 = vcombine.low %v2959_v54, %v3339_v28  ;;  %v2456_v37 = vpop.f32.mrb[125].mxu1  ;;  %v2339_v40 = vpop.f32.mrb[125].mxu0 }
 0x28d   : > { %v3193_v41 = vrot.slane %v3192_v31, 2  ;;  %v3270_v56 = vadd.f32 %v3269_v32, %v3268_v29  ;;  %v2457_v42 = vpop.f32.mrb[126].mxu1  ;;  %v2340_v43 = vpop.f32.mrb[126].mxu0 }
 0x28e   : > { %3986 = vst [vmem:[%s5338_s6 + $0x70] sm:$0xff] %v4327_v35  ;;  %v2458_v44 = vpop.f32.mrb[127].mxu1  ;;  %v2341_v33 = vpop.f32.mrb[127].mxu0 }
 0x28f   : > { %v3194_v47 = vadd.f32 %v3193_v41, %v3192_v31  ;;  %v3271_v36 = vrot.slane %v3270_v56, 2 }
 0x291   : > { %v3195_v57 = vrot.slane %v3194_v47, 1  ;;  %v3272_v58 = vadd.f32 %v3271_v36, %v3270_v56 }
 0x293   : > { %v3196_v60 = vadd.f32 %v3195_v57, %v3194_v47  ;;  %v3273_v61 = vrot.slane %v3272_v58, 1  ;;  %v2344_v2 = vpop.f32.mrb[128].mxu0  ;;  %v2461_v51 = vpop.f32.mrb[128].mxu1 }
 0x294   : > { %v2346_v50 = vpop.f32.mrb[129].mxu0  ;;  %v2462_v48 = vpop.f32.mrb[129].mxu1 }
 0x295   : > { %v3274_v49 = vadd.f32 %v3273_v61, %v3272_v58  ;;  %v2348_v55 = vpop.f32.mrb[130].mxu0  ;;  %v2463_v62 = vpop.f32.mrb[130].mxu1  ;;  %v5391_v38 = vadd.f32 %v3196_v60, %v2928_v59  ;;  %v3364_v5 = vrot.slane %v2346_v50, 1  ;;  %v4418_v48 = vld [vmem:[#allocation2] sm:$0xff] }
 0x296   : > { %v2349_v63 = vpop.f32.mrb[131].mxu0  ;;  %v2464_v0 = vpop.f32.mrb[131].mxu1  ;;  %3991 = vst [vmem:[%s5414_s12] sm:$0xff] %v4418_v48  ;;  %3992 = vst [vmem:[%s5419_s15] sm:$0xff] %v4418_v48 }
 0x297   : > { %v5393_v1 = vadd.f32 %v3274_v49, %v2950_v52  ;;  %v3365_v4 = vrot.slane %v2349_v63, 1 }
 0x299   : > { %v3366_v7 = vsel %vm842_vm0, %v3364_v5, %v3365_v4 }
 0x29a   : > { %v3396_v8 = vadd.f32 %v3366_v7, %v2344_v2 }
 0x29b   : > { %v2353_v9 = vpop.f32.mrb[132].mxu0  ;;  %v2467_v10 = vpop.f32.mrb[132].mxu1 }
 0x29c   : > { %v3404_v11 = vadd.f32 %v3396_v8, %v2467_v10  ;;  %v2355_v12 = vpop.f32.mrb[133].mxu0  ;;  %v2469_v14 = vpop.f32.mrb[133].mxu1 }
 0x29d   : > { %v2357_v3 = vpop.f32.mrb[134].mxu0  ;;  %v2471_v15 = vpop.f32.mrb[134].mxu1  ;;  %v3367_v46 = vrot.slane %v2355_v12, 1  ;;  %v3428_v22 = vrot.slane %v2469_v14, 1 }
 0x29e   : > { %v2358_v16 = vpop.f32.mrb[135].mxu0  ;;  %v2472_v17 = vpop.f32.mrb[135].mxu1 }
 0x29f   : > { %v3368_v39 = vrot.slane %v2358_v16, 1  ;;  %v3429_v18 = vrot.slane %v2472_v17, 1 }
 0x2a1   : > { %v3430_v19 = vsel %vm842_vm0, %v3428_v22, %v3429_v18  ;;  %v3369_v20 = vsel %vm842_vm0, %v3367_v46, %v3368_v39 }
 0x2a2   : > { %v5398_v21 = vadd.f32 %v3430_v19, %v3404_v11  ;;  %v3397_v23 = vadd.f32 %v3369_v20, %v2353_v9 }
 0x2a3   : > { %v2362_v24 = vpop.f32.mrb[136].mxu0  ;;  %v2476_v26 = vpop.f32.mrb[136].mxu1 }
 0x2a4   : > { %v3405_v27 = vadd.f32 %v3397_v23, %v2476_v26  ;;  %v2364_v13 = vpop.f32.mrb[137].mxu0  ;;  %v2478_v29 = vpop.f32.mrb[137].mxu1  ;;  %v3482_v43 = vmul.f32 %v5398_v21, %v5398_v21 }
 0x2a5   : > { %v2366_v54 = vpop.f32.mrb[138].mxu0  ;;  %v2480_v28 = vpop.f32.mrb[138].mxu1  ;;  %v3370_v32 = vrot.slane %v2364_v13, 1  ;;  %v3431_v6 = vrot.slane %v2478_v29, 1 }
 0x2a6   : > { %v2367_v30 = vpop.f32.mrb[139].mxu0  ;;  %v2481_v31 = vpop.f32.mrb[139].mxu1 }
 0x2a7   : > { %v3371_v34 = vrot.slane %v2367_v30, 1  ;;  %v3432_v35 = vrot.slane %v2481_v31, 1 }
 0x2a9   : > { %v3433_v37 = vsel %vm842_vm0, %v3431_v6, %v3432_v35  ;;  %v3372_v40 = vsel %vm842_vm0, %v3370_v32, %v3371_v34 }
 0x2aa   : > { %v5402_v25 = vadd.f32 %v3433_v37, %v3405_v27  ;;  %v3398_v41 = vadd.f32 %v3372_v40, %v2362_v24 }
 0x2ab   : > { %v2371_v56 = vpop.f32.mrb[140].mxu0  ;;  %v2485_v42 = vpop.f32.mrb[140].mxu1 }
 0x2ac   : > { %v3468_v44 = vadd.f32 %v5402_v25, %v5398_v21  ;;  %v3483_v33 = vmul.f32 %v5402_v25, %v5402_v25  ;;  %v3406_v45 = vadd.f32 %v3398_v41, %v2485_v42  ;;  %v2373_v47 = vpop.f32.mrb[141].mxu0  ;;  %v2487_v36 = vpop.f32.mrb[141].mxu1 }
 0x2ad   : > { %v2375_v53 = vpop.f32.mrb[142].mxu0  ;;  %v2489_v57 = vpop.f32.mrb[142].mxu1  ;;  %v3373_v61 = vrot.slane %v2373_v47, 1  ;;  %v3434_v2 = vrot.slane %v2487_v36, 1 }
 0x2ae   : > { %v3490_v58 = vadd.f32 %v3483_v33, %v3482_v43  ;;  %v2376_v59 = vpop.f32.mrb[143].mxu0  ;;  %v2490_v60 = vpop.f32.mrb[143].mxu1 }
 0x2af   : > { %v3374_v51 = vrot.slane %v2376_v59, 1  ;;  %v3435_v50 = vrot.slane %v2490_v60, 1 }
 0x2b1   : > { %v3436_v52 = vsel %vm842_vm0, %v3434_v2, %v3435_v50  ;;  %v3375_v49 = vsel %vm842_vm0, %v3373_v61, %v3374_v51 }
 0x2b2   : > { %v5425_v55 = vadd.f32 %v3436_v52, %v3406_v45  ;;  %v3399_v62 = vadd.f32 %v3375_v49, %v2371_v56 }
 0x2b3   : > { %v2380_v63 = vpop.f32.mrb[144].mxu0  ;;  %v2494_v0 = vpop.f32.mrb[144].mxu1 }
 0x2b4   : > { %v3469_v5 = vadd.f32 %v3468_v44, %v5425_v55  ;;  %v3484_v4 = vmul.f32 %v5425_v55, %v5425_v55  ;;  %v3407_v7 = vadd.f32 %v3399_v62, %v2494_v0  ;;  %v2382_v8 = vpop.f32.mrb[145].mxu0  ;;  %v2496_v9 = vpop.f32.mrb[145].mxu1 }
 0x2b5   : > { %v2384_v10 = vpop.f32.mrb[146].mxu0  ;;  %v2498_v11 = vpop.f32.mrb[146].mxu1  ;;  %v3376_v15 = vrot.slane %v2382_v8, 1  ;;  %v3437_v16 = vrot.slane %v2496_v9, 1 }
 0x2b6   : > { %v3491_v12 = vadd.f32 %v3490_v58, %v3484_v4  ;;  %v2385_v14 = vpop.f32.mrb[147].mxu0  ;;  %v2499_v3 = vpop.f32.mrb[147].mxu1 }
 0x2b7   : > { %v3377_v17 = vrot.slane %v2385_v14, 1  ;;  %v3438_v46 = vrot.slane %v2499_v3, 1 }
 0x2b9   : > { %v3439_v22 = vsel %vm842_vm0, %v3437_v16, %v3438_v46  ;;  %v3378_v39 = vsel %vm842_vm0, %v3376_v15, %v3377_v17 }
 0x2ba   : > { %v5432_v18 = vadd.f32 %v3439_v22, %v3407_v7  ;;  %v3400_v19 = vadd.f32 %v3378_v39, %v2380_v63 }
 0x2bb   : > { %v2389_v20 = vpop.f32.mrb[148].mxu0  ;;  %v2503_v23 = vpop.f32.mrb[148].mxu1 }
 0x2bc   : > { %v3470_v24 = vadd.f32 %v3469_v5, %v5432_v18  ;;  %v3485_v26 = vmul.f32 %v5432_v18, %v5432_v18  ;;  %v3408_v27 = vadd.f32 %v3400_v19, %v2503_v23  ;;  %v2391_v13 = vpop.f32.mrb[149].mxu0  ;;  %v2505_v29 = vpop.f32.mrb[149].mxu1 }
 0x2bd   : > { %v2393_v54 = vpop.f32.mrb[150].mxu0  ;;  %v2507_v28 = vpop.f32.mrb[150].mxu1  ;;  %v3379_v6 = vrot.slane %v2391_v13, 1  ;;  %v3440_v34 = vrot.slane %v2505_v29, 1 }
 0x2be   : > { %v3492_v30 = vadd.f32 %v3491_v12, %v3485_v26  ;;  %v2394_v31 = vpop.f32.mrb[151].mxu0  ;;  %v2508_v32 = vpop.f32.mrb[151].mxu1 }
 0x2bf   : > { %v3380_v35 = vrot.slane %v2394_v31, 1  ;;  %v3441_v37 = vrot.slane %v2508_v32, 1 }
 0x2c1   : > { %v3442_v40 = vsel %vm842_vm0, %v3440_v34, %v3441_v37  ;;  %v3381_v41 = vsel %vm842_vm0, %v3379_v6, %v3380_v35 }
 0x2c2   : > { %v5439_v56 = vadd.f32 %v3442_v40, %v3408_v27  ;;  %v3401_v42 = vadd.f32 %v3381_v41, %v2389_v20 }
 0x2c3   : > { %v2398_v43 = vpop.f32.mrb[152].mxu0  ;;  %v2512_v44 = vpop.f32.mrb[152].mxu1 }
 0x2c4   : > { %v3471_v33 = vadd.f32 %v3470_v24, %v5439_v56  ;;  %v3486_v45 = vmul.f32 %v5439_v56, %v5439_v56  ;;  %v3409_v47 = vadd.f32 %v3401_v42, %v2512_v44  ;;  %v2400_v36 = vpop.f32.mrb[153].mxu0  ;;  %v2514_v53 = vpop.f32.mrb[153].mxu1 }
 0x2c5   : > { %v2402_v57 = vpop.f32.mrb[154].mxu0  ;;  %v2516_v58 = vpop.f32.mrb[154].mxu1  ;;  %v3382_v2 = vrot.slane %v2400_v36, 1  ;;  %v3443_v51 = vrot.slane %v2514_v53, 1 }
 0x2c6   : > { %v3493_v59 = vadd.f32 %v3492_v30, %v3486_v45  ;;  %v2403_v60 = vpop.f32.mrb[155].mxu0  ;;  %v2517_v61 = vpop.f32.mrb[155].mxu1 }
 0x2c7   : > { %v3383_v50 = vrot.slane %v2403_v60, 1  ;;  %v3444_v48 = vrot.slane %v2517_v61, 1 }
 0x2c9   : > { %v3445_v52 = vsel %vm842_vm0, %v3443_v51, %v3444_v48  ;;  %v3384_v49 = vsel %vm842_vm0, %v3382_v2, %v3383_v50 }
 0x2ca   : > { %v5446_v62 = vadd.f32 %v3445_v52, %v3409_v47  ;;  %v3402_v63 = vadd.f32 %v3384_v49, %v2398_v43 }
 0x2cb   : > { %v2407_v0 = vpop.f32.mrb[156].mxu0  ;;  %v2521_v5 = vpop.f32.mrb[156].mxu1 }
 0x2cc   : > { %v3472_v4 = vadd.f32 %v3471_v33, %v5446_v62  ;;  %v3487_v7 = vmul.f32 %v5446_v62, %v5446_v62  ;;  %v3410_v8 = vadd.f32 %v3402_v63, %v2521_v5  ;;  %v2409_v9 = vpop.f32.mrb[157].mxu0  ;;  %v2523_v10 = vpop.f32.mrb[157].mxu1 }
 0x2cd   : > { %v2411_v11 = vpop.f32.mrb[158].mxu0  ;;  %v2525_v12 = vpop.f32.mrb[158].mxu1  ;;  %v3385_v16 = vrot.slane %v2409_v9, 1  ;;  %v3446_v17 = vrot.slane %v2523_v10, 1 }
 0x2ce   : > { %v3494_v14 = vadd.f32 %v3493_v59, %v3487_v7  ;;  %v2412_v3 = vpop.f32.mrb[159].mxu0  ;;  %v2526_v15 = vpop.f32.mrb[159].mxu1 }
 0x2cf   : > { %v3386_v46 = vrot.slane %v2412_v3, 1  ;;  %v3447_v22 = vrot.slane %v2526_v15, 1 }
 0x2d1   : > { %v3448_v39 = vsel %vm842_vm0, %v3446_v17, %v3447_v22  ;;  %v3387_v19 = vsel %vm842_vm0, %v3385_v16, %v3386_v46 }
 0x2d2   : > { %v5453_v20 = vadd.f32 %v3448_v39, %v3410_v8  ;;  %v3403_v23 = vadd.f32 %v3387_v19, %v2407_v0 }
 0x2d3   : > { %v2530_v24 = vpop.f32.mrb[160].mxu1  ;;  %v2416_v26 = vpop.f32.mrb[160].mxu0 }
 0x2d4   : > { %v3473_v27 = vadd.f32 %v3472_v4, %v5453_v20  ;;  %v3488_v13 = vmul.f32 %v5453_v20, %v5453_v20  ;;  %v3411_v29 = vadd.f32 %v3403_v23, %v2530_v24  ;;  %v2532_v54 = vpop.f32.mrb[161].mxu1  ;;  %v2417_v28 = vpop.f32.mrb[161].mxu0 }
 0x2d5   : > { %v2534_v30 = vpop.f32.mrb[162].mxu1  ;;  %v2418_v31 = vpop.f32.mrb[162].mxu0  ;;  %v3449_v35 = vrot.slane %v2532_v54, 1 }
 0x2d6   : > { %v3495_v32 = vadd.f32 %v3494_v14, %v3488_v13  ;;  %v2535_v6 = vpop.f32.mrb[163].mxu1  ;;  %v2419_v34 = vpop.f32.mrb[163].mxu0 }
 0x2d7   : > { %v3450_v37 = vrot.slane %v2535_v6, 1 }
 0x2d9   : > { %v3451_v40 = vsel %vm842_vm0, %v3449_v35, %v3450_v37 }
 0x2da   : > { %v5459_v41 = vadd.f32 %v3451_v40, %v3411_v29 }
 0x2db   : > { %v2697_v42 = vpop.f32.mrb[164].mxu1  ;;  %v2572_v43 = vpop.f32.mrb[164].mxu0 }
 0x2dc   : > { %v3474_v44 = vadd.f32 %v3473_v27, %v5459_v41  ;;  %v3489_v33 = vmul.f32 %v5459_v41, %v5459_v41  ;;  %v2698_v45 = vpop.f32.mrb[165].mxu1  ;;  %v2573_v47 = vpop.f32.mrb[165].mxu0 }
 0x2dd   : > { %v2699_v36 = vpop.f32.mrb[166].mxu1  ;;  %v2574_v53 = vpop.f32.mrb[166].mxu0 }
 0x2de   : > { %v3475_v57 = vrot.slane %v3474_v44, 4  ;;  %v3496_v58 = vadd.f32 %v3495_v32, %v3489_v33  ;;  %v2700_v59 = vpop.f32.mrb[167].mxu1  ;;  %v2575_v60 = vpop.f32.mrb[167].mxu0 }
 0x2e0   : > { %v3476_v61 = vadd.f32 %v3475_v57, %v3474_v44  ;;  %v3497_v2 = vrot.slane %v3496_v58, 4 }
 0x2e2   : > { %v3477_v51 = vrot.slane %v3476_v61, 2  ;;  %v3498_v50 = vadd.f32 %v3497_v2, %v3496_v58 }
 0x2e3   : > { %v2578_v48 = vpop.f32.mrb[168].mxu0  ;;  %v2703_v52 = vpop.f32.mrb[168].mxu1 }
 0x2e4   : > { %v3478_v49 = vadd.f32 %v3477_v51, %v3476_v61  ;;  %v3499_v63 = vrot.slane %v3498_v50, 2  ;;  %v2580_v0 = vpop.f32.mrb[169].mxu0  ;;  %v2704_v5 = vpop.f32.mrb[169].mxu1 }
 0x2e5   : > { %v2582_v4 = vpop.f32.mrb[170].mxu0  ;;  %v2705_v7 = vpop.f32.mrb[170].mxu1  ;;  %v3544_v12 = vrot.slane %v2580_v0, 1 }
 0x2e6   : > { %v3479_v8 = vrot.slane %v3478_v49, 1  ;;  %v3500_v9 = vadd.f32 %v3499_v63, %v3498_v50  ;;  %v2584_v10 = vpop.f32.mrb[171].mxu0  ;;  %v2706_v11 = vpop.f32.mrb[171].mxu1 }
 0x2e7   : > { %v3545_v14 = vrot.slane %v2584_v10, 1 }
 0x2e8   : > { %v3480_v3 = vadd.f32 %v3479_v8, %v3478_v49  ;;  %v3501_v15 = vrot.slane %v3500_v9, 1 }
 0x2e9   : > { %v3546_v16 = vsel %vm842_vm0, %v3544_v12, %v3545_v14  ;;  %v3585_v17 = vadd.f32 %v3545_v14, %v2582_v4 }
 0x2ea   : > { %v5466_v46 = vadd.f32 %v3480_v3, %v5391_v38  ;;  %v3502_v22 = vadd.f32 %v3501_v15, %v3500_v9  ;;  %v3584_v39 = vadd.f32 %v3546_v16, %v2578_v48  ;;  %v3504_v16 = vpack.c.bf16 %v5398_v21, %v5398_v21 }
 0x2eb   : > { %v2588_v19 = vpop.f32.mrb[172].mxu0  ;;  %v2709_v23 = vpop.f32.mrb[172].mxu1 }
 0x2ec   : > { %v5469_v24 = vadd.f32 %v3502_v22, %v5393_v1  ;;  %v3600_v26 = vadd.f32 %v3584_v39, %v2709_v23  ;;  %v2590_v27 = vpop.f32.mrb[173].mxu0  ;;  %v2711_v13 = vpop.f32.mrb[173].mxu1 }
 0x2ed   : > { %v2592_v29 = vpop.f32.mrb[174].mxu0  ;;  %v2713_v54 = vpop.f32.mrb[174].mxu1  ;;  %v3547_v32 = vrot.slane %v2590_v27, 1  ;;  %v3632_v6 = vrot.slane %v2711_v13, 1 }
 0x2ee   : > { %v3601_v28 = vadd.f32 %v3585_v17, %v2713_v54  ;;  %v2594_v30 = vpop.f32.mrb[175].mxu0  ;;  %v2715_v31 = vpop.f32.mrb[175].mxu1 }
 0x2ef   : > { %v3548_v34 = vrot.slane %v2594_v30, 1  ;;  %v3633_v38 = vrot.slane %v2715_v31, 1 }
 0x2f1   : > { %v3634_v35 = vsel %vm842_vm0, %v3632_v6, %v3633_v38  ;;  %v3673_v37 = vadd.f32 %v3633_v38, %v3601_v28  ;;  %v3549_v40 = vsel %vm842_vm0, %v3547_v32, %v3548_v34  ;;  %v3587_v42 = vadd.f32 %v3548_v34, %v2592_v29 }
 0x2f2   : > { %v3672_v1 = vadd.f32 %v3634_v35, %v3600_v26  ;;  %v3586_v43 = vadd.f32 %v3549_v40, %v2588_v19 }
 0x2f3   : > { %v3705_v44 = vrot.slane %v3673_v37, 1  ;;  %v3751_v33 = vmul.f32 %v3673_v37, %v3673_v37  ;;  %v2598_v45 = vpop.f32.mrb[176].mxu0  ;;  %v2719_v47 = vpop.f32.mrb[176].mxu1 }
 0x2f4   : > { %v3704_v36 = vrot.slane %v3672_v1, 1  ;;  %v3750_v53 = vmul.f32 %v3672_v1, %v3672_v1  ;;  %v3828_v57 = vpack.c.bf16 %v3673_v37, %v3672_v1  ;;  %v3602_v58 = vadd.f32 %v3586_v43, %v2719_v47  ;;  %v2600_v59 = vpop.f32.mrb[177].mxu0  ;;  %v2721_v60 = vpop.f32.mrb[177].mxu1 }
 0x2f5   : > { %v3783_v61 = vrot.slane %v3751_v33, 1  ;;  %v2602_v2 = vpop.f32.mrb[178].mxu0  ;;  %v2723_v51 = vpop.f32.mrb[178].mxu1  ;;  %v3550_v49 = vrot.slane %v2600_v59, 1  ;;  %v3635_v5 = vrot.slane %v2721_v60, 1 }
 0x2f6   : > { %v3706_v50 = vsel %vm842_vm0, %v3704_v36, %v3705_v44  ;;  %v3782_v48 = vrot.slane %v3750_v53, 1  ;;  %v3839_v52 = vshll.u32 %v3828_v57, 16  ;;  %v2604_v63 = vpop.f32.mrb[179].mxu0  ;;  %v2725_v0 = vpop.f32.mrb[179].mxu1  ;;  %v3603_v4 = vadd.f32 %v3587_v42, %v2723_v51 }
 0x2f7   : > { %v3551_v7 = vrot.slane %v2604_v63, 1  ;;  %v3636_v8 = vrot.slane %v2725_v0, 1  ;;  %v3837_v10 = vshrl.u32 %v3828_v57, 16  ;;  %v3505_v36 = vpack.c.bf16 %v5402_v25, %v5402_v25 }
 0x2f8   : > { %v3784_v9 = vsel %vm842_vm0, %v3782_v48, %v3783_v61  ;;  %v3841_v11 = vrot.slane %v3839_v52, 1 }
 0x2f9   : > { %v3637_v12 = vsel %vm842_vm0, %v3635_v5, %v3636_v8  ;;  %v3675_v14 = vadd.f32 %v3636_v8, %v3603_v4  ;;  %v3552_v3 = vsel %vm842_vm0, %v3550_v49, %v3551_v7  ;;  %v3589_v15 = vadd.f32 %v3551_v7, %v2602_v2 }
 0x2fa   : > { %v3842_v17 = vor.u32 %v3841_v11, %v3837_v10  ;;  %v3674_v22 = vadd.f32 %v3637_v12, %v3602_v58  ;;  %v3588_v39 = vadd.f32 %v3552_v3, %v2598_v45 }
 0x2fb   : > { %v3708_v19 = vrot.slane %v3675_v14, 1  ;;  %v3753_v23 = vmul.f32 %v3675_v14, %v3675_v14  ;;  %v2608_v26 = vpop.f32.mrb[180].mxu0  ;;  %v2729_v27 = vpop.f32.mrb[180].mxu1 }
 0x2fc   : > { %v4314_v13 = vcombine.low %v3504_v16, %v3842_v17  ;;  %v3707_v29 = vrot.slane %v3674_v22, 1  ;;  %v3752_v54 = vmul.f32 %v3674_v22, %v3674_v22  ;;  %v3829_v28 = vpack.c.bf16 %v3675_v14, %v3674_v22  ;;  %v2610_v30 = vpop.f32.mrb[181].mxu0  ;;  %v2731_v31 = vpop.f32.mrb[181].mxu1 }
 0x2fd   : > { %v3786_v32 = vrot.slane %v3753_v23, 1  ;;  %v3604_v6 = vadd.f32 %v3588_v39, %v2729_v27  ;;  %v3553_v34 = vrot.slane %v2610_v30, 1  ;;  %v2612_v38 = vpop.f32.mrb[182].mxu0  ;;  %v2733_v35 = vpop.f32.mrb[182].mxu1  ;;  %v3638_v42 = vrot.slane %v2731_v31, 1 }
 0x2fe   : > { %3973 = vst [vmem:[%s5338_s6 + $0x8] sm:$0xff] %v4314_v13  ;;  %v3709_v21 = vsel %vm842_vm0, %v3707_v29, %v3708_v19  ;;  %v3785_v37 = vrot.slane %v3752_v54, 1  ;;  %v3846_v40 = vshll.u32 %v3829_v28, 16  ;;  %v2614_v1 = vpop.f32.mrb[183].mxu0  ;;  %v2735_v43 = vpop.f32.mrb[183].mxu1  ;;  %v3605_v33 = vadd.f32 %v3589_v15, %v2733_v35 }
 0x2ff   : > { %v3736_v44 = vadd.f32 %v3709_v21, %v3706_v50  ;;  %v3554_v45 = vrot.slane %v2614_v1, 1  ;;  %v3639_v47 = vrot.slane %v2735_v43, 1  ;;  %v3844_v57 = vshrl.u32 %v3829_v28, 16 }
 0x300   : > { %v3787_v53 = vsel %vm842_vm0, %v3785_v37, %v3786_v32  ;;  %v3848_v58 = vrot.slane %v3846_v40, 1  ;;  %v3506_v54 = vpack.c.bf16 %v5425_v55, %v5425_v55 }
 0x301   : > { %v3814_v59 = vadd.f32 %v3787_v53, %v3784_v9  ;;  %v3640_v60 = vsel %vm842_vm0, %v3638_v42, %v3639_v47  ;;  %v3677_v61 = vadd.f32 %v3639_v47, %v3605_v33  ;;  %v3555_v2 = vsel %vm842_vm0, %v3553_v34, %v3554_v45 }
 0x302   : > { %v3849_v51 = vor.u32 %v3848_v58, %v3844_v57  ;;  %v3676_v48 = vadd.f32 %v3640_v60, %v3604_v6  ;;  %v3590_v52 = vadd.f32 %v3555_v2, %v2608_v26  ;;  %v3591_v50 = vadd.f32 %v3554_v45, %v2612_v38 }
 0x303   : > { %v3711_v49 = vrot.slane %v3677_v61, 1  ;;  %v3755_v63 = vmul.f32 %v3677_v61, %v3677_v61  ;;  %v2618_v0 = vpop.f32.mrb[184].mxu0  ;;  %v2739_v5 = vpop.f32.mrb[184].mxu1 }
 0x304   : > { %v4316_v25 = vcombine.low %v3505_v36, %v3849_v51  ;;  %v3710_v4 = vrot.slane %v3676_v48, 1  ;;  %v3754_v7 = vmul.f32 %v3676_v48, %v3676_v48  ;;  %v3830_v8 = vpack.c.bf16 %v3677_v61, %v3676_v48  ;;  %v2620_v10 = vpop.f32.mrb[185].mxu0  ;;  %v2741_v9 = vpop.f32.mrb[185].mxu1 }
 0x305   : > { %v3789_v11 = vrot.slane %v3755_v63, 1  ;;  %v3606_v12 = vadd.f32 %v3590_v52, %v2739_v5  ;;  %v3556_v14 = vrot.slane %v2620_v10, 1  ;;  %v2622_v3 = vpop.f32.mrb[186].mxu0  ;;  %v2743_v15 = vpop.f32.mrb[186].mxu1  ;;  %v3641_v39 = vrot.slane %v2741_v9, 1 }
 0x306   : > { %3975 = vst [vmem:[%s5338_s6 + $0x18] sm:$0xff] %v4316_v25  ;;  %v3712_v16 = vsel %vm842_vm0, %v3710_v4, %v3711_v49  ;;  %v3788_v17 = vrot.slane %v3754_v7, 1  ;;  %v3853_v22 = vshll.u32 %v3830_v8, 16  ;;  %v2624_v19 = vpop.f32.mrb[187].mxu0  ;;  %v2745_v23 = vpop.f32.mrb[187].mxu1  ;;  %v3607_v27 = vadd.f32 %v3591_v50, %v2743_v15 }
 0x307   : > { %v3737_v26 = vadd.f32 %v3736_v44, %v3712_v16  ;;  %v3557_v13 = vrot.slane %v2624_v19, 1  ;;  %v3642_v29 = vrot.slane %v2745_v23, 1  ;;  %v3851_v30 = vshrl.u32 %v3830_v8, 16 }
 0x308   : > { %v3790_v28 = vsel %vm842_vm0, %v3788_v17, %v3789_v11  ;;  %v3855_v31 = vrot.slane %v3853_v22, 1  ;;  %v3507_v4 = vpack.c.bf16 %v5432_v18, %v5432_v18 }
 0x309   : > { %v3815_v32 = vadd.f32 %v3814_v59, %v3790_v28  ;;  %v3643_v6 = vsel %vm842_vm0, %v3641_v39, %v3642_v29  ;;  %v3679_v34 = vadd.f32 %v3642_v29, %v3607_v27  ;;  %v3558_v38 = vsel %vm842_vm0, %v3556_v14, %v3557_v13 }
 0x30a   : > { %v3856_v35 = vor.u32 %v3855_v31, %v3851_v30  ;;  %v3678_v21 = vadd.f32 %v3643_v6, %v3606_v12  ;;  %v3592_v37 = vadd.f32 %v3558_v38, %v2618_v0  ;;  %v3593_v40 = vadd.f32 %v3557_v13, %v2622_v3 }
 0x30b   : > { %v3714_v42 = vrot.slane %v3679_v34, 1  ;;  %v3757_v1 = vmul.f32 %v3679_v34, %v3679_v34  ;;  %v2628_v43 = vpop.f32.mrb[188].mxu0  ;;  %v2749_v44 = vpop.f32.mrb[188].mxu1 }
 0x30c   : > { %v4318_v55 = vcombine.low %v3506_v54, %v3856_v35  ;;  %v3713_v33 = vrot.slane %v3678_v21, 1  ;;  %v3756_v45 = vmul.f32 %v3678_v21, %v3678_v21  ;;  %v3831_v47 = vpack.c.bf16 %v3679_v34, %v3678_v21  ;;  %v2630_v36 = vpop.f32.mrb[189].mxu0  ;;  %v2751_v53 = vpop.f32.mrb[189].mxu1 }
 0x30d   : > { %v3792_v57 = vrot.slane %v3757_v1, 1  ;;  %v3608_v58 = vadd.f32 %v3592_v37, %v2749_v44  ;;  %v3559_v59 = vrot.slane %v2630_v36, 1  ;;  %v2632_v60 = vpop.f32.mrb[190].mxu0  ;;  %v2753_v61 = vpop.f32.mrb[190].mxu1  ;;  %v3644_v52 = vrot.slane %v2751_v53, 1 }
 0x30e   : > { %3977 = vst [vmem:[%s5338_s6 + $0x28] sm:$0xff] %v4318_v55  ;;  %v3715_v2 = vsel %vm842_vm0, %v3713_v33, %v3714_v42  ;;  %v3791_v51 = vrot.slane %v3756_v45, 1  ;;  %v3860_v48 = vshll.u32 %v3831_v47, 16  ;;  %v2634_v50 = vpop.f32.mrb[191].mxu0  ;;  %v2755_v49 = vpop.f32.mrb[191].mxu1  ;;  %v3609_v0 = vadd.f32 %v3593_v40, %v2753_v61 }
 0x30f   : > { %v3738_v63 = vadd.f32 %v3737_v26, %v3715_v2  ;;  %v3560_v5 = vrot.slane %v2634_v50, 1  ;;  %v3645_v25 = vrot.slane %v2755_v49, 1  ;;  %v3858_v8 = vshrl.u32 %v3831_v47, 16 }
 0x310   : > { %v3793_v7 = vsel %vm842_vm0, %v3791_v51, %v3792_v57  ;;  %v3862_v10 = vrot.slane %v3860_v48, 1  ;;  %v3508_v55 = vpack.c.bf16 %v5439_v56, %v5439_v56 }
 0x311   : > { %v3816_v9 = vadd.f32 %v3815_v32, %v3793_v7  ;;  %v3646_v11 = vsel %vm842_vm0, %v3644_v52, %v3645_v25  ;;  %v3681_v12 = vadd.f32 %v3645_v25, %v3609_v0  ;;  %v3561_v14 = vsel %vm842_vm0, %v3559_v59, %v3560_v5 }
 0x312   : > { %v3863_v3 = vor.u32 %v3862_v10, %v3858_v8  ;;  %v3680_v15 = vadd.f32 %v3646_v11, %v3608_v58  ;;  %v3594_v16 = vadd.f32 %v3561_v14, %v2628_v43  ;;  %v3595_v17 = vadd.f32 %v3560_v5, %v2632_v60 }
 0x313   : > { %v3717_v22 = vrot.slane %v3681_v12, 1  ;;  %v3759_v39 = vmul.f32 %v3681_v12, %v3681_v12  ;;  %v2638_v19 = vpop.f32.mrb[192].mxu0  ;;  %v2759_v23 = vpop.f32.mrb[192].mxu1 }
 0x314   : > { %v4320_v18 = vcombine.low %v3507_v4, %v3863_v3  ;;  %v3716_v26 = vrot.slane %v3680_v15, 1  ;;  %v3758_v27 = vmul.f32 %v3680_v15, %v3680_v15  ;;  %v3832_v13 = vpack.c.bf16 %v3681_v12, %v3680_v15  ;;  %v2640_v29 = vpop.f32.mrb[193].mxu0  ;;  %v2761_v54 = vpop.f32.mrb[193].mxu1 }
 0x315   : > { %v3795_v28 = vrot.slane %v3759_v39, 1  ;;  %v3610_v30 = vadd.f32 %v3594_v16, %v2759_v23  ;;  %v3562_v31 = vrot.slane %v2640_v29, 1  ;;  %v2642_v32 = vpop.f32.mrb[194].mxu0  ;;  %v2763_v6 = vpop.f32.mrb[194].mxu1  ;;  %v3647_v21 = vrot.slane %v2761_v54, 1 }
 0x316   : > { %3979 = vst [vmem:[%s5338_s6 + $0x38] sm:$0xff] %v4320_v18  ;;  %v3718_v34 = vsel %vm842_vm0, %v3716_v26, %v3717_v22  ;;  %v3794_v38 = vrot.slane %v3758_v27, 1  ;;  %v3867_v35 = vshll.u32 %v3832_v13, 16  ;;  %v2644_v37 = vpop.f32.mrb[195].mxu0  ;;  %v2765_v40 = vpop.f32.mrb[195].mxu1  ;;  %v3611_v1 = vadd.f32 %v3595_v17, %v2763_v6 }
 0x317   : > { %v3739_v42 = vadd.f32 %v3738_v63, %v3718_v34  ;;  %v3563_v43 = vrot.slane %v2644_v37, 1  ;;  %v3648_v44 = vrot.slane %v2765_v40, 1  ;;  %v3865_v45 = vshrl.u32 %v3832_v13, 16 }
 0x318   : > { %v3796_v33 = vsel %vm842_vm0, %v3794_v38, %v3795_v28  ;;  %v3869_v47 = vrot.slane %v3867_v35, 1  ;;  %v3509_v23 = vpack.c.bf16 %v5446_v62, %v5446_v62 }
 0x319   : > { %v3817_v36 = vadd.f32 %v3816_v9, %v3796_v33  ;;  %v3649_v53 = vsel %vm842_vm0, %v3647_v21, %v3648_v44  ;;  %v3683_v57 = vadd.f32 %v3648_v44, %v3611_v1  ;;  %v3564_v58 = vsel %vm842_vm0, %v3562_v31, %v3563_v43 }
 0x31a   : > { %v3870_v59 = vor.u32 %v3869_v47, %v3865_v45  ;;  %v3682_v60 = vadd.f32 %v3649_v53, %v3610_v30  ;;  %v3596_v61 = vadd.f32 %v3564_v58, %v2638_v19  ;;  %v3597_v2 = vadd.f32 %v3563_v43, %v2642_v32 }
 0x31b   : > { %v3720_v51 = vrot.slane %v3683_v57, 1  ;;  %v3761_v48 = vmul.f32 %v3683_v57, %v3683_v57  ;;  %v2648_v52 = vpop.f32.mrb[196].mxu0  ;;  %v2769_v50 = vpop.f32.mrb[196].mxu1 }
 0x31c   : > { %v4322_v56 = vcombine.low %v3508_v55, %v3870_v59  ;;  %v3719_v49 = vrot.slane %v3682_v60, 1  ;;  %v3760_v63 = vmul.f32 %v3682_v60, %v3682_v60  ;;  %v3833_v0 = vpack.c.bf16 %v3683_v57, %v3682_v60  ;;  %v2650_v5 = vpop.f32.mrb[197].mxu0  ;;  %v2771_v25 = vpop.f32.mrb[197].mxu1 }
 0x31d   : > { %v3798_v4 = vrot.slane %v3761_v48, 1  ;;  %v3612_v7 = vadd.f32 %v3596_v61, %v2769_v50  ;;  %v3565_v8 = vrot.slane %v2650_v5, 1  ;;  %v2652_v10 = vpop.f32.mrb[198].mxu0  ;;  %v2773_v9 = vpop.f32.mrb[198].mxu1  ;;  %v3650_v3 = vrot.slane %v2771_v25, 1 }
 0x31e   : > { %3981 = vst [vmem:[%s5338_s6 + $0x48] sm:$0xff] %v4322_v56  ;;  %v3721_v11 = vsel %vm842_vm0, %v3719_v49, %v3720_v51  ;;  %v3797_v12 = vrot.slane %v3760_v63, 1  ;;  %v3874_v14 = vshll.u32 %v3833_v0, 16  ;;  %v2654_v15 = vpop.f32.mrb[199].mxu0  ;;  %v2775_v16 = vpop.f32.mrb[199].mxu1  ;;  %v3613_v22 = vadd.f32 %v3597_v2, %v2773_v9 }
 0x31f   : > { %v3740_v17 = vadd.f32 %v3739_v42, %v3721_v11  ;;  %v3566_v39 = vrot.slane %v2654_v15, 1  ;;  %v3651_v19 = vrot.slane %v2775_v16, 1  ;;  %v3872_v26 = vshrl.u32 %v3833_v0, 16 }
 0x320   : > { %v3799_v18 = vsel %vm842_vm0, %v3797_v12, %v3798_v4  ;;  %v3876_v27 = vrot.slane %v3874_v14, 1  ;;  %v3510_v63 = vpack.c.bf16 %v5453_v20, %v5453_v20 }
 0x321   : > { %v3818_v13 = vadd.f32 %v3817_v36, %v3799_v18  ;;  %v3652_v29 = vsel %vm842_vm0, %v3650_v3, %v3651_v19  ;;  %v3685_v54 = vadd.f32 %v3651_v19, %v3613_v22  ;;  %v3567_v28 = vsel %vm842_vm0, %v3565_v8, %v3566_v39 }
 0x322   : > { %v3877_v30 = vor.u32 %v3876_v27, %v3872_v26  ;;  %v3684_v31 = vadd.f32 %v3652_v29, %v3612_v7  ;;  %v3598_v32 = vadd.f32 %v3567_v28, %v2648_v52  ;;  %v3599_v6 = vadd.f32 %v3566_v39, %v2652_v10 }
 0x323   : > { %v3723_v34 = vrot.slane %v3685_v54, 1  ;;  %v3763_v38 = vmul.f32 %v3685_v54, %v3685_v54  ;;  %v2779_v35 = vpop.f32.mrb[200].mxu1  ;;  %v2658_v21 = vpop.f32.mrb[200].mxu0  ;;  %v3511_v19 = vpack.c.bf16 %v5459_v41, %v5459_v41 }
 0x324   : > { %v4324_v62 = vcombine.low %v3509_v23, %v3877_v30  ;;  %v3722_v37 = vrot.slane %v3684_v31, 1  ;;  %v3762_v40 = vmul.f32 %v3684_v31, %v3684_v31  ;;  %v3834_v42 = vpack.c.bf16 %v3685_v54, %v3684_v31  ;;  %v2781_v1 = vpop.f32.mrb[201].mxu1  ;;  %v2659_v43 = vpop.f32.mrb[201].mxu0 }
 0x325   : > { %v3801_v44 = vrot.slane %v3763_v38, 1  ;;  %v3614_v55 = vadd.f32 %v3598_v32, %v2779_v35  ;;  %v2783_v33 = vpop.f32.mrb[202].mxu1  ;;  %v2660_v45 = vpop.f32.mrb[202].mxu0  ;;  %v3653_v60 = vrot.slane %v2781_v1, 1  ;;  %v3996_v35 = vld [vmem:[%s5419_s15] sm:$0x1] }
 0x326   : > { %3983 = vst [vmem:[%s5338_s6 + $0x58] sm:$0xff] %v4324_v62  ;;  %v3724_v47 = vsel %vm842_vm0, %v3722_v37, %v3723_v34  ;;  %v3800_v36 = vrot.slane %v3762_v40, 1  ;;  %v3881_v53 = vshll.u32 %v3834_v42, 16  ;;  %v2785_v57 = vpop.f32.mrb[203].mxu1  ;;  %v2661_v58 = vpop.f32.mrb[203].mxu0  ;;  %v3615_v61 = vadd.f32 %v3599_v6, %v2783_v33 }
 0x327   : > { %v3741_v59 = vadd.f32 %v3740_v17, %v3724_v47  ;;  %v3654_v2 = vrot.slane %v2785_v57, 1  ;;  %v3879_v48 = vshrl.u32 %v3834_v42, 16  ;;  %v3993_v34 = vld [vmem:[%s5414_s12] sm:$0x1] }
 0x328   : > { %v3802_v51 = vsel %vm842_vm0, %v3800_v36, %v3801_v44  ;;  %v3883_v52 = vrot.slane %v3881_v53, 1 }
 0x329   : > { %v3819_v50 = vadd.f32 %v3818_v13, %v3802_v51  ;;  %v3655_v56 = vsel %vm842_vm0, %v3653_v60, %v3654_v2  ;;  %v3687_v49 = vadd.f32 %v3654_v2, %v3615_v61 }
 0x32a   : > { %v3884_v0 = vor.u32 %v3883_v52, %v3879_v48  ;;  %v3686_v5 = vadd.f32 %v3655_v56, %v3614_v55 }
 0x32b   : > { %v3726_v25 = vrot.slane %v3687_v49, 1  ;;  %v3765_v4 = vmul.f32 %v3687_v49, %v3687_v49 }
 0x32c   : > { %v4326_v7 = vcombine.low %v3510_v63, %v3884_v0  ;;  %v3725_v8 = vrot.slane %v3686_v5, 1  ;;  %v3764_v10 = vmul.f32 %v3686_v5, %v3686_v5  ;;  %v3835_v9 = vpack.c.bf16 %v3687_v49, %v3686_v5 }
 0x32d   : > { %v3804_v11 = vrot.slane %v3765_v4, 1 }
 0x32e   : > { %3985 = vst [vmem:[%s5338_s6 + $0x68] sm:$0xff] %v4326_v7  ;;  %v3727_v12 = vsel %vm842_vm0, %v3725_v8, %v3726_v25  ;;  %v3803_v14 = vrot.slane %v3764_v10, 1  ;;  %v3888_v3 = vshll.u32 %v3835_v9, 16  ;;  %v3886_v17 = vshrl.u32 %v3835_v9, 16 }
 0x32f   : > { %v3742_v15 = vadd.f32 %v3741_v59, %v3727_v12 }
 0x330   : > { %v3805_v16 = vsel %vm842_vm0, %v3803_v14, %v3804_v11  ;;  %v3890_v20 = vrot.slane %v3888_v3, 1 }
 0x331   : > { %v3743_v22 = vrot.slane %v3742_v15, 4  ;;  %v3820_v39 = vadd.f32 %v3819_v50, %v3805_v16 }
 0x332   : > { %v3891_v23 = vor.u32 %v3890_v20, %v3886_v17 }
 0x333   : > { %v3744_v18 = vadd.f32 %v3743_v22, %v3742_v15  ;;  %v3821_v26 = vrot.slane %v3820_v39, 4 }
 0x334   : > { %v4328_v27 = vcombine.low %v3511_v19, %v3891_v23 }
 0x335   : > { %v3745_v13 = vrot.slane %v3744_v18, 2  ;;  %v3822_v29 = vadd.f32 %v3821_v26, %v3820_v39 }
 0x336   : > { %3987 = vst [vmem:[%s5338_s6 + $0x78] sm:$0xff] %v4328_v27 }
 0x337   : > { %v3746_v54 = vadd.f32 %v3745_v13, %v3744_v18  ;;  %v3823_v28 = vrot.slane %v3822_v29, 2 }
 0x339   : > { %v3747_v30 = vrot.slane %v3746_v54, 1  ;;  %v3824_v31 = vadd.f32 %v3823_v28, %v3822_v29 }
 0x33b   : > { %v3748_v32 = vadd.f32 %v3747_v30, %v3746_v54  ;;  %v3825_v6 = vrot.slane %v3824_v31, 1 }
 0x33d   : > { %v3749_v38 = vadd.f32 %v3748_v32, %v5466_v46  ;;  %v3826_v41 = vadd.f32 %v3825_v6, %v3824_v31 }
 0x33f   : > { %v3827_v21 = vadd.f32 %v3826_v41, %v5469_v24  ;;  %v3994_v62 = vadd.f32 %v3993_v34, %v3749_v38 }
 0x341   : > { %3995 = vst [vmem:[%s5414_s12] sm:$0x1] %v3994_v62  ;;  %v3997_v37 = vadd.f32 %v3996_v35, %v3827_v21 }
 0x343   : > { %3998 = vst [vmem:[%s5419_s15] sm:$0x1] %v3997_v37 }
 0x344 PF: > { %s16_s20 = sadd.s32 1, %s4441_s20   ;;  %s5548_s18 = smov %s4437_s19 }
 0x345   : > { %p13_p6 = scmp.ge.s32.totalorder %s16_s20, 4   ;;  %s5549_s19 = smov %s5551_s21 }
 0x347   :  { %15 = sbr.rel (!%p13_p6) target bundleno = 2 (0x2), region = 95 }

</bundles_post_ra>
